<compile_context>
chip_gen: v5e
topology: v5e:2x2
jax: 0.10.0
libtpu: 0.0.40
codegen_flags: <defaults>
</compile_context>

<pallas_src>
import math

import jax
import jax.numpy as jnp
from jax import lax
from jax.experimental import pallas as pl
from jax.experimental.pallas import tpu as pltpu


# ----------------------------------------------------------------------------
# Single fused kernel: encoder time loop + autoregressive decoder.
# ----------------------------------------------------------------------------
def _make_forecast_kernel(num_layers, hidden, seq_len, output_window):
    L, H, T, OW = num_layers, hidden, seq_len, output_window

    def kernel(*refs):
        # refs = [src,
        #         (enc_Wih, enc_Whh, enc_b) * L,
        #         (dec_Wih, dec_Whh, dec_b) * L,
        #         proj_w, proj_b, fc_w, fc_b,
        #         out]
        src_ref = refs[0]
        enc_refs = refs[1:1 + 3 * L]
        dec_refs = refs[1 + 3 * L:1 + 6 * L]
        proj_w_ref, proj_b_ref, fc_w_ref, fc_b_ref = refs[1 + 6 * L:5 + 6 * L]
        out_ref = refs[5 + 6 * L]

        B = src_ref.shape[1]

        # Hoist every weight/bias load (and its broadcast) out of the loops.
        enc_w = [(enc_refs[3 * l][...], enc_refs[3 * l + 1][...],
                  enc_refs[3 * l + 2][...]) for l in range(L)]
        dec_w = [(dec_refs[3 * l][...], dec_refs[3 * l + 1][...],
                  dec_refs[3 * l + 2][...]) for l in range(L)]
        proj_w = proj_w_ref[...]                 # (1, F)
        proj_b = proj_b_ref[...]                 # (1, F)
        fc_w = fc_w_ref[...]                     # (1, H)
        fc_b = fc_b_ref[...]                     # (1, 1)

        def cell(x, h, c, wih, whh, b):
            # Gate columns are pre-permuted host-side to (i, f, o, g):
            # sigmoid over the first 3H lanes, tanh over the last H lanes.
            gates = (jnp.dot(x, wih, preferred_element_type=jnp.float32)
                     + jnp.dot(h, whh, preferred_element_type=jnp.float32)
                     + b)
            sig = jax.nn.sigmoid(gates[:, 0:3 * H])
            g_g = jnp.tanh(gates[:, 3 * H:4 * H])
            i_g = sig[:, 0:H]
            f_g = sig[:, H:2 * H]
            o_g = sig[:, 2 * H:3 * H]
            c_new = f_g * c + i_g * g_g
            h_new = o_g * jnp.tanh(c_new)
            return h_new, c_new

        # ------------------ encoder: serial recurrence over time ------------------
        zeros = tuple(jnp.zeros((B, H), jnp.float32) for _ in range(L))

        if T <= 32:
            # Short fixed trip count: straight-line code for LLO visibility.
            h = list(zeros)
            c = list(zeros)
            for t in range(T):
                x = src_ref[t]                                   # (B, F)
                for l in range(L):
                    h[l], c[l] = cell(x, h[l], c[l], *enc_w[l])
                    x = h[l]
        else:
            def enc_step(t, carry):
                hs, cs = carry
                x = src_ref[t]                                   # (B, F)
                new_hs, new_cs = [], []
                for l in range(L):
                    h_new, c_new = cell(x, hs[l], cs[l], *enc_w[l])
                    new_hs.append(h_new)
                    new_cs.append(c_new)
                    x = h_new
                return tuple(new_hs), tuple(new_cs)

            hs, cs = lax.fori_loop(0, T, enc_step, (zeros, zeros))
            h = list(hs)
            c = list(cs)

        # ------------------ decoder: autoregressive, OW steps ---------------------
        dec = src_ref[T - 1][:, 0:1]             # decoder_input = src[:, -1:, 0:1]
        preds = []
        for _ in range(OW):
            # proj = Linear(1, F): K=1 -> pure VPU broadcast multiply-add.
            x = dec * proj_w + proj_b            # (B, F)
            for l in range(L):
                h[l], c[l] = cell(x, h[l], c[l], *dec_w[l])
                x = h[l]
            # fc = Linear(H, 1): N=1 -> lane reduction.
            pred = jnp.sum(x * fc_w, axis=-1, keepdims=True) + fc_b   # (B, 1)
            preds.append(pred)
            dec = pred

        # Single (B, OW) store instead of OW width-1 masked column stores.
        out_ref[...] = jnp.concatenate(preds, axis=-1)

    return kernel


# ----------------------------------------------------------------------------
# ForecastNet forward pass (Pallas version).
# ----------------------------------------------------------------------------
def forecastnet_forward(src, params, output_window):
    # Host-side (trace-time, cached under jit) gate-column permutation
    # (i, f, g, o) -> (i, f, o, g) so the in-kernel EUP passes are contiguous.
    def reorder(a):
        i_g, f_g, g_g, o_g = jnp.split(a, 4, axis=-1)
        return jnp.concatenate([i_g, f_g, o_g, g_g], axis=-1)

    enc = [(reorder(wih), reorder(whh), reorder(b))
           for wih, whh, b in params["encoder"]]
    dec = [(reorder(wih), reorder(whh), reorder(b))
           for wih, whh, b in params["decoder"]]
    fc_w, fc_b = params["fc"]          # (H, 1), (1, 1)
    proj_w, proj_b = params["proj"]    # (1, F), (1, F)

    B, T, F = src.shape
    L = len(enc)
    H = enc[0][1].shape[0]

    # Pad batch to a multiple of 8 sublanes; padded rows are row-local garbage
    # and are sliced off at the end.
    B_pad = max(8, ((B + 7) // 8) * 8)
    pad = B_pad - B
    src_p = jnp.pad(src, ((0, pad), (0, 0), (0, 0))) if pad else src

    # One-time layout plumbing: time-major so the in-kernel loop indexes
    # contiguous (B, F) slabs.
    src_t = jnp.transpose(src_p, (1, 0, 2))          # (T, B_pad, F)

    args = [src_t]
    for wih, whh, b in enc:
        args.extend([wih, whh, b])
    for wih, whh, b in dec:
        args.extend([wih, whh, b])
    args.extend([proj_w, proj_b, jnp.transpose(fc_w), fc_b])

    vmem = pl.BlockSpec(memory_space=pltpu.MemorySpace.VMEM)

    preds = pl.pallas_call(
        _make_forecast_kernel(L, H, T, output_window),
        in_specs=[vmem] * len(args),
        out_specs=vmem,
        out_shape=jax.ShapeDtypeStruct((B_pad, output_window), jnp.float32),
    )(*args)                                         # (B_pad, OW)

    # torch.cat(outputs, dim=1) of (B,1,1) tensors -> (B, output_window, 1)
    return preds[:B, :, None]


# ----------------------------------------------------------------------------
# Pure-JAX reference (mirrors PyTorch LSTM equations) for verification.
# ----------------------------------------------------------------------------
def _ref_cell(x, h, c, wih, whh, b):
    gates = x @ wih + h @ whh + b
    i_g, f_g, g_g, o_g = jnp.split(gates, 4, axis=-1)
    i_g = jax.nn.sigmoid(i_g)
    f_g = jax.nn.sigmoid(f_g)
    g_g = jnp.tanh(g_g)
    o_g = jax.nn.sigmoid(o_g)
    c_new = f_g * c + i_g * g_g
    return o_g * jnp.tanh(c_new), c_new


def ref_forward(src, params, output_window):
    enc_params = params["encoder"]
    dec_params = params["decoder"]
    fc_w, fc_b = params["fc"]
    proj_w, proj_b = params["proj"]

    B = src.shape[0]
    L = len(enc_params)
    H = enc_params[0][1].shape[1] // 4

    hidden = [jnp.zeros((B, H), jnp.float32) for _ in range(L)]
    cell = [jnp.zeros((B, H), jnp.float32) for _ in range(L)]

    layer_input = src
    for l, (wih, whh, b) in enumerate(enc_params):
        outs = []
        h, c = hidden[l], cell[l]
        for t in range(src.shape[1]):
            h, c = _ref_cell(layer_input[:, t], h, c, wih, whh, b)
            outs.append(h)
        layer_input = jnp.stack(outs, axis=1)
        hidden[l], cell[l] = h, c

    decoder_input = src[:, -1, 0:1]
    outputs = []
    for _ in range(output_window):
        x = decoder_input @ proj_w + proj_b
        for l, (wih, whh, b) in enumerate(dec_params):
            hidden[l], cell[l] = _ref_cell(x, hidden[l], cell[l], wih, whh, b)
            x = hidden[l]
        pred = x @ fc_w + fc_b
        outputs.append(pred)
        decoder_input = pred
    return jnp.stack(outputs, axis=1)


# ----------------------------------------------------------------------------
# Deterministic parameter init (PyTorch-style uniform(-1/sqrt(H), 1/sqrt(H)))
# ----------------------------------------------------------------------------
def init_lstm_params(key, input_size, hidden, num_layers):
    params = []
    bound = 1.0 / math.sqrt(hidden)
    for l in range(num_layers):
        in_size = input_size if l == 0 else hidden
        key, k1, k2, k3, k4 = jax.random.split(key, 5)
        wih = jax.random.uniform(k1, (in_size, 4 * hidden), jnp.float32, -bound, bound)
        whh = jax.random.uniform(k2, (hidden, 4 * hidden), jnp.float32, -bound, bound)
        bih = jax.random.uniform(k3, (4 * hidden,), jnp.float32, -bound, bound)
        bhh = jax.random.uniform(k4, (4 * hidden,), jnp.float32, -bound, bound)
        params.append((wih, whh, (bih + bhh).reshape(1, 4 * hidden)))
    return params, key


def init_forecastnet_params(key, num_features, hidden, num_layers):
    enc, key = init_lstm_params(key, num_features, hidden, num_layers)
    dec, key = init_lstm_params(key, num_features, hidden, num_layers)

    key, k1, k2, k3, k4 = jax.random.split(key, 5)
    fc_bound = 1.0 / math.sqrt(hidden)
    fc_w = jax.random.uniform(k1, (hidden, 1), jnp.float32, -fc_bound, fc_bound)
    fc_b = jax.random.uniform(k2, (1, 1), jnp.float32, -fc_bound, fc_bound)
    proj_bound = 1.0  # Linear(1, num_features): fan_in = 1
    proj_w = jax.random.uniform(k3, (1, num_features), jnp.float32, -proj_bound, proj_bound)
    proj_b = jax.random.uniform(k4, (1, num_features), jnp.float32, -proj_bound, proj_bound)

    return {"encoder": enc, "decoder": dec,
            "fc": (fc_w, fc_b), "proj": (proj_w, proj_b)}


if __name__ == "__main__":
    # Small shapes consistent with the module's forward.
    B, T, F, H, L, OW = 2, 8, 4, 32, 2, 4

    key = jax.random.PRNGKey(0)
    key, pkey, xkey = jax.random.split(key, 3)
    params = init_forecastnet_params(pkey, num_features=F, hidden=H, num_layers=L)
    src = jax.random.normal(xkey, (B, T, F), jnp.float32)

    fwd = jax.jit(forecastnet_forward, static_argnums=2)
    out = jax.block_until_ready(fwd(src, params, OW))

    assert out.shape == (B, OW, 1), out.shape

    ref = jax.block_until_ready(ref_forward(src, params, output_window=OW))
    assert jnp.allclose(out, ref, atol=1e-4, rtol=1e-4), \
        f"max abs diff {jnp.max(jnp.abs(out - ref))}"

    print("KERNEL_OK")
</pallas_src>

<mosaic_0001>
module attributes {stable_mosaic.version = 11 : i64} {
  func.func @kernel(%arg0: memref<8x8x4xf32, #tpu.memory_space<vmem>>, %arg1: memref<4x128xf32, #tpu.memory_space<vmem>>, %arg2: memref<32x128xf32, #tpu.memory_space<vmem>>, %arg3: memref<1x128xf32, #tpu.memory_space<vmem>>, %arg4: memref<32x128xf32, #tpu.memory_space<vmem>>, %arg5: memref<32x128xf32, #tpu.memory_space<vmem>>, %arg6: memref<1x128xf32, #tpu.memory_space<vmem>>, %arg7: memref<4x128xf32, #tpu.memory_space<vmem>>, %arg8: memref<32x128xf32, #tpu.memory_space<vmem>>, %arg9: memref<1x128xf32, #tpu.memory_space<vmem>>, %arg10: memref<32x128xf32, #tpu.memory_space<vmem>>, %arg11: memref<32x128xf32, #tpu.memory_space<vmem>>, %arg12: memref<1x128xf32, #tpu.memory_space<vmem>>, %arg13: memref<1x4xf32, #tpu.memory_space<vmem>>, %arg14: memref<1x4xf32, #tpu.memory_space<vmem>>, %arg15: memref<1x32xf32, #tpu.memory_space<vmem>>, %arg16: memref<1x1xf32, #tpu.memory_space<vmem>>, %arg17: memref<8x4xf32, #tpu.memory_space<vmem>>) attributes {dimension_semantics = [], scalar_prefetch = 0 : i64, scratch_operands = 0 : i64, tpu.core_type = #tpu.core_type<tc>} {
    %c0 = arith.constant 0 : index
    %c0_0 = arith.constant 0 : index
    %0 = vector.load %arg1[%c0, %c0_0] : memref<4x128xf32, #tpu.memory_space<vmem>>, vector<4x128xf32>
    %c0_1 = arith.constant 0 : index
    %c0_2 = arith.constant 0 : index
    %1 = vector.load %arg2[%c0_1, %c0_2] : memref<32x128xf32, #tpu.memory_space<vmem>>, vector<32x128xf32>
    %c0_3 = arith.constant 0 : index
    %c0_4 = arith.constant 0 : index
    %2 = vector.load %arg3[%c0_3, %c0_4] : memref<1x128xf32, #tpu.memory_space<vmem>>, vector<1x128xf32>
    %c0_5 = arith.constant 0 : index
    %c0_6 = arith.constant 0 : index
    %3 = vector.load %arg4[%c0_5, %c0_6] : memref<32x128xf32, #tpu.memory_space<vmem>>, vector<32x128xf32>
    %c0_7 = arith.constant 0 : index
    %c0_8 = arith.constant 0 : index
    %4 = vector.load %arg5[%c0_7, %c0_8] : memref<32x128xf32, #tpu.memory_space<vmem>>, vector<32x128xf32>
    %c0_9 = arith.constant 0 : index
    %c0_10 = arith.constant 0 : index
    %5 = vector.load %arg6[%c0_9, %c0_10] : memref<1x128xf32, #tpu.memory_space<vmem>>, vector<1x128xf32>
    %c0_11 = arith.constant 0 : index
    %c0_12 = arith.constant 0 : index
    %6 = vector.load %arg7[%c0_11, %c0_12] : memref<4x128xf32, #tpu.memory_space<vmem>>, vector<4x128xf32>
    %c0_13 = arith.constant 0 : index
    %c0_14 = arith.constant 0 : index
    %7 = vector.load %arg8[%c0_13, %c0_14] : memref<32x128xf32, #tpu.memory_space<vmem>>, vector<32x128xf32>
    %c0_15 = arith.constant 0 : index
    %c0_16 = arith.constant 0 : index
    %8 = vector.load %arg9[%c0_15, %c0_16] : memref<1x128xf32, #tpu.memory_space<vmem>>, vector<1x128xf32>
    %c0_17 = arith.constant 0 : index
    %c0_18 = arith.constant 0 : index
    %9 = vector.load %arg10[%c0_17, %c0_18] : memref<32x128xf32, #tpu.memory_space<vmem>>, vector<32x128xf32>
    %c0_19 = arith.constant 0 : index
    %c0_20 = arith.constant 0 : index
    %10 = vector.load %arg11[%c0_19, %c0_20] : memref<32x128xf32, #tpu.memory_space<vmem>>, vector<32x128xf32>
    %c0_21 = arith.constant 0 : index
    %c0_22 = arith.constant 0 : index
    %11 = vector.load %arg12[%c0_21, %c0_22] : memref<1x128xf32, #tpu.memory_space<vmem>>, vector<1x128xf32>
    %c0_23 = arith.constant 0 : index
    %c0_24 = arith.constant 0 : index
    %12 = vector.load %arg13[%c0_23, %c0_24] : memref<1x4xf32, #tpu.memory_space<vmem>>, vector<1x4xf32>
    %c0_25 = arith.constant 0 : index
    %c0_26 = arith.constant 0 : index
    %13 = vector.load %arg14[%c0_25, %c0_26] : memref<1x4xf32, #tpu.memory_space<vmem>>, vector<1x4xf32>
    %c0_27 = arith.constant 0 : index
    %c0_28 = arith.constant 0 : index
    %14 = vector.load %arg15[%c0_27, %c0_28] : memref<1x32xf32, #tpu.memory_space<vmem>>, vector<1x32xf32>
    %c0_29 = arith.constant 0 : index
    %c0_30 = arith.constant 0 : index
    %15 = vector.load %arg16[%c0_29, %c0_30] : memref<1x1xf32, #tpu.memory_space<vmem>>, vector<1x1xf32>
    %cst = arith.constant 0.000000e+00 : f32
    %16 = vector.broadcast %cst : f32 to vector<8x32xf32>
    %cst_31 = arith.constant 0.000000e+00 : f32
    %17 = vector.broadcast %cst_31 : f32 to vector<8x32xf32>
    %c0_32 = arith.constant 0 : index
    %c0_33 = arith.constant 0 : index
    %c0_34 = arith.constant 0 : index
    %18 = vector.load %arg0[%c0_32, %c0_33, %c0_34] : memref<8x8x4xf32, #tpu.memory_space<vmem>>, vector<1x8x4xf32>
    %19 = vector.shape_cast %18 : vector<1x8x4xf32> to vector<8x4xf32>
    %cst_35 = arith.constant dense<0.000000e+00> : vector<8x128xf32>
    %20 = tpu.matmul %19, %0, %cst_35 {dimension_numbers = #tpu.dot_dimension_numbers<[1], [0], [0], [1], [0, 0, 1, 1], [], []>} : vector<8x4xf32>, vector<4x128xf32>, vector<8x128xf32> -> vector<8x128xf32>
    %cst_36 = arith.constant dense<0.000000e+00> : vector<8x128xf32>
    %21 = tpu.matmul %16, %1, %cst_36 {dimension_numbers = #tpu.dot_dimension_numbers<[1], [0], [0], [1], [0, 0, 1, 1], [], []>} : vector<8x32xf32>, vector<32x128xf32>, vector<8x128xf32> -> vector<8x128xf32>
    %22 = arith.addf %20, %21 : vector<8x128xf32>
    %23 = vector.broadcast %2 : vector<1x128xf32> to vector<8x128xf32>
    %24 = arith.addf %22, %23 : vector<8x128xf32>
    %25 = vector.extract_strided_slice %24 {offsets = [0, 0], sizes = [8, 96], strides = [1, 1]} : vector<8x128xf32> to vector<8x96xf32>
    %26 = arith.negf %25 : vector<8x96xf32>
    %27 = math.exp %26 : vector<8x96xf32>
    %cst_37 = arith.constant 1.000000e+00 : f32
    %28 = vector.broadcast %cst_37 : f32 to vector<8x96xf32>
    %29 = arith.addf %28, %27 : vector<8x96xf32>
    %30 = arith.divf %28, %29 : vector<8x96xf32>
    %31 = vector.extract_strided_slice %24 {offsets = [0, 96], sizes = [8, 32], strides = [1, 1]} : vector<8x128xf32> to vector<8x32xf32>
    %32 = math.tanh %31 : vector<8x32xf32>
    %33 = vector.extract_strided_slice %30 {offsets = [0, 0], sizes = [8, 32], strides = [1, 1]} : vector<8x96xf32> to vector<8x32xf32>
    %34 = vector.extract_strided_slice %30 {offsets = [0, 32], sizes = [8, 32], strides = [1, 1]} : vector<8x96xf32> to vector<8x32xf32>
    %35 = vector.extract_strided_slice %30 {offsets = [0, 64], sizes = [8, 32], strides = [1, 1]} : vector<8x96xf32> to vector<8x32xf32>
    %36 = arith.mulf %34, %16 : vector<8x32xf32>
    %37 = arith.mulf %33, %32 : vector<8x32xf32>
    %38 = arith.addf %36, %37 : vector<8x32xf32>
    %39 = math.tanh %38 : vector<8x32xf32>
    %40 = arith.mulf %35, %39 : vector<8x32xf32>
    %cst_38 = arith.constant dense<0.000000e+00> : vector<8x128xf32>
    %41 = tpu.matmul %40, %3, %cst_38 {dimension_numbers = #tpu.dot_dimension_numbers<[1], [0], [0], [1], [0, 0, 1, 1], [], []>} : vector<8x32xf32>, vector<32x128xf32>, vector<8x128xf32> -> vector<8x128xf32>
    %cst_39 = arith.constant dense<0.000000e+00> : vector<8x128xf32>
    %42 = tpu.matmul %17, %4, %cst_39 {dimension_numbers = #tpu.dot_dimension_numbers<[1], [0], [0], [1], [0, 0, 1, 1], [], []>} : vector<8x32xf32>, vector<32x128xf32>, vector<8x128xf32> -> vector<8x128xf32>
    %43 = arith.addf %41, %42 : vector<8x128xf32>
    %44 = vector.broadcast %5 : vector<1x128xf32> to vector<8x128xf32>
    %45 = arith.addf %43, %44 : vector<8x128xf32>
    %46 = vector.extract_strided_slice %45 {offsets = [0, 0], sizes = [8, 96], strides = [1, 1]} : vector<8x128xf32> to vector<8x96xf32>
    %47 = arith.negf %46 : vector<8x96xf32>
    %48 = math.exp %47 : vector<8x96xf32>
    %cst_40 = arith.constant 1.000000e+00 : f32
    %49 = vector.broadcast %cst_40 : f32 to vector<8x96xf32>
    %50 = arith.addf %49, %48 : vector<8x96xf32>
    %51 = arith.divf %49, %50 : vector<8x96xf32>
    %52 = vector.extract_strided_slice %45 {offsets = [0, 96], sizes = [8, 32], strides = [1, 1]} : vector<8x128xf32> to vector<8x32xf32>
    %53 = math.tanh %52 : vector<8x32xf32>
    %54 = vector.extract_strided_slice %51 {offsets = [0, 0], sizes = [8, 32], strides = [1, 1]} : vector<8x96xf32> to vector<8x32xf32>
    %55 = vector.extract_strided_slice %51 {offsets = [0, 32], sizes = [8, 32], strides = [1, 1]} : vector<8x96xf32> to vector<8x32xf32>
    %56 = vector.extract_strided_slice %51 {offsets = [0, 64], sizes = [8, 32], strides = [1, 1]} : vector<8x96xf32> to vector<8x32xf32>
    %57 = arith.mulf %55, %17 : vector<8x32xf32>
    %58 = arith.mulf %54, %53 : vector<8x32xf32>
    %59 = arith.addf %57, %58 : vector<8x32xf32>
    %60 = math.tanh %59 : vector<8x32xf32>
    %61 = arith.mulf %56, %60 : vector<8x32xf32>
    %c1 = arith.constant 1 : index
    %c0_41 = arith.constant 0 : index
    %c0_42 = arith.constant 0 : index
    %62 = vector.load %arg0[%c1, %c0_41, %c0_42] : memref<8x8x4xf32, #tpu.memory_space<vmem>>, vector<1x8x4xf32>
    %63 = vector.shape_cast %62 : vector<1x8x4xf32> to vector<8x4xf32>
    %cst_43 = arith.constant dense<0.000000e+00> : vector<8x128xf32>
    %64 = tpu.matmul %63, %0, %cst_43 {dimension_numbers = #tpu.dot_dimension_numbers<[1], [0], [0], [1], [0, 0, 1, 1], [], []>} : vector<8x4xf32>, vector<4x128xf32>, vector<8x128xf32> -> vector<8x128xf32>
    %cst_44 = arith.constant dense<0.000000e+00> : vector<8x128xf32>
    %65 = tpu.matmul %40, %1, %cst_44 {dimension_numbers = #tpu.dot_dimension_numbers<[1], [0], [0], [1], [0, 0, 1, 1], [], []>} : vector<8x32xf32>, vector<32x128xf32>, vector<8x128xf32> -> vector<8x128xf32>
    %66 = arith.addf %64, %65 : vector<8x128xf32>
    %67 = vector.broadcast %2 : vector<1x128xf32> to vector<8x128xf32>
    %68 = arith.addf %66, %67 : vector<8x128xf32>
    %69 = vector.extract_strided_slice %68 {offsets = [0, 0], sizes = [8, 96], strides = [1, 1]} : vector<8x128xf32> to vector<8x96xf32>
    %70 = arith.negf %69 : vector<8x96xf32>
    %71 = math.exp %70 : vector<8x96xf32>
    %cst_45 = arith.constant 1.000000e+00 : f32
    %72 = vector.broadcast %cst_45 : f32 to vector<8x96xf32>
    %73 = arith.addf %72, %71 : vector<8x96xf32>
    %74 = arith.divf %72, %73 : vector<8x96xf32>
    %75 = vector.extract_strided_slice %68 {offsets = [0, 96], sizes = [8, 32], strides = [1, 1]} : vector<8x128xf32> to vector<8x32xf32>
    %76 = math.tanh %75 : vector<8x32xf32>
    %77 = vector.extract_strided_slice %74 {offsets = [0, 0], sizes = [8, 32], strides = [1, 1]} : vector<8x96xf32> to vector<8x32xf32>
    %78 = vector.extract_strided_slice %74 {offsets = [0, 32], sizes = [8, 32], strides = [1, 1]} : vector<8x96xf32> to vector<8x32xf32>
    %79 = vector.extract_strided_slice %74 {offsets = [0, 64], sizes = [8, 32], strides = [1, 1]} : vector<8x96xf32> to vector<8x32xf32>
    %80 = arith.mulf %78, %38 : vector<8x32xf32>
    %81 = arith.mulf %77, %76 : vector<8x32xf32>
    %82 = arith.addf %80, %81 : vector<8x32xf32>
    %83 = math.tanh %82 : vector<8x32xf32>
    %84 = arith.mulf %79, %83 : vector<8x32xf32>
    %cst_46 = arith.constant dense<0.000000e+00> : vector<8x128xf32>
    %85 = tpu.matmul %84, %3, %cst_46 {dimension_numbers = #tpu.dot_dimension_numbers<[1], [0], [0], [1], [0, 0, 1, 1], [], []>} : vector<8x32xf32>, vector<32x128xf32>, vector<8x128xf32> -> vector<8x128xf32>
    %cst_47 = arith.constant dense<0.000000e+00> : vector<8x128xf32>
    %86 = tpu.matmul %61, %4, %cst_47 {dimension_numbers = #tpu.dot_dimension_numbers<[1], [0], [0], [1], [0, 0, 1, 1], [], []>} : vector<8x32xf32>, vector<32x128xf32>, vector<8x128xf32> -> vector<8x128xf32>
    %87 = arith.addf %85, %86 : vector<8x128xf32>
    %88 = vector.broadcast %5 : vector<1x128xf32> to vector<8x128xf32>
    %89 = arith.addf %87, %88 : vector<8x128xf32>
    %90 = vector.extract_strided_slice %89 {offsets = [0, 0], sizes = [8, 96], strides = [1, 1]} : vector<8x128xf32> to vector<8x96xf32>
    %91 = arith.negf %90 : vector<8x96xf32>
    %92 = math.exp %91 : vector<8x96xf32>
    %cst_48 = arith.constant 1.000000e+00 : f32
    %93 = vector.broadcast %cst_48 : f32 to vector<8x96xf32>
    %94 = arith.addf %93, %92 : vector<8x96xf32>
    %95 = arith.divf %93, %94 : vector<8x96xf32>
    %96 = vector.extract_strided_slice %89 {offsets = [0, 96], sizes = [8, 32], strides = [1, 1]} : vector<8x128xf32> to vector<8x32xf32>
    %97 = math.tanh %96 : vector<8x32xf32>
    %98 = vector.extract_strided_slice %95 {offsets = [0, 0], sizes = [8, 32], strides = [1, 1]} : vector<8x96xf32> to vector<8x32xf32>
    %99 = vector.extract_strided_slice %95 {offsets = [0, 32], sizes = [8, 32], strides = [1, 1]} : vector<8x96xf32> to vector<8x32xf32>
    %100 = vector.extract_strided_slice %95 {offsets = [0, 64], sizes = [8, 32], strides = [1, 1]} : vector<8x96xf32> to vector<8x32xf32>
    %101 = arith.mulf %99, %59 : vector<8x32xf32>
    %102 = arith.mulf %98, %97 : vector<8x32xf32>
    %103 = arith.addf %101, %102 : vector<8x32xf32>
    %104 = math.tanh %103 : vector<8x32xf32>
    %105 = arith.mulf %100, %104 : vector<8x32xf32>
    %c2 = arith.constant 2 : index
    %c0_49 = arith.constant 0 : index
    %c0_50 = arith.constant 0 : index
    %106 = vector.load %arg0[%c2, %c0_49, %c0_50] : memref<8x8x4xf32, #tpu.memory_space<vmem>>, vector<1x8x4xf32>
    %107 = vector.shape_cast %106 : vector<1x8x4xf32> to vector<8x4xf32>
    %cst_51 = arith.constant dense<0.000000e+00> : vector<8x128xf32>
    %108 = tpu.matmul %107, %0, %cst_51 {dimension_numbers = #tpu.dot_dimension_numbers<[1], [0], [0], [1], [0, 0, 1, 1], [], []>} : vector<8x4xf32>, vector<4x128xf32>, vector<8x128xf32> -> vector<8x128xf32>
    %cst_52 = arith.constant dense<0.000000e+00> : vector<8x128xf32>
    %109 = tpu.matmul %84, %1, %cst_52 {dimension_numbers = #tpu.dot_dimension_numbers<[1], [0], [0], [1], [0, 0, 1, 1], [], []>} : vector<8x32xf32>, vector<32x128xf32>, vector<8x128xf32> -> vector<8x128xf32>
    %110 = arith.addf %108, %109 : vector<8x128xf32>
    %111 = vector.broadcast %2 : vector<1x128xf32> to vector<8x128xf32>
    %112 = arith.addf %110, %111 : vector<8x128xf32>
    %113 = vector.extract_strided_slice %112 {offsets = [0, 0], sizes = [8, 96], strides = [1, 1]} : vector<8x128xf32> to vector<8x96xf32>
    %114 = arith.negf %113 : vector<8x96xf32>
    %115 = math.exp %114 : vector<8x96xf32>
    %cst_53 = arith.constant 1.000000e+00 : f32
    %116 = vector.broadcast %cst_53 : f32 to vector<8x96xf32>
    %117 = arith.addf %116, %115 : vector<8x96xf32>
    %118 = arith.divf %116, %117 : vector<8x96xf32>
    %119 = vector.extract_strided_slice %112 {offsets = [0, 96], sizes = [8, 32], strides = [1, 1]} : vector<8x128xf32> to vector<8x32xf32>
    %120 = math.tanh %119 : vector<8x32xf32>
    %121 = vector.extract_strided_slice %118 {offsets = [0, 0], sizes = [8, 32], strides = [1, 1]} : vector<8x96xf32> to vector<8x32xf32>
    %122 = vector.extract_strided_slice %118 {offsets = [0, 32], sizes = [8, 32], strides = [1, 1]} : vector<8x96xf32> to vector<8x32xf32>
    %123 = vector.extract_strided_slice %118 {offsets = [0, 64], sizes = [8, 32], strides = [1, 1]} : vector<8x96xf32> to vector<8x32xf32>
    %124 = arith.mulf %122, %82 : vector<8x32xf32>
    %125 = arith.mulf %121, %120 : vector<8x32xf32>
    %126 = arith.addf %124, %125 : vector<8x32xf32>
    %127 = math.tanh %126 : vector<8x32xf32>
    %128 = arith.mulf %123, %127 : vector<8x32xf32>
    %cst_54 = arith.constant dense<0.000000e+00> : vector<8x128xf32>
    %129 = tpu.matmul %128, %3, %cst_54 {dimension_numbers = #tpu.dot_dimension_numbers<[1], [0], [0], [1], [0, 0, 1, 1], [], []>} : vector<8x32xf32>, vector<32x128xf32>, vector<8x128xf32> -> vector<8x128xf32>
    %cst_55 = arith.constant dense<0.000000e+00> : vector<8x128xf32>
    %130 = tpu.matmul %105, %4, %cst_55 {dimension_numbers = #tpu.dot_dimension_numbers<[1], [0], [0], [1], [0, 0, 1, 1], [], []>} : vector<8x32xf32>, vector<32x128xf32>, vector<8x128xf32> -> vector<8x128xf32>
    %131 = arith.addf %129, %130 : vector<8x128xf32>
    %132 = vector.broadcast %5 : vector<1x128xf32> to vector<8x128xf32>
    %133 = arith.addf %131, %132 : vector<8x128xf32>
    %134 = vector.extract_strided_slice %133 {offsets = [0, 0], sizes = [8, 96], strides = [1, 1]} : vector<8x128xf32> to vector<8x96xf32>
    %135 = arith.negf %134 : vector<8x96xf32>
    %136 = math.exp %135 : vector<8x96xf32>
    %cst_56 = arith.constant 1.000000e+00 : f32
    %137 = vector.broadcast %cst_56 : f32 to vector<8x96xf32>
    %138 = arith.addf %137, %136 : vector<8x96xf32>
    %139 = arith.divf %137, %138 : vector<8x96xf32>
    %140 = vector.extract_strided_slice %133 {offsets = [0, 96], sizes = [8, 32], strides = [1, 1]} : vector<8x128xf32> to vector<8x32xf32>
    %141 = math.tanh %140 : vector<8x32xf32>
    %142 = vector.extract_strided_slice %139 {offsets = [0, 0], sizes = [8, 32], strides = [1, 1]} : vector<8x96xf32> to vector<8x32xf32>
    %143 = vector.extract_strided_slice %139 {offsets = [0, 32], sizes = [8, 32], strides = [1, 1]} : vector<8x96xf32> to vector<8x32xf32>
    %144 = vector.extract_strided_slice %139 {offsets = [0, 64], sizes = [8, 32], strides = [1, 1]} : vector<8x96xf32> to vector<8x32xf32>
    %145 = arith.mulf %143, %103 : vector<8x32xf32>
    %146 = arith.mulf %142, %141 : vector<8x32xf32>
    %147 = arith.addf %145, %146 : vector<8x32xf32>
    %148 = math.tanh %147 : vector<8x32xf32>
    %149 = arith.mulf %144, %148 : vector<8x32xf32>
    %c3 = arith.constant 3 : index
    %c0_57 = arith.constant 0 : index
    %c0_58 = arith.constant 0 : index
    %150 = vector.load %arg0[%c3, %c0_57, %c0_58] : memref<8x8x4xf32, #tpu.memory_space<vmem>>, vector<1x8x4xf32>
    %151 = vector.shape_cast %150 : vector<1x8x4xf32> to vector<8x4xf32>
    %cst_59 = arith.constant dense<0.000000e+00> : vector<8x128xf32>
    %152 = tpu.matmul %151, %0, %cst_59 {dimension_numbers = #tpu.dot_dimension_numbers<[1], [0], [0], [1], [0, 0, 1, 1], [], []>} : vector<8x4xf32>, vector<4x128xf32>, vector<8x128xf32> -> vector<8x128xf32>
    %cst_60 = arith.constant dense<0.000000e+00> : vector<8x128xf32>
    %153 = tpu.matmul %128, %1, %cst_60 {dimension_numbers = #tpu.dot_dimension_numbers<[1], [0], [0], [1], [0, 0, 1, 1], [], []>} : vector<8x32xf32>, vector<32x128xf32>, vector<8x128xf32> -> vector<8x128xf32>
    %154 = arith.addf %152, %153 : vector<8x128xf32>
    %155 = vector.broadcast %2 : vector<1x128xf32> to vector<8x128xf32>
    %156 = arith.addf %154, %155 : vector<8x128xf32>
    %157 = vector.extract_strided_slice %156 {offsets = [0, 0], sizes = [8, 96], strides = [1, 1]} : vector<8x128xf32> to vector<8x96xf32>
    %158 = arith.negf %157 : vector<8x96xf32>
    %159 = math.exp %158 : vector<8x96xf32>
    %cst_61 = arith.constant 1.000000e+00 : f32
    %160 = vector.broadcast %cst_61 : f32 to vector<8x96xf32>
    %161 = arith.addf %160, %159 : vector<8x96xf32>
    %162 = arith.divf %160, %161 : vector<8x96xf32>
    %163 = vector.extract_strided_slice %156 {offsets = [0, 96], sizes = [8, 32], strides = [1, 1]} : vector<8x128xf32> to vector<8x32xf32>
    %164 = math.tanh %163 : vector<8x32xf32>
    %165 = vector.extract_strided_slice %162 {offsets = [0, 0], sizes = [8, 32], strides = [1, 1]} : vector<8x96xf32> to vector<8x32xf32>
    %166 = vector.extract_strided_slice %162 {offsets = [0, 32], sizes = [8, 32], strides = [1, 1]} : vector<8x96xf32> to vector<8x32xf32>
    %167 = vector.extract_strided_slice %162 {offsets = [0, 64], sizes = [8, 32], strides = [1, 1]} : vector<8x96xf32> to vector<8x32xf32>
    %168 = arith.mulf %166, %126 : vector<8x32xf32>
    %169 = arith.mulf %165, %164 : vector<8x32xf32>
    %170 = arith.addf %168, %169 : vector<8x32xf32>
    %171 = math.tanh %170 : vector<8x32xf32>
    %172 = arith.mulf %167, %171 : vector<8x32xf32>
    %cst_62 = arith.constant dense<0.000000e+00> : vector<8x128xf32>
    %173 = tpu.matmul %172, %3, %cst_62 {dimension_numbers = #tpu.dot_dimension_numbers<[1], [0], [0], [1], [0, 0, 1, 1], [], []>} : vector<8x32xf32>, vector<32x128xf32>, vector<8x128xf32> -> vector<8x128xf32>
    %cst_63 = arith.constant dense<0.000000e+00> : vector<8x128xf32>
    %174 = tpu.matmul %149, %4, %cst_63 {dimension_numbers = #tpu.dot_dimension_numbers<[1], [0], [0], [1], [0, 0, 1, 1], [], []>} : vector<8x32xf32>, vector<32x128xf32>, vector<8x128xf32> -> vector<8x128xf32>
    %175 = arith.addf %173, %174 : vector<8x128xf32>
    %176 = vector.broadcast %5 : vector<1x128xf32> to vector<8x128xf32>
    %177 = arith.addf %175, %176 : vector<8x128xf32>
    %178 = vector.extract_strided_slice %177 {offsets = [0, 0], sizes = [8, 96], strides = [1, 1]} : vector<8x128xf32> to vector<8x96xf32>
    %179 = arith.negf %178 : vector<8x96xf32>
    %180 = math.exp %179 : vector<8x96xf32>
    %cst_64 = arith.constant 1.000000e+00 : f32
    %181 = vector.broadcast %cst_64 : f32 to vector<8x96xf32>
    %182 = arith.addf %181, %180 : vector<8x96xf32>
    %183 = arith.divf %181, %182 : vector<8x96xf32>
    %184 = vector.extract_strided_slice %177 {offsets = [0, 96], sizes = [8, 32], strides = [1, 1]} : vector<8x128xf32> to vector<8x32xf32>
    %185 = math.tanh %184 : vector<8x32xf32>
    %186 = vector.extract_strided_slice %183 {offsets = [0, 0], sizes = [8, 32], strides = [1, 1]} : vector<8x96xf32> to vector<8x32xf32>
    %187 = vector.extract_strided_slice %183 {offsets = [0, 32], sizes = [8, 32], strides = [1, 1]} : vector<8x96xf32> to vector<8x32xf32>
    %188 = vector.extract_strided_slice %183 {offsets = [0, 64], sizes = [8, 32], strides = [1, 1]} : vector<8x96xf32> to vector<8x32xf32>
    %189 = arith.mulf %187, %147 : vector<8x32xf32>
    %190 = arith.mulf %186, %185 : vector<8x32xf32>
    %191 = arith.addf %189, %190 : vector<8x32xf32>
    %192 = math.tanh %191 : vector<8x32xf32>
    %193 = arith.mulf %188, %192 : vector<8x32xf32>
    %c4 = arith.constant 4 : index
    %c0_65 = arith.constant 0 : index
    %c0_66 = arith.constant 0 : index
    %194 = vector.load %arg0[%c4, %c0_65, %c0_66] : memref<8x8x4xf32, #tpu.memory_space<vmem>>, vector<1x8x4xf32>
    %195 = vector.shape_cast %194 : vector<1x8x4xf32> to vector<8x4xf32>
    %cst_67 = arith.constant dense<0.000000e+00> : vector<8x128xf32>
    %196 = tpu.matmul %195, %0, %cst_67 {dimension_numbers = #tpu.dot_dimension_numbers<[1], [0], [0], [1], [0, 0, 1, 1], [], []>} : vector<8x4xf32>, vector<4x128xf32>, vector<8x128xf32> -> vector<8x128xf32>
    %cst_68 = arith.constant dense<0.000000e+00> : vector<8x128xf32>
    %197 = tpu.matmul %172, %1, %cst_68 {dimension_numbers = #tpu.dot_dimension_numbers<[1], [0], [0], [1], [0, 0, 1, 1], [], []>} : vector<8x32xf32>, vector<32x128xf32>, vector<8x128xf32> -> vector<8x128xf32>
    %198 = arith.addf %196, %197 : vector<8x128xf32>
    %199 = vector.broadcast %2 : vector<1x128xf32> to vector<8x128xf32>
    %200 = arith.addf %198, %199 : vector<8x128xf32>
    %201 = vector.extract_strided_slice %200 {offsets = [0, 0], sizes = [8, 96], strides = [1, 1]} : vector<8x128xf32> to vector<8x96xf32>
    %202 = arith.negf %201 : vector<8x96xf32>
    %203 = math.exp %202 : vector<8x96xf32>
    %cst_69 = arith.constant 1.000000e+00 : f32
    %204 = vector.broadcast %cst_69 : f32 to vector<8x96xf32>
    %205 = arith.addf %204, %203 : vector<8x96xf32>
    %206 = arith.divf %204, %205 : vector<8x96xf32>
    %207 = vector.extract_strided_slice %200 {offsets = [0, 96], sizes = [8, 32], strides = [1, 1]} : vector<8x128xf32> to vector<8x32xf32>
    %208 = math.tanh %207 : vector<8x32xf32>
    %209 = vector.extract_strided_slice %206 {offsets = [0, 0], sizes = [8, 32], strides = [1, 1]} : vector<8x96xf32> to vector<8x32xf32>
    %210 = vector.extract_strided_slice %206 {offsets = [0, 32], sizes = [8, 32], strides = [1, 1]} : vector<8x96xf32> to vector<8x32xf32>
    %211 = vector.extract_strided_slice %206 {offsets = [0, 64], sizes = [8, 32], strides = [1, 1]} : vector<8x96xf32> to vector<8x32xf32>
    %212 = arith.mulf %210, %170 : vector<8x32xf32>
    %213 = arith.mulf %209, %208 : vector<8x32xf32>
    %214 = arith.addf %212, %213 : vector<8x32xf32>
    %215 = math.tanh %214 : vector<8x32xf32>
    %216 = arith.mulf %211, %215 : vector<8x32xf32>
    %cst_70 = arith.constant dense<0.000000e+00> : vector<8x128xf32>
    %217 = tpu.matmul %216, %3, %cst_70 {dimension_numbers = #tpu.dot_dimension_numbers<[1], [0], [0], [1], [0, 0, 1, 1], [], []>} : vector<8x32xf32>, vector<32x128xf32>, vector<8x128xf32> -> vector<8x128xf32>
    %cst_71 = arith.constant dense<0.000000e+00> : vector<8x128xf32>
    %218 = tpu.matmul %193, %4, %cst_71 {dimension_numbers = #tpu.dot_dimension_numbers<[1], [0], [0], [1], [0, 0, 1, 1], [], []>} : vector<8x32xf32>, vector<32x128xf32>, vector<8x128xf32> -> vector<8x128xf32>
    %219 = arith.addf %217, %218 : vector<8x128xf32>
    %220 = vector.broadcast %5 : vector<1x128xf32> to vector<8x128xf32>
    %221 = arith.addf %219, %220 : vector<8x128xf32>
    %222 = vector.extract_strided_slice %221 {offsets = [0, 0], sizes = [8, 96], strides = [1, 1]} : vector<8x128xf32> to vector<8x96xf32>
    %223 = arith.negf %222 : vector<8x96xf32>
    %224 = math.exp %223 : vector<8x96xf32>
    %cst_72 = arith.constant 1.000000e+00 : f32
    %225 = vector.broadcast %cst_72 : f32 to vector<8x96xf32>
    %226 = arith.addf %225, %224 : vector<8x96xf32>
    %227 = arith.divf %225, %226 : vector<8x96xf32>
    %228 = vector.extract_strided_slice %221 {offsets = [0, 96], sizes = [8, 32], strides = [1, 1]} : vector<8x128xf32> to vector<8x32xf32>
    %229 = math.tanh %228 : vector<8x32xf32>
    %230 = vector.extract_strided_slice %227 {offsets = [0, 0], sizes = [8, 32], strides = [1, 1]} : vector<8x96xf32> to vector<8x32xf32>
    %231 = vector.extract_strided_slice %227 {offsets = [0, 32], sizes = [8, 32], strides = [1, 1]} : vector<8x96xf32> to vector<8x32xf32>
    %232 = vector.extract_strided_slice %227 {offsets = [0, 64], sizes = [8, 32], strides = [1, 1]} : vector<8x96xf32> to vector<8x32xf32>
    %233 = arith.mulf %231, %191 : vector<8x32xf32>
    %234 = arith.mulf %230, %229 : vector<8x32xf32>
    %235 = arith.addf %233, %234 : vector<8x32xf32>
    %236 = math.tanh %235 : vector<8x32xf32>
    %237 = arith.mulf %232, %236 : vector<8x32xf32>
    %c5 = arith.constant 5 : index
    %c0_73 = arith.constant 0 : index
    %c0_74 = arith.constant 0 : index
    %238 = vector.load %arg0[%c5, %c0_73, %c0_74] : memref<8x8x4xf32, #tpu.memory_space<vmem>>, vector<1x8x4xf32>
    %239 = vector.shape_cast %238 : vector<1x8x4xf32> to vector<8x4xf32>
    %cst_75 = arith.constant dense<0.000000e+00> : vector<8x128xf32>
    %240 = tpu.matmul %239, %0, %cst_75 {dimension_numbers = #tpu.dot_dimension_numbers<[1], [0], [0], [1], [0, 0, 1, 1], [], []>} : vector<8x4xf32>, vector<4x128xf32>, vector<8x128xf32> -> vector<8x128xf32>
    %cst_76 = arith.constant dense<0.000000e+00> : vector<8x128xf32>
    %241 = tpu.matmul %216, %1, %cst_76 {dimension_numbers = #tpu.dot_dimension_numbers<[1], [0], [0], [1], [0, 0, 1, 1], [], []>} : vector<8x32xf32>, vector<32x128xf32>, vector<8x128xf32> -> vector<8x128xf32>
    %242 = arith.addf %240, %241 : vector<8x128xf32>
    %243 = vector.broadcast %2 : vector<1x128xf32> to vector<8x128xf32>
    %244 = arith.addf %242, %243 : vector<8x128xf32>
    %245 = vector.extract_strided_slice %244 {offsets = [0, 0], sizes = [8, 96], strides = [1, 1]} : vector<8x128xf32> to vector<8x96xf32>
    %246 = arith.negf %245 : vector<8x96xf32>
    %247 = math.exp %246 : vector<8x96xf32>
    %cst_77 = arith.constant 1.000000e+00 : f32
    %248 = vector.broadcast %cst_77 : f32 to vector<8x96xf32>
    %249 = arith.addf %248, %247 : vector<8x96xf32>
    %250 = arith.divf %248, %249 : vector<8x96xf32>
    %251 = vector.extract_strided_slice %244 {offsets = [0, 96], sizes = [8, 32], strides = [1, 1]} : vector<8x128xf32> to vector<8x32xf32>
    %252 = math.tanh %251 : vector<8x32xf32>
    %253 = vector.extract_strided_slice %250 {offsets = [0, 0], sizes = [8, 32], strides = [1, 1]} : vector<8x96xf32> to vector<8x32xf32>
    %254 = vector.extract_strided_slice %250 {offsets = [0, 32], sizes = [8, 32], strides = [1, 1]} : vector<8x96xf32> to vector<8x32xf32>
    %255 = vector.extract_strided_slice %250 {offsets = [0, 64], sizes = [8, 32], strides = [1, 1]} : vector<8x96xf32> to vector<8x32xf32>
    %256 = arith.mulf %254, %214 : vector<8x32xf32>
    %257 = arith.mulf %253, %252 : vector<8x32xf32>
    %258 = arith.addf %256, %257 : vector<8x32xf32>
    %259 = math.tanh %258 : vector<8x32xf32>
    %260 = arith.mulf %255, %259 : vector<8x32xf32>
    %cst_78 = arith.constant dense<0.000000e+00> : vector<8x128xf32>
    %261 = tpu.matmul %260, %3, %cst_78 {dimension_numbers = #tpu.dot_dimension_numbers<[1], [0], [0], [1], [0, 0, 1, 1], [], []>} : vector<8x32xf32>, vector<32x128xf32>, vector<8x128xf32> -> vector<8x128xf32>
    %cst_79 = arith.constant dense<0.000000e+00> : vector<8x128xf32>
    %262 = tpu.matmul %237, %4, %cst_79 {dimension_numbers = #tpu.dot_dimension_numbers<[1], [0], [0], [1], [0, 0, 1, 1], [], []>} : vector<8x32xf32>, vector<32x128xf32>, vector<8x128xf32> -> vector<8x128xf32>
    %263 = arith.addf %261, %262 : vector<8x128xf32>
    %264 = vector.broadcast %5 : vector<1x128xf32> to vector<8x128xf32>
    %265 = arith.addf %263, %264 : vector<8x128xf32>
    %266 = vector.extract_strided_slice %265 {offsets = [0, 0], sizes = [8, 96], strides = [1, 1]} : vector<8x128xf32> to vector<8x96xf32>
    %267 = arith.negf %266 : vector<8x96xf32>
    %268 = math.exp %267 : vector<8x96xf32>
    %cst_80 = arith.constant 1.000000e+00 : f32
    %269 = vector.broadcast %cst_80 : f32 to vector<8x96xf32>
    %270 = arith.addf %269, %268 : vector<8x96xf32>
    %271 = arith.divf %269, %270 : vector<8x96xf32>
    %272 = vector.extract_strided_slice %265 {offsets = [0, 96], sizes = [8, 32], strides = [1, 1]} : vector<8x128xf32> to vector<8x32xf32>
    %273 = math.tanh %272 : vector<8x32xf32>
    %274 = vector.extract_strided_slice %271 {offsets = [0, 0], sizes = [8, 32], strides = [1, 1]} : vector<8x96xf32> to vector<8x32xf32>
    %275 = vector.extract_strided_slice %271 {offsets = [0, 32], sizes = [8, 32], strides = [1, 1]} : vector<8x96xf32> to vector<8x32xf32>
    %276 = vector.extract_strided_slice %271 {offsets = [0, 64], sizes = [8, 32], strides = [1, 1]} : vector<8x96xf32> to vector<8x32xf32>
    %277 = arith.mulf %275, %235 : vector<8x32xf32>
    %278 = arith.mulf %274, %273 : vector<8x32xf32>
    %279 = arith.addf %277, %278 : vector<8x32xf32>
    %280 = math.tanh %279 : vector<8x32xf32>
    %281 = arith.mulf %276, %280 : vector<8x32xf32>
    %c6 = arith.constant 6 : index
    %c0_81 = arith.constant 0 : index
    %c0_82 = arith.constant 0 : index
    %282 = vector.load %arg0[%c6, %c0_81, %c0_82] : memref<8x8x4xf32, #tpu.memory_space<vmem>>, vector<1x8x4xf32>
    %283 = vector.shape_cast %282 : vector<1x8x4xf32> to vector<8x4xf32>
    %cst_83 = arith.constant dense<0.000000e+00> : vector<8x128xf32>
    %284 = tpu.matmul %283, %0, %cst_83 {dimension_numbers = #tpu.dot_dimension_numbers<[1], [0], [0], [1], [0, 0, 1, 1], [], []>} : vector<8x4xf32>, vector<4x128xf32>, vector<8x128xf32> -> vector<8x128xf32>
    %cst_84 = arith.constant dense<0.000000e+00> : vector<8x128xf32>
    %285 = tpu.matmul %260, %1, %cst_84 {dimension_numbers = #tpu.dot_dimension_numbers<[1], [0], [0], [1], [0, 0, 1, 1], [], []>} : vector<8x32xf32>, vector<32x128xf32>, vector<8x128xf32> -> vector<8x128xf32>
    %286 = arith.addf %284, %285 : vector<8x128xf32>
    %287 = vector.broadcast %2 : vector<1x128xf32> to vector<8x128xf32>
    %288 = arith.addf %286, %287 : vector<8x128xf32>
    %289 = vector.extract_strided_slice %288 {offsets = [0, 0], sizes = [8, 96], strides = [1, 1]} : vector<8x128xf32> to vector<8x96xf32>
    %290 = arith.negf %289 : vector<8x96xf32>
    %291 = math.exp %290 : vector<8x96xf32>
    %cst_85 = arith.constant 1.000000e+00 : f32
    %292 = vector.broadcast %cst_85 : f32 to vector<8x96xf32>
    %293 = arith.addf %292, %291 : vector<8x96xf32>
    %294 = arith.divf %292, %293 : vector<8x96xf32>
    %295 = vector.extract_strided_slice %288 {offsets = [0, 96], sizes = [8, 32], strides = [1, 1]} : vector<8x128xf32> to vector<8x32xf32>
    %296 = math.tanh %295 : vector<8x32xf32>
    %297 = vector.extract_strided_slice %294 {offsets = [0, 0], sizes = [8, 32], strides = [1, 1]} : vector<8x96xf32> to vector<8x32xf32>
    %298 = vector.extract_strided_slice %294 {offsets = [0, 32], sizes = [8, 32], strides = [1, 1]} : vector<8x96xf32> to vector<8x32xf32>
    %299 = vector.extract_strided_slice %294 {offsets = [0, 64], sizes = [8, 32], strides = [1, 1]} : vector<8x96xf32> to vector<8x32xf32>
    %300 = arith.mulf %298, %258 : vector<8x32xf32>
    %301 = arith.mulf %297, %296 : vector<8x32xf32>
    %302 = arith.addf %300, %301 : vector<8x32xf32>
    %303 = math.tanh %302 : vector<8x32xf32>
    %304 = arith.mulf %299, %303 : vector<8x32xf32>
    %cst_86 = arith.constant dense<0.000000e+00> : vector<8x128xf32>
    %305 = tpu.matmul %304, %3, %cst_86 {dimension_numbers = #tpu.dot_dimension_numbers<[1], [0], [0], [1], [0, 0, 1, 1], [], []>} : vector<8x32xf32>, vector<32x128xf32>, vector<8x128xf32> -> vector<8x128xf32>
    %cst_87 = arith.constant dense<0.000000e+00> : vector<8x128xf32>
    %306 = tpu.matmul %281, %4, %cst_87 {dimension_numbers = #tpu.dot_dimension_numbers<[1], [0], [0], [1], [0, 0, 1, 1], [], []>} : vector<8x32xf32>, vector<32x128xf32>, vector<8x128xf32> -> vector<8x128xf32>
    %307 = arith.addf %305, %306 : vector<8x128xf32>
    %308 = vector.broadcast %5 : vector<1x128xf32> to vector<8x128xf32>
    %309 = arith.addf %307, %308 : vector<8x128xf32>
    %310 = vector.extract_strided_slice %309 {offsets = [0, 0], sizes = [8, 96], strides = [1, 1]} : vector<8x128xf32> to vector<8x96xf32>
    %311 = arith.negf %310 : vector<8x96xf32>
    %312 = math.exp %311 : vector<8x96xf32>
    %cst_88 = arith.constant 1.000000e+00 : f32
    %313 = vector.broadcast %cst_88 : f32 to vector<8x96xf32>
    %314 = arith.addf %313, %312 : vector<8x96xf32>
    %315 = arith.divf %313, %314 : vector<8x96xf32>
    %316 = vector.extract_strided_slice %309 {offsets = [0, 96], sizes = [8, 32], strides = [1, 1]} : vector<8x128xf32> to vector<8x32xf32>
    %317 = math.tanh %316 : vector<8x32xf32>
    %318 = vector.extract_strided_slice %315 {offsets = [0, 0], sizes = [8, 32], strides = [1, 1]} : vector<8x96xf32> to vector<8x32xf32>
    %319 = vector.extract_strided_slice %315 {offsets = [0, 32], sizes = [8, 32], strides = [1, 1]} : vector<8x96xf32> to vector<8x32xf32>
    %320 = vector.extract_strided_slice %315 {offsets = [0, 64], sizes = [8, 32], strides = [1, 1]} : vector<8x96xf32> to vector<8x32xf32>
    %321 = arith.mulf %319, %279 : vector<8x32xf32>
    %322 = arith.mulf %318, %317 : vector<8x32xf32>
    %323 = arith.addf %321, %322 : vector<8x32xf32>
    %324 = math.tanh %323 : vector<8x32xf32>
    %325 = arith.mulf %320, %324 : vector<8x32xf32>
    %c7 = arith.constant 7 : index
    %c0_89 = arith.constant 0 : index
    %c0_90 = arith.constant 0 : index
    %326 = vector.load %arg0[%c7, %c0_89, %c0_90] : memref<8x8x4xf32, #tpu.memory_space<vmem>>, vector<1x8x4xf32>
    %327 = vector.shape_cast %326 : vector<1x8x4xf32> to vector<8x4xf32>
    %cst_91 = arith.constant dense<0.000000e+00> : vector<8x128xf32>
    %328 = tpu.matmul %327, %0, %cst_91 {dimension_numbers = #tpu.dot_dimension_numbers<[1], [0], [0], [1], [0, 0, 1, 1], [], []>} : vector<8x4xf32>, vector<4x128xf32>, vector<8x128xf32> -> vector<8x128xf32>
    %cst_92 = arith.constant dense<0.000000e+00> : vector<8x128xf32>
    %329 = tpu.matmul %304, %1, %cst_92 {dimension_numbers = #tpu.dot_dimension_numbers<[1], [0], [0], [1], [0, 0, 1, 1], [], []>} : vector<8x32xf32>, vector<32x128xf32>, vector<8x128xf32> -> vector<8x128xf32>
    %330 = arith.addf %328, %329 : vector<8x128xf32>
    %331 = vector.broadcast %2 : vector<1x128xf32> to vector<8x128xf32>
    %332 = arith.addf %330, %331 : vector<8x128xf32>
    %333 = vector.extract_strided_slice %332 {offsets = [0, 0], sizes = [8, 96], strides = [1, 1]} : vector<8x128xf32> to vector<8x96xf32>
    %334 = arith.negf %333 : vector<8x96xf32>
    %335 = math.exp %334 : vector<8x96xf32>
    %cst_93 = arith.constant 1.000000e+00 : f32
    %336 = vector.broadcast %cst_93 : f32 to vector<8x96xf32>
    %337 = arith.addf %336, %335 : vector<8x96xf32>
    %338 = arith.divf %336, %337 : vector<8x96xf32>
    %339 = vector.extract_strided_slice %332 {offsets = [0, 96], sizes = [8, 32], strides = [1, 1]} : vector<8x128xf32> to vector<8x32xf32>
    %340 = math.tanh %339 : vector<8x32xf32>
    %341 = vector.extract_strided_slice %338 {offsets = [0, 0], sizes = [8, 32], strides = [1, 1]} : vector<8x96xf32> to vector<8x32xf32>
    %342 = vector.extract_strided_slice %338 {offsets = [0, 32], sizes = [8, 32], strides = [1, 1]} : vector<8x96xf32> to vector<8x32xf32>
    %343 = vector.extract_strided_slice %338 {offsets = [0, 64], sizes = [8, 32], strides = [1, 1]} : vector<8x96xf32> to vector<8x32xf32>
    %344 = arith.mulf %342, %302 : vector<8x32xf32>
    %345 = arith.mulf %341, %340 : vector<8x32xf32>
    %346 = arith.addf %344, %345 : vector<8x32xf32>
    %347 = math.tanh %346 : vector<8x32xf32>
    %348 = arith.mulf %343, %347 : vector<8x32xf32>
    %cst_94 = arith.constant dense<0.000000e+00> : vector<8x128xf32>
    %349 = tpu.matmul %348, %3, %cst_94 {dimension_numbers = #tpu.dot_dimension_numbers<[1], [0], [0], [1], [0, 0, 1, 1], [], []>} : vector<8x32xf32>, vector<32x128xf32>, vector<8x128xf32> -> vector<8x128xf32>
    %cst_95 = arith.constant dense<0.000000e+00> : vector<8x128xf32>
    %350 = tpu.matmul %325, %4, %cst_95 {dimension_numbers = #tpu.dot_dimension_numbers<[1], [0], [0], [1], [0, 0, 1, 1], [], []>} : vector<8x32xf32>, vector<32x128xf32>, vector<8x128xf32> -> vector<8x128xf32>
    %351 = arith.addf %349, %350 : vector<8x128xf32>
    %352 = vector.broadcast %5 : vector<1x128xf32> to vector<8x128xf32>
    %353 = arith.addf %351, %352 : vector<8x128xf32>
    %354 = vector.extract_strided_slice %353 {offsets = [0, 0], sizes = [8, 96], strides = [1, 1]} : vector<8x128xf32> to vector<8x96xf32>
    %355 = arith.negf %354 : vector<8x96xf32>
    %356 = math.exp %355 : vector<8x96xf32>
    %cst_96 = arith.constant 1.000000e+00 : f32
    %357 = vector.broadcast %cst_96 : f32 to vector<8x96xf32>
    %358 = arith.addf %357, %356 : vector<8x96xf32>
    %359 = arith.divf %357, %358 : vector<8x96xf32>
    %360 = vector.extract_strided_slice %353 {offsets = [0, 96], sizes = [8, 32], strides = [1, 1]} : vector<8x128xf32> to vector<8x32xf32>
    %361 = math.tanh %360 : vector<8x32xf32>
    %362 = vector.extract_strided_slice %359 {offsets = [0, 0], sizes = [8, 32], strides = [1, 1]} : vector<8x96xf32> to vector<8x32xf32>
    %363 = vector.extract_strided_slice %359 {offsets = [0, 32], sizes = [8, 32], strides = [1, 1]} : vector<8x96xf32> to vector<8x32xf32>
    %364 = vector.extract_strided_slice %359 {offsets = [0, 64], sizes = [8, 32], strides = [1, 1]} : vector<8x96xf32> to vector<8x32xf32>
    %365 = arith.mulf %363, %323 : vector<8x32xf32>
    %366 = arith.mulf %362, %361 : vector<8x32xf32>
    %367 = arith.addf %365, %366 : vector<8x32xf32>
    %368 = math.tanh %367 : vector<8x32xf32>
    %369 = arith.mulf %364, %368 : vector<8x32xf32>
    %c7_97 = arith.constant 7 : index
    %c0_98 = arith.constant 0 : index
    %c0_99 = arith.constant 0 : index
    %370 = vector.load %arg0[%c7_97, %c0_98, %c0_99] : memref<8x8x4xf32, #tpu.memory_space<vmem>>, vector<1x8x4xf32>
    %371 = vector.shape_cast %370 : vector<1x8x4xf32> to vector<8x4xf32>
    %372 = vector.extract_strided_slice %371 {offsets = [0, 0], sizes = [8, 1], strides = [1, 1]} : vector<8x4xf32> to vector<8x1xf32>
    %373 = vector.broadcast %372 : vector<8x1xf32> to vector<8x4xf32>
    %374 = vector.broadcast %12 : vector<1x4xf32> to vector<8x4xf32>
    %375 = arith.mulf %373, %374 : vector<8x4xf32>
    %376 = vector.broadcast %13 : vector<1x4xf32> to vector<8x4xf32>
    %377 = arith.addf %375, %376 : vector<8x4xf32>
    %cst_100 = arith.constant dense<0.000000e+00> : vector<8x128xf32>
    %378 = tpu.matmul %377, %6, %cst_100 {dimension_numbers = #tpu.dot_dimension_numbers<[1], [0], [0], [1], [0, 0, 1, 1], [], []>} : vector<8x4xf32>, vector<4x128xf32>, vector<8x128xf32> -> vector<8x128xf32>
    %cst_101 = arith.constant dense<0.000000e+00> : vector<8x128xf32>
    %379 = tpu.matmul %348, %7, %cst_101 {dimension_numbers = #tpu.dot_dimension_numbers<[1], [0], [0], [1], [0, 0, 1, 1], [], []>} : vector<8x32xf32>, vector<32x128xf32>, vector<8x128xf32> -> vector<8x128xf32>
    %380 = arith.addf %378, %379 : vector<8x128xf32>
    %381 = vector.broadcast %8 : vector<1x128xf32> to vector<8x128xf32>
    %382 = arith.addf %380, %381 : vector<8x128xf32>
    %383 = vector.extract_strided_slice %382 {offsets = [0, 0], sizes = [8, 96], strides = [1, 1]} : vector<8x128xf32> to vector<8x96xf32>
    %384 = arith.negf %383 : vector<8x96xf32>
    %385 = math.exp %384 : vector<8x96xf32>
    %cst_102 = arith.constant 1.000000e+00 : f32
    %386 = vector.broadcast %cst_102 : f32 to vector<8x96xf32>
    %387 = arith.addf %386, %385 : vector<8x96xf32>
    %388 = arith.divf %386, %387 : vector<8x96xf32>
    %389 = vector.extract_strided_slice %382 {offsets = [0, 96], sizes = [8, 32], strides = [1, 1]} : vector<8x128xf32> to vector<8x32xf32>
    %390 = math.tanh %389 : vector<8x32xf32>
    %391 = vector.extract_strided_slice %388 {offsets = [0, 0], sizes = [8, 32], strides = [1, 1]} : vector<8x96xf32> to vector<8x32xf32>
    %392 = vector.extract_strided_slice %388 {offsets = [0, 32], sizes = [8, 32], strides = [1, 1]} : vector<8x96xf32> to vector<8x32xf32>
    %393 = vector.extract_strided_slice %388 {offsets = [0, 64], sizes = [8, 32], strides = [1, 1]} : vector<8x96xf32> to vector<8x32xf32>
    %394 = arith.mulf %392, %346 : vector<8x32xf32>
    %395 = arith.mulf %391, %390 : vector<8x32xf32>
    %396 = arith.addf %394, %395 : vector<8x32xf32>
    %397 = math.tanh %396 : vector<8x32xf32>
    %398 = arith.mulf %393, %397 : vector<8x32xf32>
    %cst_103 = arith.constant dense<0.000000e+00> : vector<8x128xf32>
    %399 = tpu.matmul %398, %9, %cst_103 {dimension_numbers = #tpu.dot_dimension_numbers<[1], [0], [0], [1], [0, 0, 1, 1], [], []>} : vector<8x32xf32>, vector<32x128xf32>, vector<8x128xf32> -> vector<8x128xf32>
    %cst_104 = arith.constant dense<0.000000e+00> : vector<8x128xf32>
    %400 = tpu.matmul %369, %10, %cst_104 {dimension_numbers = #tpu.dot_dimension_numbers<[1], [0], [0], [1], [0, 0, 1, 1], [], []>} : vector<8x32xf32>, vector<32x128xf32>, vector<8x128xf32> -> vector<8x128xf32>
    %401 = arith.addf %399, %400 : vector<8x128xf32>
    %402 = vector.broadcast %11 : vector<1x128xf32> to vector<8x128xf32>
    %403 = arith.addf %401, %402 : vector<8x128xf32>
    %404 = vector.extract_strided_slice %403 {offsets = [0, 0], sizes = [8, 96], strides = [1, 1]} : vector<8x128xf32> to vector<8x96xf32>
    %405 = arith.negf %404 : vector<8x96xf32>
    %406 = math.exp %405 : vector<8x96xf32>
    %cst_105 = arith.constant 1.000000e+00 : f32
    %407 = vector.broadcast %cst_105 : f32 to vector<8x96xf32>
    %408 = arith.addf %407, %406 : vector<8x96xf32>
    %409 = arith.divf %407, %408 : vector<8x96xf32>
    %410 = vector.extract_strided_slice %403 {offsets = [0, 96], sizes = [8, 32], strides = [1, 1]} : vector<8x128xf32> to vector<8x32xf32>
    %411 = math.tanh %410 : vector<8x32xf32>
    %412 = vector.extract_strided_slice %409 {offsets = [0, 0], sizes = [8, 32], strides = [1, 1]} : vector<8x96xf32> to vector<8x32xf32>
    %413 = vector.extract_strided_slice %409 {offsets = [0, 32], sizes = [8, 32], strides = [1, 1]} : vector<8x96xf32> to vector<8x32xf32>
    %414 = vector.extract_strided_slice %409 {offsets = [0, 64], sizes = [8, 32], strides = [1, 1]} : vector<8x96xf32> to vector<8x32xf32>
    %415 = arith.mulf %413, %367 : vector<8x32xf32>
    %416 = arith.mulf %412, %411 : vector<8x32xf32>
    %417 = arith.addf %415, %416 : vector<8x32xf32>
    %418 = math.tanh %417 : vector<8x32xf32>
    %419 = arith.mulf %414, %418 : vector<8x32xf32>
    %420 = vector.broadcast %14 : vector<1x32xf32> to vector<8x32xf32>
    %421 = arith.mulf %419, %420 : vector<8x32xf32>
    %cst_106 = arith.constant dense<0.000000e+00> : vector<8xf32>
    %422 = vector.multi_reduction <add>, %421, %cst_106 [1] : vector<8x32xf32> to vector<8xf32>
    %423 = vector.shape_cast %422 : vector<8xf32> to vector<8x1xf32>
    %424 = vector.broadcast %15 : vector<1x1xf32> to vector<8x1xf32>
    %425 = arith.addf %423, %424 : vector<8x1xf32>
    %426 = vector.broadcast %425 : vector<8x1xf32> to vector<8x4xf32>
    %427 = vector.broadcast %12 : vector<1x4xf32> to vector<8x4xf32>
    %428 = arith.mulf %426, %427 : vector<8x4xf32>
    %429 = vector.broadcast %13 : vector<1x4xf32> to vector<8x4xf32>
    %430 = arith.addf %428, %429 : vector<8x4xf32>
    %cst_107 = arith.constant dense<0.000000e+00> : vector<8x128xf32>
    %431 = tpu.matmul %430, %6, %cst_107 {dimension_numbers = #tpu.dot_dimension_numbers<[1], [0], [0], [1], [0, 0, 1, 1], [], []>} : vector<8x4xf32>, vector<4x128xf32>, vector<8x128xf32> -> vector<8x128xf32>
    %cst_108 = arith.constant dense<0.000000e+00> : vector<8x128xf32>
    %432 = tpu.matmul %398, %7, %cst_108 {dimension_numbers = #tpu.dot_dimension_numbers<[1], [0], [0], [1], [0, 0, 1, 1], [], []>} : vector<8x32xf32>, vector<32x128xf32>, vector<8x128xf32> -> vector<8x128xf32>
    %433 = arith.addf %431, %432 : vector<8x128xf32>
    %434 = vector.broadcast %8 : vector<1x128xf32> to vector<8x128xf32>
    %435 = arith.addf %433, %434 : vector<8x128xf32>
    %436 = vector.extract_strided_slice %435 {offsets = [0, 0], sizes = [8, 96], strides = [1, 1]} : vector<8x128xf32> to vector<8x96xf32>
    %437 = arith.negf %436 : vector<8x96xf32>
    %438 = math.exp %437 : vector<8x96xf32>
    %cst_109 = arith.constant 1.000000e+00 : f32
    %439 = vector.broadcast %cst_109 : f32 to vector<8x96xf32>
    %440 = arith.addf %439, %438 : vector<8x96xf32>
    %441 = arith.divf %439, %440 : vector<8x96xf32>
    %442 = vector.extract_strided_slice %435 {offsets = [0, 96], sizes = [8, 32], strides = [1, 1]} : vector<8x128xf32> to vector<8x32xf32>
    %443 = math.tanh %442 : vector<8x32xf32>
    %444 = vector.extract_strided_slice %441 {offsets = [0, 0], sizes = [8, 32], strides = [1, 1]} : vector<8x96xf32> to vector<8x32xf32>
    %445 = vector.extract_strided_slice %441 {offsets = [0, 32], sizes = [8, 32], strides = [1, 1]} : vector<8x96xf32> to vector<8x32xf32>
    %446 = vector.extract_strided_slice %441 {offsets = [0, 64], sizes = [8, 32], strides = [1, 1]} : vector<8x96xf32> to vector<8x32xf32>
    %447 = arith.mulf %445, %396 : vector<8x32xf32>
    %448 = arith.mulf %444, %443 : vector<8x32xf32>
    %449 = arith.addf %447, %448 : vector<8x32xf32>
    %450 = math.tanh %449 : vector<8x32xf32>
    %451 = arith.mulf %446, %450 : vector<8x32xf32>
    %cst_110 = arith.constant dense<0.000000e+00> : vector<8x128xf32>
    %452 = tpu.matmul %451, %9, %cst_110 {dimension_numbers = #tpu.dot_dimension_numbers<[1], [0], [0], [1], [0, 0, 1, 1], [], []>} : vector<8x32xf32>, vector<32x128xf32>, vector<8x128xf32> -> vector<8x128xf32>
    %cst_111 = arith.constant dense<0.000000e+00> : vector<8x128xf32>
    %453 = tpu.matmul %419, %10, %cst_111 {dimension_numbers = #tpu.dot_dimension_numbers<[1], [0], [0], [1], [0, 0, 1, 1], [], []>} : vector<8x32xf32>, vector<32x128xf32>, vector<8x128xf32> -> vector<8x128xf32>
    %454 = arith.addf %452, %453 : vector<8x128xf32>
    %455 = vector.broadcast %11 : vector<1x128xf32> to vector<8x128xf32>
    %456 = arith.addf %454, %455 : vector<8x128xf32>
    %457 = vector.extract_strided_slice %456 {offsets = [0, 0], sizes = [8, 96], strides = [1, 1]} : vector<8x128xf32> to vector<8x96xf32>
    %458 = arith.negf %457 : vector<8x96xf32>
    %459 = math.exp %458 : vector<8x96xf32>
    %cst_112 = arith.constant 1.000000e+00 : f32
    %460 = vector.broadcast %cst_112 : f32 to vector<8x96xf32>
    %461 = arith.addf %460, %459 : vector<8x96xf32>
    %462 = arith.divf %460, %461 : vector<8x96xf32>
    %463 = vector.extract_strided_slice %456 {offsets = [0, 96], sizes = [8, 32], strides = [1, 1]} : vector<8x128xf32> to vector<8x32xf32>
    %464 = math.tanh %463 : vector<8x32xf32>
    %465 = vector.extract_strided_slice %462 {offsets = [0, 0], sizes = [8, 32], strides = [1, 1]} : vector<8x96xf32> to vector<8x32xf32>
    %466 = vector.extract_strided_slice %462 {offsets = [0, 32], sizes = [8, 32], strides = [1, 1]} : vector<8x96xf32> to vector<8x32xf32>
    %467 = vector.extract_strided_slice %462 {offsets = [0, 64], sizes = [8, 32], strides = [1, 1]} : vector<8x96xf32> to vector<8x32xf32>
    %468 = arith.mulf %466, %417 : vector<8x32xf32>
    %469 = arith.mulf %465, %464 : vector<8x32xf32>
    %470 = arith.addf %468, %469 : vector<8x32xf32>
    %471 = math.tanh %470 : vector<8x32xf32>
    %472 = arith.mulf %467, %471 : vector<8x32xf32>
    %473 = vector.broadcast %14 : vector<1x32xf32> to vector<8x32xf32>
    %474 = arith.mulf %472, %473 : vector<8x32xf32>
    %cst_113 = arith.constant dense<0.000000e+00> : vector<8xf32>
    %475 = vector.multi_reduction <add>, %474, %cst_113 [1] : vector<8x32xf32> to vector<8xf32>
    %476 = vector.shape_cast %475 : vector<8xf32> to vector<8x1xf32>
    %477 = vector.broadcast %15 : vector<1x1xf32> to vector<8x1xf32>
    %478 = arith.addf %476, %477 : vector<8x1xf32>
    %479 = vector.broadcast %478 : vector<8x1xf32> to vector<8x4xf32>
    %480 = vector.broadcast %12 : vector<1x4xf32> to vector<8x4xf32>
    %481 = arith.mulf %479, %480 : vector<8x4xf32>
    %482 = vector.broadcast %13 : vector<1x4xf32> to vector<8x4xf32>
    %483 = arith.addf %481, %482 : vector<8x4xf32>
    %cst_114 = arith.constant dense<0.000000e+00> : vector<8x128xf32>
    %484 = tpu.matmul %483, %6, %cst_114 {dimension_numbers = #tpu.dot_dimension_numbers<[1], [0], [0], [1], [0, 0, 1, 1], [], []>} : vector<8x4xf32>, vector<4x128xf32>, vector<8x128xf32> -> vector<8x128xf32>
    %cst_115 = arith.constant dense<0.000000e+00> : vector<8x128xf32>
    %485 = tpu.matmul %451, %7, %cst_115 {dimension_numbers = #tpu.dot_dimension_numbers<[1], [0], [0], [1], [0, 0, 1, 1], [], []>} : vector<8x32xf32>, vector<32x128xf32>, vector<8x128xf32> -> vector<8x128xf32>
    %486 = arith.addf %484, %485 : vector<8x128xf32>
    %487 = vector.broadcast %8 : vector<1x128xf32> to vector<8x128xf32>
    %488 = arith.addf %486, %487 : vector<8x128xf32>
    %489 = vector.extract_strided_slice %488 {offsets = [0, 0], sizes = [8, 96], strides = [1, 1]} : vector<8x128xf32> to vector<8x96xf32>
    %490 = arith.negf %489 : vector<8x96xf32>
    %491 = math.exp %490 : vector<8x96xf32>
    %cst_116 = arith.constant 1.000000e+00 : f32
    %492 = vector.broadcast %cst_116 : f32 to vector<8x96xf32>
    %493 = arith.addf %492, %491 : vector<8x96xf32>
    %494 = arith.divf %492, %493 : vector<8x96xf32>
    %495 = vector.extract_strided_slice %488 {offsets = [0, 96], sizes = [8, 32], strides = [1, 1]} : vector<8x128xf32> to vector<8x32xf32>
    %496 = math.tanh %495 : vector<8x32xf32>
    %497 = vector.extract_strided_slice %494 {offsets = [0, 0], sizes = [8, 32], strides = [1, 1]} : vector<8x96xf32> to vector<8x32xf32>
    %498 = vector.extract_strided_slice %494 {offsets = [0, 32], sizes = [8, 32], strides = [1, 1]} : vector<8x96xf32> to vector<8x32xf32>
    %499 = vector.extract_strided_slice %494 {offsets = [0, 64], sizes = [8, 32], strides = [1, 1]} : vector<8x96xf32> to vector<8x32xf32>
    %500 = arith.mulf %498, %449 : vector<8x32xf32>
    %501 = arith.mulf %497, %496 : vector<8x32xf32>
    %502 = arith.addf %500, %501 : vector<8x32xf32>
    %503 = math.tanh %502 : vector<8x32xf32>
    %504 = arith.mulf %499, %503 : vector<8x32xf32>
    %cst_117 = arith.constant dense<0.000000e+00> : vector<8x128xf32>
    %505 = tpu.matmul %504, %9, %cst_117 {dimension_numbers = #tpu.dot_dimension_numbers<[1], [0], [0], [1], [0, 0, 1, 1], [], []>} : vector<8x32xf32>, vector<32x128xf32>, vector<8x128xf32> -> vector<8x128xf32>
    %cst_118 = arith.constant dense<0.000000e+00> : vector<8x128xf32>
    %506 = tpu.matmul %472, %10, %cst_118 {dimension_numbers = #tpu.dot_dimension_numbers<[1], [0], [0], [1], [0, 0, 1, 1], [], []>} : vector<8x32xf32>, vector<32x128xf32>, vector<8x128xf32> -> vector<8x128xf32>
    %507 = arith.addf %505, %506 : vector<8x128xf32>
    %508 = vector.broadcast %11 : vector<1x128xf32> to vector<8x128xf32>
    %509 = arith.addf %507, %508 : vector<8x128xf32>
    %510 = vector.extract_strided_slice %509 {offsets = [0, 0], sizes = [8, 96], strides = [1, 1]} : vector<8x128xf32> to vector<8x96xf32>
    %511 = arith.negf %510 : vector<8x96xf32>
    %512 = math.exp %511 : vector<8x96xf32>
    %cst_119 = arith.constant 1.000000e+00 : f32
    %513 = vector.broadcast %cst_119 : f32 to vector<8x96xf32>
    %514 = arith.addf %513, %512 : vector<8x96xf32>
    %515 = arith.divf %513, %514 : vector<8x96xf32>
    %516 = vector.extract_strided_slice %509 {offsets = [0, 96], sizes = [8, 32], strides = [1, 1]} : vector<8x128xf32> to vector<8x32xf32>
    %517 = math.tanh %516 : vector<8x32xf32>
    %518 = vector.extract_strided_slice %515 {offsets = [0, 0], sizes = [8, 32], strides = [1, 1]} : vector<8x96xf32> to vector<8x32xf32>
    %519 = vector.extract_strided_slice %515 {offsets = [0, 32], sizes = [8, 32], strides = [1, 1]} : vector<8x96xf32> to vector<8x32xf32>
    %520 = vector.extract_strided_slice %515 {offsets = [0, 64], sizes = [8, 32], strides = [1, 1]} : vector<8x96xf32> to vector<8x32xf32>
    %521 = arith.mulf %519, %470 : vector<8x32xf32>
    %522 = arith.mulf %518, %517 : vector<8x32xf32>
    %523 = arith.addf %521, %522 : vector<8x32xf32>
    %524 = math.tanh %523 : vector<8x32xf32>
    %525 = arith.mulf %520, %524 : vector<8x32xf32>
    %526 = vector.broadcast %14 : vector<1x32xf32> to vector<8x32xf32>
    %527 = arith.mulf %525, %526 : vector<8x32xf32>
    %cst_120 = arith.constant dense<0.000000e+00> : vector<8xf32>
    %528 = vector.multi_reduction <add>, %527, %cst_120 [1] : vector<8x32xf32> to vector<8xf32>
    %529 = vector.shape_cast %528 : vector<8xf32> to vector<8x1xf32>
    %530 = vector.broadcast %15 : vector<1x1xf32> to vector<8x1xf32>
    %531 = arith.addf %529, %530 : vector<8x1xf32>
    %532 = vector.broadcast %531 : vector<8x1xf32> to vector<8x4xf32>
    %533 = vector.broadcast %12 : vector<1x4xf32> to vector<8x4xf32>
    %534 = arith.mulf %532, %533 : vector<8x4xf32>
    %535 = vector.broadcast %13 : vector<1x4xf32> to vector<8x4xf32>
    %536 = arith.addf %534, %535 : vector<8x4xf32>
    %cst_121 = arith.constant dense<0.000000e+00> : vector<8x128xf32>
    %537 = tpu.matmul %536, %6, %cst_121 {dimension_numbers = #tpu.dot_dimension_numbers<[1], [0], [0], [1], [0, 0, 1, 1], [], []>} : vector<8x4xf32>, vector<4x128xf32>, vector<8x128xf32> -> vector<8x128xf32>
    %cst_122 = arith.constant dense<0.000000e+00> : vector<8x128xf32>
    %538 = tpu.matmul %504, %7, %cst_122 {dimension_numbers = #tpu.dot_dimension_numbers<[1], [0], [0], [1], [0, 0, 1, 1], [], []>} : vector<8x32xf32>, vector<32x128xf32>, vector<8x128xf32> -> vector<8x128xf32>
    %539 = arith.addf %537, %538 : vector<8x128xf32>
    %540 = vector.broadcast %8 : vector<1x128xf32> to vector<8x128xf32>
    %541 = arith.addf %539, %540 : vector<8x128xf32>
    %542 = vector.extract_strided_slice %541 {offsets = [0, 0], sizes = [8, 96], strides = [1, 1]} : vector<8x128xf32> to vector<8x96xf32>
    %543 = arith.negf %542 : vector<8x96xf32>
    %544 = math.exp %543 : vector<8x96xf32>
    %cst_123 = arith.constant 1.000000e+00 : f32
    %545 = vector.broadcast %cst_123 : f32 to vector<8x96xf32>
    %546 = arith.addf %545, %544 : vector<8x96xf32>
    %547 = arith.divf %545, %546 : vector<8x96xf32>
    %548 = vector.extract_strided_slice %541 {offsets = [0, 96], sizes = [8, 32], strides = [1, 1]} : vector<8x128xf32> to vector<8x32xf32>
    %549 = math.tanh %548 : vector<8x32xf32>
    %550 = vector.extract_strided_slice %547 {offsets = [0, 0], sizes = [8, 32], strides = [1, 1]} : vector<8x96xf32> to vector<8x32xf32>
    %551 = vector.extract_strided_slice %547 {offsets = [0, 32], sizes = [8, 32], strides = [1, 1]} : vector<8x96xf32> to vector<8x32xf32>
    %552 = vector.extract_strided_slice %547 {offsets = [0, 64], sizes = [8, 32], strides = [1, 1]} : vector<8x96xf32> to vector<8x32xf32>
    %553 = arith.mulf %551, %502 : vector<8x32xf32>
    %554 = arith.mulf %550, %549 : vector<8x32xf32>
    %555 = arith.addf %553, %554 : vector<8x32xf32>
    %556 = math.tanh %555 : vector<8x32xf32>
    %557 = arith.mulf %552, %556 : vector<8x32xf32>
    %cst_124 = arith.constant dense<0.000000e+00> : vector<8x128xf32>
    %558 = tpu.matmul %557, %9, %cst_124 {dimension_numbers = #tpu.dot_dimension_numbers<[1], [0], [0], [1], [0, 0, 1, 1], [], []>} : vector<8x32xf32>, vector<32x128xf32>, vector<8x128xf32> -> vector<8x128xf32>
    %cst_125 = arith.constant dense<0.000000e+00> : vector<8x128xf32>
    %559 = tpu.matmul %525, %10, %cst_125 {dimension_numbers = #tpu.dot_dimension_numbers<[1], [0], [0], [1], [0, 0, 1, 1], [], []>} : vector<8x32xf32>, vector<32x128xf32>, vector<8x128xf32> -> vector<8x128xf32>
    %560 = arith.addf %558, %559 : vector<8x128xf32>
    %561 = vector.broadcast %11 : vector<1x128xf32> to vector<8x128xf32>
    %562 = arith.addf %560, %561 : vector<8x128xf32>
    %563 = vector.extract_strided_slice %562 {offsets = [0, 0], sizes = [8, 96], strides = [1, 1]} : vector<8x128xf32> to vector<8x96xf32>
    %564 = arith.negf %563 : vector<8x96xf32>
    %565 = math.exp %564 : vector<8x96xf32>
    %cst_126 = arith.constant 1.000000e+00 : f32
    %566 = vector.broadcast %cst_126 : f32 to vector<8x96xf32>
    %567 = arith.addf %566, %565 : vector<8x96xf32>
    %568 = arith.divf %566, %567 : vector<8x96xf32>
    %569 = vector.extract_strided_slice %562 {offsets = [0, 96], sizes = [8, 32], strides = [1, 1]} : vector<8x128xf32> to vector<8x32xf32>
    %570 = math.tanh %569 : vector<8x32xf32>
    %571 = vector.extract_strided_slice %568 {offsets = [0, 0], sizes = [8, 32], strides = [1, 1]} : vector<8x96xf32> to vector<8x32xf32>
    %572 = vector.extract_strided_slice %568 {offsets = [0, 32], sizes = [8, 32], strides = [1, 1]} : vector<8x96xf32> to vector<8x32xf32>
    %573 = vector.extract_strided_slice %568 {offsets = [0, 64], sizes = [8, 32], strides = [1, 1]} : vector<8x96xf32> to vector<8x32xf32>
    %574 = arith.mulf %572, %523 : vector<8x32xf32>
    %575 = arith.mulf %571, %570 : vector<8x32xf32>
    %576 = arith.addf %574, %575 : vector<8x32xf32>
    %577 = math.tanh %576 : vector<8x32xf32>
    %578 = arith.mulf %573, %577 : vector<8x32xf32>
    %579 = vector.broadcast %14 : vector<1x32xf32> to vector<8x32xf32>
    %580 = arith.mulf %578, %579 : vector<8x32xf32>
    %cst_127 = arith.constant dense<0.000000e+00> : vector<8xf32>
    %581 = vector.multi_reduction <add>, %580, %cst_127 [1] : vector<8x32xf32> to vector<8xf32>
    %582 = vector.shape_cast %581 : vector<8xf32> to vector<8x1xf32>
    %583 = vector.broadcast %15 : vector<1x1xf32> to vector<8x1xf32>
    %584 = arith.addf %582, %583 : vector<8x1xf32>
    %585 = tpu.concatenate %425, %478, %531, %584 in 1 : vector<8x1xf32>, vector<8x1xf32>, vector<8x1xf32>, vector<8x1xf32> -> vector<8x4xf32>
    %c0_128 = arith.constant 0 : index
    %c0_129 = arith.constant 0 : index
    %586 = vector.load %arg17[%c0_128, %c0_129] : memref<8x4xf32, #tpu.memory_space<vmem>>, vector<8x4xf32>
    tpu.vector_store %arg17[%c0_128, %c0_129], %585 {strides = array<i32>} : memref<8x4xf32, #tpu.memory_space<vmem>>, vector<8x4xf32>,
    return
  }
}

</mosaic_0001>

<bundles_post_ra>
// kernel: forecastnet_forward.1
= control target key start
LH: loop header
LB: loop body
LE: loop exit
PB: predicated region body
PF: predicated region fallthrough
CT: control target
= control target key end

     0   :  { %vm121_vm0 = vcmask 1043456   ;;  %vm117_vm1 = vcmask 31744   ;;  %v2559_v6 = vmov 0.0   ;;  %s2560_s25 = smov 32   ;;  %s2561_s28 = smov 64   ;;  %vm93_vm6 = vcmask 261120   ;;  %s3340_s2 = inlined_call_operand.vmem [shape: f32[32,128], index: 2, kind: input, shape index: {}]   ;;  %s3341_s1 = inlined_call_operand.vmem [shape: f32[4,128], index: 1, kind: input, shape index: {}]   ;;  %s3342_s0 = inlined_call_operand.vmem [shape: f32[8,8,4], index: 0, kind: input, shape index: {}]   ;;  %s3343_s3 = inlined_call_operand.vmem [shape: f32[1,128], index: 3, kind: input, shape index: {}]   ;;  %s3344_s5 = inlined_call_operand.vmem [shape: f32[32,128], index: 5, kind: input, shape index: {}]   ;;  %s3345_s4 = inlined_call_operand.vmem [shape: f32[32,128], index: 4, kind: input, shape index: {}]   ;;  %s3346_s6 = inlined_call_operand.vmem [shape: f32[1,128], index: 6, kind: input, shape index: {}]   ;;  %s3347_s13 = inlined_call_operand.vmem [shape: f32[1,4], index: 13, kind: input, shape index: {}]   ;;  %s3348_s14 = inlined_call_operand.vmem [shape: f32[1,4], index: 14, kind: input, shape index: {}]   ;;  %s3349_s8 = inlined_call_operand.vmem [shape: f32[32,128], index: 8, kind: input, shape index: {}]   ;;  %s3350_s7 = inlined_call_operand.vmem [shape: f32[4,128], index: 7, kind: input, shape index: {}]   ;;  %s3351_s9 = inlined_call_operand.vmem [shape: f32[1,128], index: 9, kind: input, shape index: {}]   ;;  %s3352_s10 = inlined_call_operand.vmem [shape: f32[32,128], index: 10, kind: input, shape index: {}]   ;;  %s3353_s11 = inlined_call_operand.vmem [shape: f32[32,128], index: 11, kind: input, shape index: {}]   ;;  %s3354_s12 = inlined_call_operand.vmem [shape: f32[1,128], index: 12, kind: input, shape index: {}]   ;;  %s3355_s15 = inlined_call_operand.vmem [shape: f32[1,32], index: 15, kind: input, shape index: {}]   ;;  %s3356_s16 = inlined_call_operand.<no memory space> [shape: f32[1,1], index: 16, kind: input, shape index: {}]   ;;  %s3357_s17 = inlined_call_operand.vmem [shape: f32[8,4], index: 17, kind: output, shape index: {}]  }
   0x1   :  { %3359 = sst [smem:[#allocation3_spill]] %s3340_s2  ;;  %v92_v3 = vld [vmem:[%s3342_s0] sm:$0xff]  ;;  %v2719_v32 = vld [vmem:[%s3344_s5 + $0x18] sm:$0xff]  ;;  %v2729_v34 = vld [vmem:[%s3344_s5 + $0x10] sm:$0xff] }
   0x2   :  { %3360 = sst [smem:[#allocation4_spill]] %s3341_s1  ;;  %v2707_v8 = vld [vmem:[%s3343_s3] ss:$0 sm:$0xff]  ;;  %v2724_v33 = vld [vmem:[%s3345_s4 + $0x18] sm:$0xff]  ;;  %198 = vmatpush.msra.mxu2 %v2719_v32  ;;  %v2736_v35 = vld [vmem:[%s3345_s4 + $0x10] sm:$0xff] }
   0x3   :  { %s3361_s26 = sld [smem:[#allocation3_spill]]  ;;  %223 = vmatpush.msra.mxu3 %v2724_v33  ;;  %v2741_v36 = vld [vmem:[%s3344_s5 + $0x8] sm:$0xff]  ;;  %v2753_v38 = vld [vmem:[%s3344_s5] sm:$0xff] }
   0x4   :  { %s3362_s30 = sld [smem:[#allocation4_spill]]  ;;  %v2746_v37 = vld [vmem:[%s3345_s4 + $0x8] sm:$0xff]  ;;  %199 = vmatpush.msra.mxu2 %v2729_v34  ;;  %v2758_v39 = vld [vmem:[%s3345_s4] sm:$0xff] }
   0x5   :  { %224 = vmatpush.msra.mxu3 %v2736_v35  ;;  %v2257_v42 = vld [vmem:[%s3342_s0 + $0x8] sm:$0xff]  ;;  %v2797_v45 = vld [vmem:[%s3346_s6] ss:$0 sm:$0xff] }
   0x6   :  { %200 = vmatpush.msra.mxu2 %v2741_v36 }
   0x7   :  { %225 = vmatpush.msra.mxu3 %v2746_v37 }
   0x8   :  { %201 = vmatpush.msra.mxu2 %v2753_v38 }
   0x9   :  { %v2659_v0 = vld [vmem:[%s3361_s26 + $0x18] sm:$0xff]  ;;  %v2664_v1 = vld [vmem:[%s3361_s26 + $0x10] sm:$0xff]  ;;  %v2678_v4 = vld [vmem:[%s3361_s26 + $0x8] sm:$0xff]  ;;  %226 = vmatpush.msra.mxu3 %v2758_v39  ;;  %202 = vmatmul.f32.vlgmr.msra.gmra.mxu2 %v2559_v6 }
   0xa   :  { %109 = vmatpush.msra.mxu0 %v2659_v0  ;;  %v2670_v2 = vld [vmem:[%s3362_s30] sm:$0xf]  ;;  %372 = vmatpush.msrb.mxu2 %v2719_v32 }
   0xb   :  { %2252 = vmatpush.msk.msra.mxu1 %vm121_vm0, %v2670_v2  ;;  %v2687_v5 = vld [vmem:[%s3361_s26] sm:$0xff]  ;;  %397 = vmatpush.msrb.mxu3 %v2724_v33 }
   0xc   :  { %110 = vmatpush.msra.mxu0 %v2664_v1  ;;  %2253 = vmatmul.msk.f32.vlgmr.msra.gmra.mxu1 %vm117_vm1, %v92_v3 }
   0xd   :  { %286 = vmatpush.msrb.mxu1 %v2659_v0  ;;  %398 = vmatpush.msrb.mxu3 %v2736_v35 }
   0xe   :  { %111 = vmatpush.msra.mxu0 %v2678_v4  ;;  %373 = vmatpush.msrb.mxu2 %v2729_v34 }
   0xf   :  { %287 = vmatpush.msrb.mxu1 %v2664_v1  ;;  %399 = vmatpush.msrb.mxu3 %v2746_v37 }
  0x10   :  { %112 = vmatpush.msra.mxu0 %v2687_v5  ;;  %374 = vmatpush.msrb.mxu2 %v2741_v36 }
  0x11   :  { %113 = vmatmul.f32.vlgmr.msra.gmra.mxu0 %v2559_v6  ;;  %288 = vmatpush.msrb.mxu1 %v2678_v4 }
  0x12   :  { %2259 = vmatpush.msk.msrb.mxu0 %vm121_vm0, %v2670_v2  ;;  %400 = vmatpush.msrb.mxu3 %v2758_v39 }
  0x13   :  { %289 = vmatpush.msrb.mxu1 %v2687_v5  ;;  %375 = vmatpush.msrb.mxu2 %v2753_v38 }
  0x14   :  { %2267 = vmatpush.msk.msra.mxu0 %vm121_vm0, %v2670_v2 }
  0x15   :  { %457 = vmatpush.msra.mxu1 %v2659_v0  ;;  %543 = vmatpush.msra.mxu2 %v2719_v32 }
  0x17   :  { %458 = vmatpush.msra.mxu1 %v2664_v1  ;;  %544 = vmatpush.msra.mxu2 %v2729_v34 }
  0x19   :  { %459 = vmatpush.msra.mxu1 %v2678_v4  ;;  %545 = vmatpush.msra.mxu2 %v2741_v36 }
  0x1a   :  { %2260 = vmatmul.msk.f32.vlgmr.msrb.gmra.mxu0 %vm117_vm1, %v2257_v42 }
  0x1b   :  { %460 = vmatpush.msra.mxu1 %v2687_v5  ;;  %546 = vmatpush.msra.mxu2 %v2753_v38 }
  0x1c   :  { %2275 = vmatpush.msk.msrb.mxu0 %vm121_vm0, %v2670_v2 }
  0x89   :  { %v142_v7 = vpop.f32.mrf.mxu1 }
  0x8c   :  { %v203_v44 = vpop.f32.mrf.mxu2 }
  0x8e   :  { %v114_v9 = vpop.f32.mrf.mxu0 }
  0x8f   :  { %v143_v10 = vadd.f32 %v142_v7, %v114_v9 }
  0x91   :  { %v148_v11 = vadd.f32 %v2707_v8, %v143_v10 }
  0x93   :  { %2359 = vtanh.f32 %v148_v11  ;;  %v2254_v13 = vmul.f32 -1.442695, %v148_v11 }
  0x95   :  { %2361 = vpow2.f32 %v2254_v13 }
  0x97   :  { %v314_v49 = vpop.f32.mrf.mxu0 }
  0x99   :  { %v2360_v12 = vpop.eup %2359 }
  0x9a   :  { %171 = vrot.lane.b32.xlu0 %v2360_v12, %s2560_s25 }
  0x9b   :  { %v2362_v14 = vpop.eup %2361 }
  0x9c   :  { %v152_v15 = vadd.f32 1.0, %v2362_v14 }
  0x9e   :  { %2363 = vrcp.f32 %v152_v15  ;;  %v164_v21 = vand.u32 2147483648, %v152_v15  ;;  %vm158_vm3 = vweird.f32 %v152_v15  ;;  %v162_v22 = vand.u32 2147483647, %v152_v15 }
  0xa0   :  { %v165_v24 = vor.u32 1.1754944e-38, %v164_v21  ;;  %vm163_vm5 = vcmp.eq.f32.partialorder %v162_v22, 8.507059e+37 }
  0xa4   :  { %v2364_v16 = vpop.eup %2363 }
  0xa5   :  { %v154_v17 = vmul.f32 %v2364_v16, %v152_v15  ;;  %vm159_vm2 = vweird.f32 %v2364_v16 }
  0xa6   :  { %vm160_vm4 = vmor %vm158_vm3, %vm159_vm2 }
  0xa7   :  { %v155_v18 = vsub.f32 1.0, %v154_v17 }
  0xa9   :  { %v156_v19 = vmul.f32 %v2364_v16, %v155_v18 }
  0xab   :  { %v157_v20 = vadd.f32 %v2364_v16, %v156_v19 }
  0xad   :  { %v161_v23 = vsel %vm160_vm4, %v2364_v16, %v157_v20 }
  0xae   :  { %v166_v26 = vsel %vm163_vm5, %v165_v24, %v161_v23 }
  0xaf   :  { %v169_v28 = vmul.f32 0.0, %v166_v26 }
 0x10c   :  { %v172_v25 = vpop.permute.xlu0 %171 }
 0x10d   :  { %v174_v27 = vmul.f32 %v172_v25, %v166_v26 }
 0x10f   :  { %176 = vrot.lane.b32.xlu0 %v174_v27, %s2560_s25 }
 0x181   :  { %v177_v29 = vpop.permute.xlu0 %176 }
 0x182   :  { %v2712_v30 = vadd.f32 %v177_v29, %v169_v28 }
 0x184   :  { %2365 = vtanh.f32 %v2712_v30 }
 0x18a   :  { %v2366_v31 = vpop.eup %2365 }
 0x18b   :  { %182 = vrot.lane.b32.xlu1 %v2366_v31, %s2560_s25 }
 0x1fd   :  { %v183_v40 = vpop.permute.xlu1 %182 }
 0x1fe   :  { %v185_v41 = vmul.f32 %v183_v40, %v166_v26 }
 0x200   :  { %207 = vrot.lane.b32.xlu1 %v185_v41, %s2561_s28 }
 0x272   :  { %v208_v43 = vpop.permute.xlu1 %207 }
 0x273   :  { %2255 = vmatmul.msk.f32.vlgmr.msra.gmra.mxu3 %vm93_vm6, %v208_v43  ;;  %2258 = vmatmul.msk.f32.vlgmr.msrb.gmra.mxu1 %vm93_vm6, %v208_v43 }
 0x274   :  { %628 = vmatpush.msrb.mxu1 %v2659_v0  ;;  %568 = vmatpush.msra.mxu3 %v2724_v33 }
 0x276   :  { %629 = vmatpush.msrb.mxu1 %v2664_v1  ;;  %569 = vmatpush.msra.mxu3 %v2736_v35 }
 0x278   :  { %630 = vmatpush.msrb.mxu1 %v2678_v4  ;;  %570 = vmatpush.msra.mxu3 %v2746_v37 }
 0x27a   :  { %631 = vmatpush.msrb.mxu1 %v2687_v5  ;;  %571 = vmatpush.msra.mxu3 %v2758_v39 }
 0x2f0   :  { %v291_v48 = vpop.f32.mrf.mxu1 }
 0x2f1   :  { %v315_v51 = vadd.f32 %v314_v49, %v291_v48 }
 0x2f3   :  { %v317_v52 = vadd.f32 %v2707_v8, %v315_v51 }
 0x2f5   :  { %v2261_v56 = vmul.f32 -1.442695, %v317_v52 }
 0x2f6   :  { %v228_v46 = vpop.f32.mrf.mxu3 }
 0x2f7   :  { %v229_v47 = vadd.f32 %v228_v46, %v203_v44 }
 0x2f9   :  { %v234_v50 = vadd.f32 %v2797_v45, %v229_v47 }
 0x2fb   :  { %2367 = vtanh.f32 %v234_v50  ;;  %v2256_v55 = vmul.f32 -1.442695, %v234_v50 }
 0x2fc   :  { %2369 = vtanh.f32 %v317_v52 }
 0x2fd   :  { %2371 = vpow2.f32 %v2256_v55 }
 0x2fe   :  { %2373 = vpow2.f32 %v2261_v56 }
 0x301   :  { %v2368_v53 = vpop.eup %2367 }
 0x302   :  { %257 = vrot.lane.b32.xlu2 %v2368_v53, %s2560_s25  ;;  %v2370_v54 = vpop.eup %2369 }
 0x303   :  { %v2372_v57 = vpop.eup %2371 }
 0x304   :  { %v238_v58 = vadd.f32 1.0, %v2372_v57  ;;  %v2374_v59 = vpop.eup %2373 }
 0x305   :  { %v321_v60 = vadd.f32 1.0, %v2374_v59 }
 0x306   :  { %2375 = vrcp.f32 %v238_v58  ;;  %v250_v11 = vand.u32 2147483648, %v238_v58  ;;  %vm244_vm8 = vweird.f32 %v238_v58  ;;  %v248_v12 = vand.u32 2147483647, %v238_v58 }
 0x307   :  { %2377 = vrcp.f32 %v321_v60  ;;  %v333_v20 = vand.u32 2147483648, %v321_v60  ;;  %vm327_vm12 = vweird.f32 %v321_v60  ;;  %v331_v21 = vand.u32 2147483647, %v321_v60 }
 0x308   :  { %v251_v15 = vor.u32 1.1754944e-38, %v250_v11  ;;  %vm249_vm10 = vcmp.eq.f32.partialorder %v248_v12, 8.507059e+37 }
 0x309   :  { %v334_v23 = vor.u32 1.1754944e-38, %v333_v20  ;;  %vm332_vm14 = vcmp.eq.f32.partialorder %v331_v21, 8.507059e+37 }
 0x30a   :  { %340 = vrot.lane.b32.xlu2 %v2370_v54, %s2560_s25 }
 0x30c   :  { %v2376_v61 = vpop.eup %2375 }
 0x30d   :  { %v240_v62 = vmul.f32 %v2376_v61, %v238_v58  ;;  %v2378_v3 = vpop.eup %2377  ;;  %vm245_vm7 = vweird.f32 %v2376_v61 }
 0x30e   :  { %v323_v7 = vmul.f32 %v2378_v3, %v321_v60  ;;  %vm246_vm9 = vmor %vm244_vm8, %vm245_vm7  ;;  %vm328_vm11 = vweird.f32 %v2378_v3 }
 0x30f   :  { %v241_v63 = vsub.f32 1.0, %v240_v62  ;;  %vm329_vm13 = vmor %vm327_vm12, %vm328_vm11 }
 0x310   :  { %v324_v10 = vsub.f32 1.0, %v323_v7 }
 0x311   :  { %v242_v6 = vmul.f32 %v2376_v61, %v241_v63 }
 0x312   :  { %v325_v14 = vmul.f32 %v2378_v3, %v324_v10 }
 0x313   :  { %v243_v9 = vadd.f32 %v2376_v61, %v242_v6 }
 0x314   :  { %v326_v19 = vadd.f32 %v2378_v3, %v325_v14 }
 0x315   :  { %v247_v13 = vsel %vm246_vm9, %v2376_v61, %v243_v9 }
 0x316   :  { %v252_v17 = vsel %vm249_vm10, %v251_v15, %v247_v13  ;;  %v330_v22 = vsel %vm329_vm13, %v2378_v3, %v326_v19 }
 0x317   :  { %v335_v24 = vsel %vm332_vm14, %v334_v23, %v330_v22  ;;  %v255_v27 = vmul.f32 0.0, %v252_v17 }
 0x318   :  { %v338_v31 = vmul.f32 %v335_v24, %v2712_v30  ;;  %v2265_v30 = vld [vmem:[%s3342_s0 + $0x10] sm:$0xff] }
 0x319   :  { %2268 = vmatmul.msk.f32.vlgmr.msra.gmra.mxu0 %vm117_vm1, %v2265_v30 }
 0x31a   :  { %2283 = vmatpush.msk.msra.mxu0 %vm121_vm0, %v2670_v2 }
 0x35c   :  { %v258_v16 = vpop.permute.xlu2 %257 }
 0x35d   :  { %v260_v18 = vmul.f32 %v258_v16, %v252_v17 }
 0x35f   :  { %262 = vrot.lane.b32.xlu0 %v260_v18, %s2560_s25 }
 0x364   :  { %v341_v25 = vpop.permute.xlu2 %340 }
 0x365   :  { %v343_v26 = vmul.f32 %v341_v25, %v335_v24 }
 0x367   :  { %345 = vrot.lane.b32.xlu1 %v343_v26, %s2560_s25 }
 0x396   :  { %v485_v51 = vpop.f32.mrf.mxu0 }
 0x3d1   :  { %v263_v28 = vpop.permute.xlu0 %262 }
 0x3d2   :  { %v2805_v29 = vadd.f32 %v263_v28, %v255_v27 }
 0x3d4   :  { %2379 = vtanh.f32 %v2805_v29 }
 0x3d9   :  { %v346_v40 = vpop.permute.xlu1 %345 }
 0x3da   :  { %v2380_v41 = vpop.eup %2379  ;;  %v2809_v42 = vadd.f32 %v346_v40, %v338_v31 }
 0x3db   :  { %268 = vrot.lane.b32.xlu2 %v2380_v41, %s2560_s25 }
 0x3dc   :  { %2381 = vtanh.f32 %v2809_v42 }
 0x3e2   :  { %v2382_v43 = vpop.eup %2381 }
 0x3e3   :  { %351 = vrot.lane.b32.xlu0 %v2382_v43, %s2560_s25 }
 0x435   :  { %v269_v44 = vpop.permute.xlu2 %268 }
 0x436   :  { %v271_v46 = vmul.f32 %v269_v44, %v252_v17 }
 0x438   :  { %356 = vrot.lane.b32.xlu1 %v271_v46, %s2561_s28 }
 0x455   :  { %v352_v47 = vpop.permute.xlu0 %351 }
 0x456   :  { %v354_v48 = vmul.f32 %v352_v47, %v335_v24 }
 0x458   :  { %381 = vrot.lane.b32.xlu2 %v354_v48, %s2561_s28 }
 0x4aa   :  { %v357_v49 = vpop.permute.xlu1 %356 }
 0x4ab   :  { %2262 = vmatmul.msk.f32.vlgmr.msrb.gmra.mxu2 %vm93_vm6, %v357_v49 }
 0x4ac   :  { %714 = vmatpush.msrb.mxu2 %v2719_v32 }
 0x4ae   :  { %715 = vmatpush.msrb.mxu2 %v2729_v34 }
 0x4b0   :  { %716 = vmatpush.msrb.mxu2 %v2741_v36 }
 0x4b2   :  { %v382_v50 = vpop.permute.xlu2 %381  ;;  %717 = vmatpush.msrb.mxu2 %v2753_v38 }
 0x4b3   :  { %2263 = vmatmul.msk.f32.vlgmr.msrb.gmra.mxu3 %vm93_vm6, %v382_v50  ;;  %2266 = vmatmul.msk.f32.vlgmr.msra.gmra.mxu1 %vm93_vm6, %v382_v50 }
 0x4b4   :  { %739 = vmatpush.msrb.mxu3 %v2724_v33  ;;  %799 = vmatpush.msra.mxu1 %v2659_v0 }
 0x4b6   :  { %740 = vmatpush.msrb.mxu3 %v2736_v35  ;;  %800 = vmatpush.msra.mxu1 %v2664_v1 }
 0x4b8   :  { %741 = vmatpush.msrb.mxu3 %v2746_v37  ;;  %801 = vmatpush.msra.mxu1 %v2678_v4 }
 0x4ba   :  { %742 = vmatpush.msrb.mxu3 %v2758_v39  ;;  %802 = vmatpush.msra.mxu1 %v2687_v5 }
 0x52e   :  { %v377_v55 = vpop.f32.mrf.mxu2 }
 0x530   :  { %v462_v52 = vpop.f32.mrf.mxu1 }
 0x531   :  { %v486_v53 = vadd.f32 %v485_v51, %v462_v52 }
 0x533   :  { %v488_v54 = vadd.f32 %v2707_v8, %v486_v53 }
 0x535   :  { %2383 = vtanh.f32 %v488_v54  ;;  %v2269_v61 = vmul.f32 -1.442695, %v488_v54 }
 0x536   :  { %v402_v56 = vpop.f32.mrf.mxu3 }
 0x537   :  { %v403_v57 = vadd.f32 %v402_v56, %v377_v55 }
 0x539   :  { %v405_v58 = vadd.f32 %v2797_v45, %v403_v57 }
 0x53b   :  { %v2384_v59 = vpop.eup %2383  ;;  %2385 = vtanh.f32 %v405_v58  ;;  %v2264_v62 = vmul.f32 -1.442695, %v405_v58 }
 0x53c   :  { %511 = vrot.lane.b32.xlu1 %v2384_v59, %s2560_s25  ;;  %2387 = vpow2.f32 %v2269_v61 }
 0x53d   :  { %2389 = vpow2.f32 %v2264_v62 }
 0x541   :  { %v2386_v60 = vpop.eup %2385 }
 0x542   :  { %428 = vrot.lane.b32.xlu0 %v2386_v60, %s2560_s25  ;;  %v2388_v63 = vpop.eup %2387 }
 0x543   :  { %v492_v3 = vadd.f32 1.0, %v2388_v63  ;;  %v2390_v6 = vpop.eup %2389 }
 0x544   :  { %v409_v7 = vadd.f32 1.0, %v2390_v6 }
 0x545   :  { %2391 = vrcp.f32 %v492_v3  ;;  %v504_v17 = vand.u32 2147483648, %v492_v3  ;;  %vm498_vm2 = vweird.f32 %v492_v3  ;;  %v502_v18 = vand.u32 2147483647, %v492_v3 }
 0x546   :  { %2393 = vrcp.f32 %v409_v7  ;;  %v421_v25 = vand.u32 2147483648, %v409_v7  ;;  %vm415_vm7 = vweird.f32 %v409_v7  ;;  %v419_v27 = vand.u32 2147483647, %v409_v7 }
 0x547   :  { %v505_v21 = vor.u32 1.1754944e-38, %v504_v17  ;;  %vm503_vm4 = vcmp.eq.f32.partialorder %v502_v18, 8.507059e+37 }
 0x548   :  { %v422_v31 = vor.u32 1.1754944e-38, %v421_v25  ;;  %vm420_vm9 = vcmp.eq.f32.partialorder %v419_v27, 8.507059e+37 }
 0x54b   :  { %v2392_v9 = vpop.eup %2391 }
 0x54c   :  { %v494_v10 = vmul.f32 %v2392_v9, %v492_v3  ;;  %v2394_v11 = vpop.eup %2393  ;;  %vm499_vm15 = vweird.f32 %v2392_v9 }
 0x54d   :  { %v411_v13 = vmul.f32 %v2394_v11, %v409_v7  ;;  %vm500_vm3 = vmor %vm498_vm2, %vm499_vm15  ;;  %vm416_vm5 = vweird.f32 %v2394_v11 }
 0x54e   :  { %v495_v12 = vsub.f32 1.0, %v494_v10  ;;  %vm417_vm8 = vmor %vm415_vm7, %vm416_vm5 }
 0x54f   :  { %v412_v15 = vsub.f32 1.0, %v411_v13 }
 0x550   :  { %v496_v14 = vmul.f32 %v2392_v9, %v495_v12 }
 0x551   :  { %v413_v19 = vmul.f32 %v2394_v11, %v412_v15 }
 0x552   :  { %v497_v16 = vadd.f32 %v2392_v9, %v496_v14 }
 0x553   :  { %v414_v22 = vadd.f32 %v2394_v11, %v413_v19 }
 0x554   :  { %v501_v20 = vsel %vm500_vm3, %v2392_v9, %v497_v16 }
 0x555   :  { %v506_v24 = vsel %vm503_vm4, %v505_v21, %v501_v20  ;;  %v418_v28 = vsel %vm417_vm8, %v2394_v11, %v414_v22 }
 0x556   :  { %v423_v41 = vsel %vm420_vm9, %v422_v31, %v418_v28  ;;  %v509_v30 = vmul.f32 %v506_v24, %v2809_v42  ;;  %v2273_v42 = vld [vmem:[%s3342_s0 + $0x18] sm:$0xff] }
 0x557   :  { %v426_v44 = vmul.f32 %v423_v41, %v2805_v29  ;;  %2276 = vmatmul.msk.f32.vlgmr.msrb.gmra.mxu0 %vm117_vm1, %v2273_v42 }
 0x558   :  { %2291 = vmatpush.msk.msrb.mxu0 %vm121_vm0, %v2670_v2 }
 0x5ae   :  { %v512_v23 = vpop.permute.xlu1 %511 }
 0x5af   :  { %v514_v26 = vmul.f32 %v512_v23, %v506_v24 }
 0x5b1   :  { %516 = vrot.lane.b32.xlu0 %v514_v26, %s2560_s25 }
 0x5b4   :  { %v429_v40 = vpop.permute.xlu0 %428 }
 0x5b5   :  { %v431_v43 = vmul.f32 %v429_v40, %v423_v41 }
 0x5b7   :  { %433 = vrot.lane.b32.xlu2 %v431_v43, %s2560_s25 }
 0x5d4   :  { %v656_v57 = vpop.f32.mrf.mxu0 }
 0x611   :  { %v434_v46 = vpop.permute.xlu2 %433 }
 0x612   :  { %v2844_v47 = vadd.f32 %v434_v46, %v426_v44 }
 0x614   :  { %2395 = vtanh.f32 %v2844_v47 }
 0x61a   :  { %v2396_v48 = vpop.eup %2395 }
 0x61b   :  { %439 = vrot.lane.b32.xlu1 %v2396_v48, %s2560_s25 }
 0x623   :  { %v517_v49 = vpop.permute.xlu0 %516 }
 0x624   :  { %v2849_v50 = vadd.f32 %v517_v49, %v509_v30 }
 0x626   :  { %2397 = vtanh.f32 %v2849_v50 }
 0x62c   :  { %v2398_v51 = vpop.eup %2397 }
 0x62d   :  { %522 = vrot.lane.b32.xlu2 %v2398_v51, %s2560_s25 }
 0x687   :  { %v523_v52 = vpop.permute.xlu2 %522 }
 0x688   :  { %v525_v29 = vmul.f32 %v523_v52, %v506_v24 }
 0x68a   :  { %552 = vrot.lane.b32.xlu1 %v525_v29, %s2561_s28 }
 0x68d   :  { %v440_v53 = vpop.permute.xlu1 %439 }
 0x68e   :  { %v442_v54 = vmul.f32 %v440_v53, %v423_v41 }
 0x690   :  { %527 = vrot.lane.b32.xlu0 %v442_v54, %s2561_s28 }
 0x6fc   :  { %v553_v55 = vpop.permute.xlu1 %552 }
 0x6fd   :  { %2271 = vmatmul.msk.f32.vlgmr.msra.gmra.mxu3 %vm93_vm6, %v553_v55  ;;  %2274 = vmatmul.msk.f32.vlgmr.msrb.gmra.mxu1 %vm93_vm6, %v553_v55 }
 0x6fe   :  { %910 = vmatpush.msra.mxu3 %v2724_v33  ;;  %970 = vmatpush.msrb.mxu1 %v2659_v0 }
 0x700   :  { %911 = vmatpush.msra.mxu3 %v2736_v35  ;;  %971 = vmatpush.msrb.mxu1 %v2664_v1 }
 0x702   :  { %v528_v56 = vpop.permute.xlu0 %527  ;;  %912 = vmatpush.msra.mxu3 %v2746_v37  ;;  %972 = vmatpush.msrb.mxu1 %v2678_v4 }
 0x703   :  { %2270 = vmatmul.msk.f32.vlgmr.msra.gmra.mxu2 %vm93_vm6, %v528_v56 }
 0x704   :  { %913 = vmatpush.msra.mxu3 %v2758_v39  ;;  %973 = vmatpush.msrb.mxu1 %v2687_v5 }
 0x705   :  { %885 = vmatpush.msra.mxu2 %v2719_v32 }
 0x707   :  { %886 = vmatpush.msra.mxu2 %v2729_v34 }
 0x709   :  { %887 = vmatpush.msra.mxu2 %v2741_v36 }
 0x70b   :  { %888 = vmatpush.msra.mxu2 %v2753_v38 }
 0x77a   :  { %v633_v58 = vpop.f32.mrf.mxu1 }
 0x77b   :  { %v657_v59 = vadd.f32 %v656_v57, %v633_v58 }
 0x77d   :  { %v659_v60 = vadd.f32 %v2707_v8, %v657_v59 }
 0x77f   :  { %2399 = vtanh.f32 %v659_v60  ;;  %v2277_v11 = vmul.f32 -1.442695, %v659_v60 }
 0x780   :  { %v573_v62 = vpop.f32.mrf.mxu3 }
 0x785   :  { %v2400_v61 = vpop.eup %2399 }
 0x786   :  { %v548_v63 = vpop.f32.mrf.mxu2  ;;  %682 = vrot.lane.b32.xlu0 %v2400_v61, %s2560_s25 }
 0x787   :  { %v574_v3 = vadd.f32 %v573_v62, %v548_v63 }
 0x789   :  { %v576_v6 = vadd.f32 %v2797_v45, %v574_v3 }
 0x78b   :  { %2401 = vtanh.f32 %v576_v6  ;;  %v2272_v9 = vmul.f32 -1.442695, %v576_v6 }
 0x78d   :  { %2403 = vpow2.f32 %v2272_v9 }
 0x78e   :  { %2405 = vpow2.f32 %v2277_v11 }
 0x791   :  { %v2402_v7 = vpop.eup %2401 }
 0x792   :  { %599 = vrot.lane.b32.xlu2 %v2402_v7, %s2560_s25 }
 0x793   :  { %v2404_v10 = vpop.eup %2403 }
 0x794   :  { %v580_v12 = vadd.f32 1.0, %v2404_v10  ;;  %v2406_v13 = vpop.eup %2405 }
 0x795   :  { %v663_v15 = vadd.f32 1.0, %v2406_v13 }
 0x796   :  { %2407 = vrcp.f32 %v580_v12  ;;  %v592_v22 = vand.u32 2147483648, %v580_v12  ;;  %vm586_vm11 = vweird.f32 %v580_v12  ;;  %v590_v23 = vand.u32 2147483647, %v580_v12 }
 0x797   :  { %2409 = vrcp.f32 %v663_v15  ;;  %v675_v43 = vand.u32 2147483648, %v663_v15  ;;  %vm669_vm15 = vweird.f32 %v663_v15  ;;  %v673_v44 = vand.u32 2147483647, %v663_v15 }
 0x798   :  { %v593_v26 = vor.u32 1.1754944e-38, %v592_v22  ;;  %vm591_vm13 = vcmp.eq.f32.partialorder %v590_v23, 8.507059e+37 }
 0x799   :  { %v676_v48 = vor.u32 1.1754944e-38, %v675_v43  ;;  %vm674_vm3 = vcmp.eq.f32.partialorder %v673_v44, 8.507059e+37 }
 0x79c   :  { %v2408_v14 = vpop.eup %2407 }
 0x79d   :  { %v582_v16 = vmul.f32 %v2408_v14, %v580_v12  ;;  %v2410_v19 = vpop.eup %2409  ;;  %vm587_vm10 = vweird.f32 %v2408_v14 }
 0x79e   :  { %v665_v21 = vmul.f32 %v2410_v19, %v663_v15  ;;  %vm588_vm12 = vmor %vm586_vm11, %vm587_vm10  ;;  %vm670_vm14 = vweird.f32 %v2410_v19 }
 0x79f   :  { %v583_v17 = vsub.f32 1.0, %v582_v16  ;;  %vm671_vm2 = vmor %vm669_vm15, %vm670_vm14 }
 0x7a0   :  { %v666_v25 = vsub.f32 1.0, %v665_v21 }
 0x7a1   :  { %v584_v18 = vmul.f32 %v2408_v14, %v583_v17 }
 0x7a2   :  { %v667_v40 = vmul.f32 %v2410_v19, %v666_v25 }
 0x7a3   :  { %v585_v20 = vadd.f32 %v2408_v14, %v584_v18 }
 0x7a4   :  { %v668_v41 = vadd.f32 %v2410_v19, %v667_v40 }
 0x7a5   :  { %v589_v24 = vsel %vm588_vm12, %v2408_v14, %v585_v20 }
 0x7a6   :  { %v594_v28 = vsel %vm591_vm13, %v593_v26, %v589_v24  ;;  %v672_v46 = vsel %vm671_vm2, %v2410_v19, %v668_v41 }
 0x7a7   :  { %v677_v49 = vsel %vm674_vm3, %v676_v48, %v672_v46  ;;  %v597_v42 = vmul.f32 %v594_v28, %v2844_v47  ;;  %v2281_v47 = vld [vmem:[%s3342_s0 + $0x20] sm:$0xff] }
 0x7a8   :  { %v680_v52 = vmul.f32 %v677_v49, %v2849_v50  ;;  %2284 = vmatmul.msk.f32.vlgmr.msra.gmra.mxu0 %vm117_vm1, %v2281_v47 }
 0x7a9   :  { %2299 = vmatpush.msk.msra.mxu0 %vm121_vm0, %v2670_v2 }
 0x7ec   :  { %v600_v27 = vpop.permute.xlu2 %599 }
 0x7ed   :  { %v602_v31 = vmul.f32 %v600_v27, %v594_v28 }
 0x7ef   :  { %604 = vrot.lane.b32.xlu1 %v602_v31, %s2560_s25 }
 0x7f8   :  { %v683_v30 = vpop.permute.xlu0 %682 }
 0x7f9   :  { %v685_v51 = vmul.f32 %v683_v30, %v677_v49 }
 0x7fb   :  { %687 = vrot.lane.b32.xlu2 %v685_v51, %s2560_s25 }
 0x825   :  { %v827_v63 = vpop.f32.mrf.mxu0 }
 0x855   :  { %v688_v29 = vpop.permute.xlu2 %687 }
 0x856   :  { %v2883_v53 = vadd.f32 %v688_v29, %v680_v52 }
 0x858   :  { %2411 = vtanh.f32 %v2883_v53 }
 0x85e   :  { %v2412_v54 = vpop.eup %2411 }
 0x85f   :  { %693 = vrot.lane.b32.xlu1 %v2412_v54, %s2560_s25 }
 0x861   :  { %v605_v55 = vpop.permute.xlu1 %604 }
 0x862   :  { %v2888_v56 = vadd.f32 %v605_v55, %v597_v42 }
 0x864   :  { %2413 = vtanh.f32 %v2888_v56 }
 0x86a   :  { %v2414_v57 = vpop.eup %2413 }
 0x86b   :  { %610 = vrot.lane.b32.xlu0 %v2414_v57, %s2560_s25 }
 0x8d1   :  { %v694_v58 = vpop.permute.xlu1 %693 }
 0x8d2   :  { %v696_v50 = vmul.f32 %v694_v58, %v677_v49 }
 0x8d4   :  { %723 = vrot.lane.b32.xlu0 %v696_v50, %s2561_s28 }
 0x8dd   :  { %v611_v59 = vpop.permute.xlu0 %610 }
 0x8de   :  { %v613_v60 = vmul.f32 %v611_v59, %v594_v28 }
 0x8e0   :  { %698 = vrot.lane.b32.xlu2 %v613_v60, %s2561_s28 }
 0x93a   :  { %v699_v61 = vpop.permute.xlu2 %698 }
 0x93b   :  { %2278 = vmatmul.msk.f32.vlgmr.msrb.gmra.mxu2 %vm93_vm6, %v699_v61 }
 0x93c   :  { %1056 = vmatpush.msrb.mxu2 %v2719_v32 }
 0x93e   :  { %1057 = vmatpush.msrb.mxu2 %v2729_v34 }
 0x940   :  { %1058 = vmatpush.msrb.mxu2 %v2741_v36 }
 0x942   :  { %1059 = vmatpush.msrb.mxu2 %v2753_v38 }
 0x946   :  { %v724_v62 = vpop.permute.xlu0 %723 }
 0x947   :  { %2279 = vmatmul.msk.f32.vlgmr.msrb.gmra.mxu3 %vm93_vm6, %v724_v62  ;;  %2282 = vmatmul.msk.f32.vlgmr.msra.gmra.mxu1 %vm93_vm6, %v724_v62 }
 0x948   :  { %1081 = vmatpush.msrb.mxu3 %v2724_v33  ;;  %1141 = vmatpush.msra.mxu1 %v2659_v0 }
 0x94a   :  { %1082 = vmatpush.msrb.mxu3 %v2736_v35  ;;  %1142 = vmatpush.msra.mxu1 %v2664_v1 }
 0x94c   :  { %1083 = vmatpush.msrb.mxu3 %v2746_v37  ;;  %1143 = vmatpush.msra.mxu1 %v2678_v4 }
 0x94e   :  { %1084 = vmatpush.msrb.mxu3 %v2758_v39  ;;  %1144 = vmatpush.msra.mxu1 %v2687_v5 }
 0x9be   :  { %v719_v9 = vpop.f32.mrf.mxu2 }
 0x9c4   :  { %v804_v3 = vpop.f32.mrf.mxu1 }
 0x9c5   :  { %v828_v6 = vadd.f32 %v827_v63, %v804_v3 }
 0x9c7   :  { %v830_v7 = vadd.f32 %v2707_v8, %v828_v6 }
 0x9c9   :  { %2415 = vtanh.f32 %v830_v7  ;;  %v2285_v15 = vmul.f32 -1.442695, %v830_v7 }
 0x9ca   :  { %v744_v10 = vpop.f32.mrf.mxu3 }
 0x9cb   :  { %v745_v11 = vadd.f32 %v744_v10, %v719_v9 }
 0x9cd   :  { %v747_v12 = vadd.f32 %v2797_v45, %v745_v11 }
 0x9cf   :  { %v2416_v13 = vpop.eup %2415  ;;  %2417 = vtanh.f32 %v747_v12  ;;  %v2280_v20 = vmul.f32 -1.442695, %v747_v12 }
 0x9d0   :  { %853 = vrot.lane.b32.xlu2 %v2416_v13, %s2560_s25  ;;  %2419 = vpow2.f32 %v2285_v15 }
 0x9d5   :  { %v2418_v14 = vpop.eup %2417 }
 0x9d6   :  { %770 = vrot.lane.b32.xlu1 %v2418_v14, %s2560_s25  ;;  %v2420_v16 = vpop.eup %2419 }
 0x9d7   :  { %v834_v17 = vadd.f32 1.0, %v2420_v16 }
 0x9d9   :  { %2421 = vrcp.f32 %v834_v17  ;;  %v846_v24 = vand.u32 2147483648, %v834_v17  ;;  %vm840_vm5 = vweird.f32 %v834_v17  ;;  %v844_v26 = vand.u32 2147483647, %v834_v17 }
 0x9da   :  { %2423 = vpow2.f32 %v2280_v20 }
 0x9db   :  { %v847_v31 = vor.u32 1.1754944e-38, %v846_v24  ;;  %vm845_vm8 = vcmp.eq.f32.partialorder %v844_v26, 8.507059e+37 }
 0x9df   :  { %v2422_v18 = vpop.eup %2421 }
 0x9e0   :  { %v836_v19 = vmul.f32 %v2422_v18, %v834_v17  ;;  %vm841_vm4 = vweird.f32 %v2422_v18  ;;  %v2424_v25 = vpop.eup %2423 }
 0x9e1   :  { %vm842_vm7 = vmor %vm840_vm5, %vm841_vm4  ;;  %v751_v28 = vadd.f32 1.0, %v2424_v25 }
 0x9e2   :  { %v837_v21 = vsub.f32 1.0, %v836_v19 }
 0x9e3   :  { %2425 = vrcp.f32 %v751_v28  ;;  %v763_v51 = vand.u32 2147483648, %v751_v28  ;;  %vm757_vm10 = vweird.f32 %v751_v28  ;;  %v761_v52 = vand.u32 2147483647, %v751_v28 }
 0x9e4   :  { %v838_v22 = vmul.f32 %v2422_v18, %v837_v21 }
 0x9e5   :  { %v764_v54 = vor.u32 1.1754944e-38, %v763_v51  ;;  %vm762_vm12 = vcmp.eq.f32.partialorder %v761_v52, 8.507059e+37 }
 0x9e6   :  { %v839_v23 = vadd.f32 %v2422_v18, %v838_v22 }
 0x9e8   :  { %v843_v27 = vsel %vm842_vm7, %v2422_v18, %v839_v23 }
 0x9e9   :  { %v848_v41 = vsel %vm845_vm8, %v847_v31, %v843_v27  ;;  %v2426_v44 = vpop.eup %2425 }
 0x9ea   :  { %v753_v46 = vmul.f32 %v2426_v44, %v751_v28  ;;  %vm758_vm9 = vweird.f32 %v2426_v44  ;;  %v851_v58 = vmul.f32 %v848_v41, %v2883_v53 }
 0x9eb   :  { %vm759_vm11 = vmor %vm757_vm10, %vm758_vm9 }
 0x9ec   :  { %v754_v48 = vsub.f32 1.0, %v753_v46 }
 0x9ee   :  { %v755_v30 = vmul.f32 %v2426_v44, %v754_v48 }
 0x9f0   :  { %v756_v49 = vadd.f32 %v2426_v44, %v755_v30 }
 0x9f2   :  { %v760_v29 = vsel %vm759_vm11, %v2426_v44, %v756_v49 }
 0x9f3   :  { %v765_v55 = vsel %vm762_vm12, %v764_v54, %v760_v29 }
 0x9f4   :  { %v768_v47 = vmul.f32 %v765_v55, %v2888_v56  ;;  %v2289_v56 = vld [vmem:[%s3342_s0 + $0x28] sm:$0xff] }
 0x9f5   :  { %2292 = vmatmul.msk.f32.vlgmr.msrb.gmra.mxu0 %vm117_vm1, %v2289_v56  ;;  %v2554_v56 = vld [vmem:[%s3344_s5 + $0x10] sm:$0xff] }
 0x9f6   :  { %2307 = vmatpush.msk.msrb.mxu0 %vm121_vm0, %v2670_v2 }
 0xa2a   :  { %v854_v40 = vpop.permute.xlu2 %853 }
 0xa2b   :  { %v856_v43 = vmul.f32 %v854_v40, %v848_v41 }
 0xa2d   :  { %858 = vrot.lane.b32.xlu1 %v856_v43, %s2560_s25 }
 0xa48   :  { %v771_v42 = vpop.permute.xlu1 %770 }
 0xa49   :  { %v773_v57 = vmul.f32 %v771_v42, %v765_v55 }
 0xa4b   :  { %775 = vrot.lane.b32.xlu0 %v773_v57, %s2560_s25 }
 0xa9f   :  { %v859_v50 = vpop.permute.xlu1 %858 }
 0xaa0   :  { %v2922_v59 = vadd.f32 %v859_v50, %v851_v58 }
 0xaa2   :  { %2427 = vtanh.f32 %v2922_v59 }
 0xaa8   :  { %v2428_v60 = vpop.eup %2427 }
 0xaa9   :  { %864 = vrot.lane.b32.xlu0 %v2428_v60, %s2560_s25 }
 0xabd   :  { %v776_v61 = vpop.permute.xlu0 %775 }
 0xabe   :  { %v2927_v62 = vadd.f32 %v776_v61, %v768_v47 }
 0xac0   :  { %2429 = vtanh.f32 %v2927_v62 }
 0xac6   :  { %v2430_v63 = vpop.eup %2429 }
 0xac7   :  { %781 = vrot.lane.b32.xlu2 %v2430_v63, %s2560_s25 }
 0xb1b   :  { %v865_v3 = vpop.permute.xlu0 %864 }
 0xb1c   :  { %v867_v53 = vmul.f32 %v865_v3, %v848_v41  ;;  %v2551_v3 = vld [vmem:[%s3345_s4 + $0x18] sm:$0xff] }
 0xb1e   :  { %894 = vrot.lane.b32.xlu2 %v867_v53, %s2561_s28  ;;  %v2552_v53 = vld [vmem:[%s3345_s4 + $0x10] sm:$0xff] }
 0xb21   :  { %v782_v6 = vpop.permute.xlu2 %781 }
 0xb22   :  { %v784_v7 = vmul.f32 %v782_v6, %v765_v55 }
 0xb24   :  { %869 = vrot.lane.b32.xlu1 %v784_v7, %s2561_s28  ;;  %v2553_v7 = vld [vmem:[%s3344_s5 + $0x18] sm:$0xff] }
 0xb78   :  { %v895_v9 = vpop.permute.xlu2 %894 }
 0xb79   :  { %2287 = vmatmul.msk.f32.vlgmr.msra.gmra.mxu3 %vm93_vm6, %v895_v9  ;;  %2290 = vmatmul.msk.f32.vlgmr.msrb.gmra.mxu1 %vm93_vm6, %v895_v9  ;;  %v2555_v9 = vld [vmem:[%s3344_s5 + $0x8] sm:$0xff] }
 0xb7a   :  { %1252 = vmatpush.msra.mxu3 %v2724_v33  ;;  %1312 = vmatpush.msrb.mxu1 %v2659_v0  ;;  %v998_v0 = vpop.f32.mrf.mxu0 }
 0xb7c   :  { %1253 = vmatpush.msra.mxu3 %v2736_v35  ;;  %1313 = vmatpush.msrb.mxu1 %v2664_v1 }
 0xb7e   :  { %1254 = vmatpush.msra.mxu3 %v2746_v37  ;;  %1314 = vmatpush.msrb.mxu1 %v2678_v4 }
 0xb80   :  { %1255 = vmatpush.msra.mxu3 %v2758_v39  ;;  %1315 = vmatpush.msrb.mxu1 %v2687_v5 }
 0xb96   :  { %v870_v2 = vpop.permute.xlu1 %869 }
 0xb97   :  { %2286 = vmatmul.msk.f32.vlgmr.msra.gmra.mxu2 %vm93_vm6, %v870_v2 }
 0xb98   :  { %1227 = vmatpush.msra.mxu2 %v2719_v32 }
 0xb9a   :  { %1228 = vmatpush.msra.mxu2 %v2729_v34 }
 0xb9c   :  { %1229 = vmatpush.msra.mxu2 %v2741_v36 }
 0xb9e   :  { %1230 = vmatpush.msra.mxu2 %v2753_v38 }
 0xbf6   :  { %v975_v1 = vpop.f32.mrf.mxu1 }
 0xbf7   :  { %v999_v33 = vadd.f32 %v998_v0, %v975_v1  ;;  %v3002_v1 = vld [vmem:[%s3343_s3] ss:$0 sm:$0xff] }
 0xbf9   :  { %v1001_v4 = vadd.f32 %v2707_v8, %v999_v33 }
 0xbfb   :  { %2431 = vtanh.f32 %v1001_v4  ;;  %v2293_v36 = vmul.f32 -1.442695, %v1001_v4 }
 0xbfc   :  { %v915_v5 = vpop.f32.mrf.mxu3 }
 0xc01   :  { %v2432_v35 = vpop.eup %2431 }
 0xc02   :  { %1024 = vrot.lane.b32.xlu1 %v2432_v35, %s2560_s25 }
 0xc1a   :  { %v890_v10 = vpop.f32.mrf.mxu2 }
 0xc1b   :  { %v916_v11 = vadd.f32 %v915_v5, %v890_v10 }
 0xc1d   :  { %v918_v32 = vadd.f32 %v2797_v45, %v916_v11 }
 0xc1f   :  { %2433 = vtanh.f32 %v918_v32  ;;  %v2288_v16 = vmul.f32 -1.442695, %v918_v32 }
 0xc20   :  { %2435 = vpow2.f32 %v2293_v36 }
 0xc25   :  { %v2434_v34 = vpop.eup %2433 }
 0xc26   :  { %941 = vrot.lane.b32.xlu0 %v2434_v34, %s2560_s25  ;;  %v2436_v38 = vpop.eup %2435 }
 0xc27   :  { %v1005_v12 = vadd.f32 1.0, %v2436_v38 }
 0xc29   :  { %2437 = vrcp.f32 %v1005_v12  ;;  %v1017_v18 = vand.u32 2147483648, %v1005_v12  ;;  %vm1011_vm14 = vweird.f32 %v1005_v12  ;;  %v1015_v19 = vand.u32 2147483647, %v1005_v12 }
 0xc2a   :  { %2439 = vpow2.f32 %v2288_v16 }
 0xc2b   :  { %v1018_v21 = vor.u32 1.1754944e-38, %v1017_v18  ;;  %vm1016_vm2 = vcmp.eq.f32.partialorder %v1015_v19, 8.507059e+37 }
 0xc2f   :  { %v2438_v13 = vpop.eup %2437 }
 0xc30   :  { %v1007_v8 = vmul.f32 %v2438_v13, %v1005_v12  ;;  %vm1012_vm13 = vweird.f32 %v2438_v13  ;;  %v2440_v24 = vpop.eup %2439 }
 0xc31   :  { %vm1013_vm15 = vmor %vm1011_vm14, %vm1012_vm13  ;;  %v922_v26 = vadd.f32 1.0, %v2440_v24 }
 0xc32   :  { %v1008_v14 = vsub.f32 1.0, %v1007_v8 }
 0xc33   :  { %2441 = vrcp.f32 %v922_v26  ;;  %v934_v43 = vand.u32 2147483648, %v922_v26  ;;  %vm928_vm4 = vweird.f32 %v922_v26  ;;  %v932_v44 = vand.u32 2147483647, %v922_v26 }
 0xc34   :  { %v1009_v15 = vmul.f32 %v2438_v13, %v1008_v14 }
 0xc35   :  { %v935_v48 = vor.u32 1.1754944e-38, %v934_v43  ;;  %vm933_vm7 = vcmp.eq.f32.partialorder %v932_v44, 8.507059e+37 }
 0xc36   :  { %v1010_v17 = vadd.f32 %v2438_v13, %v1009_v15 }
 0xc38   :  { %v1014_v20 = vsel %vm1013_vm15, %v2438_v13, %v1010_v17 }
 0xc39   :  { %v1019_v23 = vsel %vm1016_vm2, %v1018_v21, %v1014_v20  ;;  %v2442_v27 = vpop.eup %2441 }
 0xc3a   :  { %v924_v28 = vmul.f32 %v2442_v27, %v922_v26  ;;  %vm929_vm3 = vweird.f32 %v2442_v27  ;;  %v1022_v52 = vmul.f32 %v1019_v23, %v2922_v59 }
 0xc3b   :  { %vm930_vm5 = vmor %vm928_vm4, %vm929_vm3 }
 0xc3c   :  { %v925_v31 = vsub.f32 1.0, %v924_v28 }
 0xc3e   :  { %v926_v40 = vmul.f32 %v2442_v27, %v925_v31 }
 0xc40   :  { %v927_v41 = vadd.f32 %v2442_v27, %v926_v40 }
 0xc42   :  { %v931_v46 = vsel %vm930_vm5, %v2442_v27, %v927_v41 }
 0xc43   :  { %v936_v49 = vsel %vm933_vm7, %v935_v48, %v931_v46 }
 0xc44   :  { %v939_v55 = vmul.f32 %v936_v49, %v2927_v62  ;;  %v2297_v62 = vld [vmem:[%s3342_s0 + $0x30] sm:$0xff] }
 0xc45   :  { %2300 = vmatmul.msk.f32.vlgmr.msra.gmra.mxu0 %vm117_vm1, %v2297_v62 }
 0xc74   :  { %v1025_v22 = vpop.permute.xlu1 %1024 }
 0xc75   :  { %v1027_v25 = vmul.f32 %v1025_v22, %v1019_v23 }
 0xc77   :  { %1029 = vrot.lane.b32.xlu0 %v1027_v25, %s2560_s25 }
 0xc98   :  { %v942_v30 = vpop.permute.xlu0 %941 }
 0xc99   :  { %v944_v51 = vmul.f32 %v942_v30, %v936_v49 }
 0xc9b   :  { %946 = vrot.lane.b32.xlu2 %v944_v51, %s2560_s25 }
 0xce9   :  { %v1030_v29 = vpop.permute.xlu0 %1029 }
 0xcea   :  { %v2961_v54 = vadd.f32 %v1030_v29, %v1022_v52 }
 0xcec   :  { %2443 = vtanh.f32 %v2961_v54 }
 0xcf2   :  { %v2444_v42 = vpop.eup %2443 }
 0xcf3   :  { %1035 = vrot.lane.b32.xlu2 %v2444_v42, %s2560_s25 }
 0xcf5   :  { %v947_v57 = vpop.permute.xlu2 %946 }
 0xcf6   :  { %v2966_v58 = vadd.f32 %v947_v57, %v939_v55 }
 0xcf8   :  { %2445 = vtanh.f32 %v2966_v58 }
 0xcfe   :  { %v2446_v50 = vpop.eup %2445 }
 0xcff   :  { %952 = vrot.lane.b32.xlu1 %v2446_v50, %s2560_s25 }
 0xd4d   :  { %v1036_v60 = vpop.permute.xlu2 %1035 }
 0xd4e   :  { %v1038_v59 = vmul.f32 %v1036_v60, %v1019_v23 }
 0xd50   :  { %1065 = vrot.lane.b32.xlu1 %v1038_v59, %s2561_s28 }
 0xd71   :  { %v953_v47 = vpop.permute.xlu1 %952 }
 0xd72   :  { %v955_v61 = vmul.f32 %v953_v47, %v936_v49 }
 0xd74   :  { %1040 = vrot.lane.b32.xlu0 %v955_v61, %s2561_s28 }
 0xdc2   :  { %v1066_v63 = vpop.permute.xlu1 %1065 }
 0xdc3   :  { %2295 = vmatmul.msk.f32.vlgmr.msrb.gmra.mxu3 %vm93_vm6, %v1066_v63  ;;  %2298 = vmatmul.msk.f32.vlgmr.msra.gmra.mxu1 %vm93_vm6, %v1066_v63 }
 0xdc4   :  { %1423 = vmatpush.msrb.mxu3 %v2551_v3 }
 0xdc6   :  { %1424 = vmatpush.msrb.mxu3 %v2552_v53 }
 0xdc8   :  { %1425 = vmatpush.msrb.mxu3 %v2746_v37  ;;  %v2556_v37 = vld [vmem:[%s3344_s5] sm:$0xff] }
 0xdca   :  { %1426 = vmatpush.msrb.mxu3 %v2758_v39  ;;  %v1169_v39 = vpop.f32.mrf.mxu0 }
 0xde6   :  { %v1041_v6 = vpop.permute.xlu0 %1040 }
 0xde7   :  { %2294 = vmatmul.msk.f32.vlgmr.msrb.gmra.mxu2 %vm93_vm6, %v1041_v6 }
 0xde8   :  { %1398 = vmatpush.msrb.mxu2 %v2553_v7 }
 0xdea   :  { %1399 = vmatpush.msrb.mxu2 %v2554_v56 }
 0xdec   :  { %1400 = vmatpush.msrb.mxu2 %v2555_v9 }
 0xdee   :  { %1401 = vmatpush.msrb.mxu2 %v2556_v37 }
 0xe40   :  { %v1146_v2 = vpop.f32.mrf.mxu1 }
 0xe41   :  { %v1170_v0 = vadd.f32 %v1169_v39, %v1146_v2  ;;  %v3037_v39 = vld [vmem:[%s3346_s6] ss:$0 sm:$0xff] }
 0xe43   :  { %v1172_v33 = vadd.f32 %v3002_v1, %v1170_v0 }
 0xe45   :  { %2447 = vtanh.f32 %v1172_v33  ;;  %v2301_v34 = vmul.f32 -1.442695, %v1172_v33 }
 0xe46   :  { %v1086_v35 = vpop.f32.mrf.mxu3 }
 0xe4b   :  { %v2448_v4 = vpop.eup %2447 }
 0xe4c   :  { %1195 = vrot.lane.b32.xlu0 %v2448_v4, %s2560_s25 }
 0xe6a   :  { %v1061_v5 = vpop.f32.mrf.mxu2 }
 0xe6b   :  { %v1087_v10 = vadd.f32 %v1086_v35, %v1061_v5 }
 0xe6d   :  { %v1089_v11 = vadd.f32 %v2797_v45, %v1087_v10 }
 0xe6f   :  { %2449 = vtanh.f32 %v1089_v11  ;;  %v2296_v12 = vmul.f32 -1.442695, %v1089_v11 }
 0xe70   :  { %2451 = vpow2.f32 %v2301_v34 }
 0xe75   :  { %v2450_v32 = vpop.eup %2449 }
 0xe76   :  { %1112 = vrot.lane.b32.xlu2 %v2450_v32, %s2560_s25  ;;  %v2452_v36 = vpop.eup %2451 }
 0xe77   :  { %v1176_v38 = vadd.f32 1.0, %v2452_v36 }
 0xe79   :  { %2453 = vrcp.f32 %v1176_v38  ;;  %v1188_v45 = vand.u32 2147483648, %v1176_v38  ;;  %vm1182_vm9 = vweird.f32 %v1176_v38  ;;  %v1186_v19 = vand.u32 2147483647, %v1176_v38 }
 0xe7a   :  { %2455 = vpow2.f32 %v2296_v12 }
 0xe7b   :  { %v1189_v22 = vor.u32 1.1754944e-38, %v1188_v45  ;;  %vm1187_vm11 = vcmp.eq.f32.partialorder %v1186_v19, 8.507059e+37 }
 0xe7f   :  { %v2454_v13 = vpop.eup %2453 }
 0xe80   :  { %v1178_v8 = vmul.f32 %v2454_v13, %v1176_v38  ;;  %v2456_v14 = vpop.eup %2455  ;;  %vm1183_vm8 = vweird.f32 %v2454_v13 }
 0xe81   :  { %v1093_v16 = vadd.f32 1.0, %v2456_v14  ;;  %vm1184_vm10 = vmor %vm1182_vm9, %vm1183_vm8 }
 0xe82   :  { %v1179_v15 = vsub.f32 1.0, %v1178_v8 }
 0xe83   :  { %2457 = vrcp.f32 %v1093_v16  ;;  %v1105_v40 = vand.u32 2147483648, %v1093_v16  ;;  %vm1099_vm13 = vweird.f32 %v1093_v16  ;;  %v1103_v41 = vand.u32 2147483647, %v1093_v16 }
 0xe84   :  { %v1180_v17 = vmul.f32 %v2454_v13, %v1179_v15 }
 0xe85   :  { %v1106_v44 = vor.u32 1.1754944e-38, %v1105_v40  ;;  %vm1104_vm15 = vcmp.eq.f32.partialorder %v1103_v41, 8.507059e+37 }
 0xe86   :  { %v1181_v18 = vadd.f32 %v2454_v13, %v1180_v17 }
 0xe88   :  { %v1185_v21 = vsel %vm1184_vm10, %v2454_v13, %v1181_v18 }
 0xe89   :  { %v2458_v20 = vpop.eup %2457  ;;  %v1190_v25 = vsel %vm1187_vm11, %v1189_v22, %v1185_v21 }
 0xe8a   :  { %v1095_v23 = vmul.f32 %v2458_v20, %v1093_v16  ;;  %vm1100_vm12 = vweird.f32 %v2458_v20  ;;  %v1193_v49 = vmul.f32 %v1190_v25, %v2961_v54 }
 0xe8b   :  { %vm1101_vm14 = vmor %vm1099_vm13, %vm1100_vm12 }
 0xe8c   :  { %v1096_v27 = vsub.f32 1.0, %v1095_v23 }
 0xe8e   :  { %v1097_v28 = vmul.f32 %v2458_v20, %v1096_v27 }
 0xe90   :  { %v1098_v31 = vadd.f32 %v2458_v20, %v1097_v28 }
 0xe92   :  { %v1102_v43 = vsel %vm1101_vm14, %v2458_v20, %v1098_v31 }
 0xe93   :  { %v1107_v48 = vsel %vm1104_vm15, %v1106_v44, %v1102_v43  ;;  %v2562_v44 = vmov 0  }
 0xe94   :  { %v1110_v42 = vmul.f32 %v1107_v48, %v2966_v58  ;;  %v3025_v58 = vld [vmem:[%s3342_s0 + $0x38] sm:$0xff]  ;;  %2348 = vset.pattern.permute.xlu0 %v2562_v44  ;;  %2349 = vset.pattern.permute.xlu1 %v2562_v44 }
 0xe95   :  { %2308 = vmatmul.msk.f32.vlgmr.msrb.gmra.mxu0 %vm117_vm1, %v3025_v58  ;;  %2350 = vset.pattern.permute.xlu2 %v2562_v44 }
 0xebe   :  { %v1196_v24 = vpop.permute.xlu0 %1195 }
 0xebf   :  { %v1198_v26 = vmul.f32 %v1196_v24, %v1190_v25 }
 0xec1   :  { %1200 = vrot.lane.b32.xlu2 %v1198_v26, %s2560_s25 }
 0xed0   :  { %v1113_v46 = vpop.permute.xlu2 %1112 }
 0xed1   :  { %v1115_v30 = vmul.f32 %v1113_v46, %v1107_v48 }
 0xed3   :  { %1117 = vrot.lane.b32.xlu1 %v1115_v30, %s2560_s25 }
 0xf12   :  { %v1340_v63 = vpop.f32.mrf.mxu0 }
 0xf1b   :  { %v1201_v51 = vpop.permute.xlu2 %1200 }
 0xf1c   :  { %v3011_v52 = vadd.f32 %v1201_v51, %v1193_v49  ;;  %v3057_v51 = vld [vmem:[%s3349_s8 + $0x18] sm:$0xff] }
 0xf1d   :  { %1493 = vmatpush.msra.mxu1 %v3057_v51 }
 0xf1e   :  { %2459 = vtanh.f32 %v3011_v52 }
 0xf24   :  { %v2460_v29 = vpop.eup %2459 }
 0xf25   :  { %1206 = vrot.lane.b32.xlu1 %v2460_v29, %s2560_s25  ;;  %v3068_v29 = vld [vmem:[%s3349_s8 + $0x8] sm:$0xff] }
 0xf45   :  { %v1118_v55 = vpop.permute.xlu1 %1117 }
 0xf46   :  { %v3016_v57 = vadd.f32 %v1118_v55, %v1110_v42  ;;  %v3073_v42 = vld [vmem:[%s3350_s7] sm:$0xf] }
 0xf47   :  { %2314 = vmatpush.msk.msra.mxu0 %vm121_vm0, %v3073_v42  ;;  %v3081_v55 = vld [vmem:[%s3349_s8] sm:$0xff] }
 0xf48   :  { %2461 = vtanh.f32 %v3016_v57 }
 0xf49   :  { %2321 = vmatpush.msk.msrb.mxu0 %vm121_vm0, %v3073_v42 }
 0xf4e   :  { %v2462_v50 = vpop.eup %2461 }
 0xf4f   :  { %1123 = vrot.lane.b32.xlu0 %v2462_v50, %s2560_s25 }
 0xf97   :  { %v1207_v60 = vpop.permute.xlu1 %1206 }
 0xf98   :  { %v1209_v54 = vmul.f32 %v1207_v60, %v1190_v25  ;;  %v3095_v60 = vld [vmem:[%s3347_s13] ss:$0 sm:$0xff] }
 0xf9a   :  { %1236 = vrot.lane.b32.xlu0 %v1209_v54, %s2561_s28  ;;  %v3100_v54 = vld [vmem:[%s3348_s14] ss:$0 sm:$0xff] }
 0xfc1   :  { %v1124_v59 = vpop.permute.xlu0 %1123 }
 0xfc2   :  { %v1126_v47 = vmul.f32 %v1124_v59, %v1107_v48 }
 0xfc4   :  { %1211 = vrot.lane.b32.xlu2 %v1126_v47, %s2561_s28 }
0x100c   :  { %v1237_v61 = vpop.permute.xlu0 %1236 }
0x100d   :  { %2303 = vmatmul.msk.f32.vlgmr.msra.gmra.mxu3 %vm93_vm6, %v1237_v61  ;;  %2306 = vmatmul.msk.f32.vlgmr.msrb.gmra.mxu1 %vm93_vm6, %v1237_v61 }
0x101e   :  { %v1212_v62 = vpop.permute.xlu2 %1211 }
0x101f   :  { %2302 = vmatmul.msk.f32.vlgmr.msra.gmra.mxu2 %vm93_vm6, %v1212_v62 }
0x108a   :  { %v1317_v3 = vpop.f32.mrf.mxu1 }
0x108b   :  { %v1341_v53 = vadd.f32 %v1340_v63, %v1317_v3 }
0x108d   :  { %v1343_v6 = vadd.f32 %v3002_v1, %v1341_v53 }
0x108f   :  { %2463 = vtanh.f32 %v1343_v6  ;;  %v2309_v33 = vmul.f32 -1.442695, %v1343_v6  ;;  %v3118_v6 = vld [vmem:[%s3351_s9] ss:$0 sm:$0xff] }
0x1090   :  { %v1257_v56 = vpop.f32.mrf.mxu3 }
0x1095   :  { %v2464_v7 = vpop.eup %2463 }
0x1096   :  { %1366 = vrot.lane.b32.xlu2 %v2464_v7, %s2560_s25 }
0x10a2   :  { %v1232_v9 = vpop.f32.mrf.mxu2 }
0x10a3   :  { %v1258_v37 = vadd.f32 %v1257_v56, %v1232_v9 }
0x10a5   :  { %v1260_v2 = vadd.f32 %v3037_v39, %v1258_v37 }
0x10a7   :  { %2465 = vtanh.f32 %v1260_v2  ;;  %v2304_v15 = vmul.f32 -1.442695, %v1260_v2 }
0x10a8   :  { %2467 = vpow2.f32 %v2309_v33 }
0x10ad   :  { %v2466_v0 = vpop.eup %2465 }
0x10ae   :  { %1283 = vrot.lane.b32.xlu1 %v2466_v0, %s2560_s25  ;;  %v2468_v1 = vpop.eup %2467 }
0x10af   :  { %v1347_v4 = vadd.f32 1.0, %v2468_v1 }
0x10b1   :  { %2469 = vrcp.f32 %v1347_v4  ;;  %v1359_v34 = vand.u32 2147483648, %v1347_v4  ;;  %vm1353_vm3 = vweird.f32 %v1347_v4  ;;  %v1357_v36 = vand.u32 2147483647, %v1347_v4 }
0x10b2   :  { %2471 = vpow2.f32 %v2304_v15 }
0x10b3   :  { %v1360_v12 = vor.u32 1.1754944e-38, %v1359_v34  ;;  %vm1358_vm5 = vcmp.eq.f32.partialorder %v1357_v36, 8.507059e+37 }
0x10b7   :  { %v2470_v35 = vpop.eup %2469 }
0x10b8   :  { %v1349_v5 = vmul.f32 %v2470_v35, %v1347_v4  ;;  %vm1354_vm2 = vweird.f32 %v2470_v35  ;;  %v2472_v16 = vpop.eup %2471 }
0x10b9   :  { %vm1355_vm4 = vmor %vm1353_vm3, %vm1354_vm2  ;;  %v1264_v17 = vadd.f32 1.0, %v2472_v16 }
0x10ba   :  { %v1350_v10 = vsub.f32 1.0, %v1349_v5 }
0x10bb   :  { %2473 = vrcp.f32 %v1264_v17  ;;  %v1276_v22 = vand.u32 2147483648, %v1264_v17  ;;  %vm1270_vm8 = vweird.f32 %v1264_v17  ;;  %v1274_v23 = vand.u32 2147483647, %v1264_v17 }
0x10bc   :  { %v1351_v11 = vmul.f32 %v2470_v35, %v1350_v10 }
0x10bd   :  { %v1277_v25 = vor.u32 1.1754944e-38, %v1276_v22  ;;  %vm1275_vm10 = vcmp.eq.f32.partialorder %v1274_v23, 8.507059e+37 }
0x10be   :  { %v1352_v32 = vadd.f32 %v2470_v35, %v1351_v11 }
0x10c0   :  { %v1356_v38 = vsel %vm1355_vm4, %v2470_v35, %v1352_v32 }
0x10c1   :  { %v1361_v8 = vsel %vm1358_vm5, %v1360_v12, %v1356_v38  ;;  %v2474_v18 = vpop.eup %2473 }
0x10c2   :  { %v1266_v45 = vmul.f32 %v2474_v18, %v1264_v17  ;;  %vm1271_vm7 = vweird.f32 %v2474_v18  ;;  %v1364_v31 = vmul.f32 %v1361_v8, %v3011_v52  ;;  %v3062_v52 = vld [vmem:[%s3349_s8 + $0x10] sm:$0xff]  ;;  %s2564_s8 = smov 2  }
0x10c3   :  { %vm1272_vm9 = vmor %vm1270_vm8, %vm1271_vm7  ;;  %1494 = vmatpush.msra.mxu1 %v3062_v52 }
0x10c4   :  { %v1267_v19 = vsub.f32 1.0, %v1266_v45 }
0x10c5   :  { %1495 = vmatpush.msra.mxu1 %v3068_v29 }
0x10c6   :  { %v1268_v20 = vmul.f32 %v2474_v18, %v1267_v19 }
0x10c7   :  { %1496 = vmatpush.msra.mxu1 %v3081_v55 }
0x10c8   :  { %v1269_v21 = vadd.f32 %v2474_v18, %v1268_v20 }
0x10c9   :  { %1695 = vmatpush.msrb.mxu1 %v3057_v51 }
0x10ca   :  { %v1273_v24 = vsel %vm1272_vm9, %v2474_v18, %v1269_v21 }
0x10cb   :  { %v1278_v27 = vsel %vm1275_vm10, %v1277_v25, %v1273_v24  ;;  %1696 = vmatpush.msrb.mxu1 %v3062_v52 }
0x10cc   :  { %v1281_v46 = vmul.f32 %v1278_v27, %v3016_v57 }
0x10cd   :  { %1697 = vmatpush.msrb.mxu1 %v3068_v29 }
0x10cf   :  { %1698 = vmatpush.msrb.mxu1 %v3081_v55 }
0x10f0   :  { %v1367_v13 = vpop.permute.xlu2 %1366 }
0x10f1   :  { %v1369_v14 = vmul.f32 %v1367_v13, %v1361_v8 }
0x10f3   :  { %1371 = vrot.lane.b32.xlu1 %v1369_v14, %s2560_s25 }
0x1120   :  { %v1284_v26 = vpop.permute.xlu1 %1283 }
0x1121   :  { %v1286_v28 = vmul.f32 %v1284_v26, %v1278_v27 }
0x1123   :  { %1288 = vrot.lane.b32.xlu0 %v1286_v28, %s2560_s25 }
0x1165   :  { %v1372_v40 = vpop.permute.xlu1 %1371 }
0x1166   :  { %v3044_v41 = vadd.f32 %v1372_v40, %v1364_v31 }
0x1168   :  { %2475 = vtanh.f32 %v3044_v41 }
0x116e   :  { %v2476_v43 = vpop.eup %2475 }
0x116f   :  { %1377 = vrot.lane.b32.xlu0 %v2476_v43, %s2560_s25 }
0x1177   :  { %1470 = vperm.xlu0 %2348, %v3025_v58  }
0x1195   :  { %v1289_v48 = vpop.permute.xlu0 %1288 }
0x1196   :  { %v3050_v30 = vadd.f32 %v1289_v48, %v1281_v46 }
0x1198   :  { %2477 = vtanh.f32 %v3050_v30 }
0x119e   :  { %v2478_v49 = vpop.eup %2477 }
0x119f   :  { %1294 = vrot.lane.b32.xlu2 %v2478_v49, %s2560_s25 }
0x11e1   :  { %v1378_v57 = vpop.permute.xlu0 %1377 }
0x11e2   :  { %v1380_v50 = vmul.f32 %v1378_v57, %v1361_v8 }
0x11e4   :  { %1407 = vrot.lane.b32.xlu2 %v1380_v50, %s2561_s28 }
0x11e9   :  { %v1471_v59 = vpop.permute.xlu0 %1470 }
0x11ea   :  { %v1476_v47 = vmul.f32 %v3095_v60, %v1471_v59 }
0x11ec   :  { %v1480_v58 = vadd.f32 %v3100_v54, %v1476_v47 }
0x11ee   :  { %2315 = vmatmul.msk.f32.vlgmr.msra.gmra.mxu0 %vm117_vm1, %v1480_v58  ;;  %v3140_v58 = vld [vmem:[%s3352_s10 + $0x18] sm:$0xff] }
0x11ef   :  { %2328 = vmatpush.msk.msra.mxu0 %vm121_vm0, %v3073_v42  ;;  %1610 = vmatpush.msra.mxu3 %v3140_v58 }
0x11f9   :  { %v1295_v61 = vpop.permute.xlu2 %1294 }
0x11fa   :  { %v1297_v62 = vmul.f32 %v1295_v61, %v1278_v27  ;;  %v3151_v61 = vld [vmem:[%s3352_s10 + $0x8] sm:$0xff] }
0x11fc   :  { %1382 = vrot.lane.b32.xlu1 %v1297_v62, %s2561_s28  ;;  %v3157_v62 = vld [vmem:[%s3352_s10] sm:$0xff] }
0x123e   :  { %v1408_v63 = vpop.permute.xlu2 %1407 }
0x123f   :  { %2311 = vmatmul.msk.f32.vlgmr.msrb.gmra.mxu3 %vm93_vm6, %v1408_v63  ;;  %2313 = vmatmul.msk.f32.vlgmr.msra.gmra.mxu1 %vm93_vm6, %v1408_v63  ;;  %v3167_v63 = vld [vmem:[%s3353_s11 + $0x18] sm:$0xff] }
0x1240   :  { %1880 = vmatpush.msra.mxu1 %v3057_v51  ;;  %1585 = vmatpush.msra.mxu2 %v3167_v63 }
0x1242   :  { %1881 = vmatpush.msra.mxu1 %v3062_v52 }
0x1244   :  { %1882 = vmatpush.msra.mxu1 %v3068_v29 }
0x1246   :  { %1883 = vmatpush.msra.mxu1 %v3081_v55 }
0x126b   :  { %v1524_v53 = vpop.f32.mrf.mxu0 }
0x126e   :  { %v1383_v3 = vpop.permute.xlu1 %1382 }
0x126f   :  { %2310 = vmatmul.msk.f32.vlgmr.msrb.gmra.mxu2 %vm93_vm6, %v1383_v3  ;;  %v3172_v3 = vld [vmem:[%s3353_s11 + $0x10] sm:$0xff] }
0x1270   :  { %1586 = vmatpush.msra.mxu2 %v3172_v3 }
0x12bc   :  { %v1498_v7 = vpop.f32.mrf.mxu1 }
0x12bd   :  { %v1525_v56 = vadd.f32 %v1524_v53, %v1498_v7  ;;  %v3179_v53 = vld [vmem:[%s3353_s11 + $0x8] sm:$0xff]  ;;  %v3185_v7 = vld [vmem:[%s3353_s11] sm:$0xff] }
0x12be   :  { %1587 = vmatpush.msra.mxu2 %v3179_v53 }
0x12bf   :  { %v1530_v9 = vadd.f32 %v3118_v6, %v1525_v56 }
0x12c0   :  { %1588 = vmatpush.msra.mxu2 %v3185_v7 }
0x12c1   :  { %2479 = vtanh.f32 %v1530_v9  ;;  %v2316_v1 = vmul.f32 -1.442695, %v1530_v9 }
0x12c2   :  { %v1428_v2 = vpop.f32.mrf.mxu3  ;;  %1781 = vmatpush.msrb.mxu2 %v3167_v63 }
0x12c4   :  { %1782 = vmatpush.msrb.mxu2 %v3172_v3 }
0x12c6   :  { %1783 = vmatpush.msrb.mxu2 %v3179_v53 }
0x12c7   :  { %v2480_v37 = vpop.eup %2479 }
0x12c8   :  { %1553 = vrot.lane.b32.xlu2 %v2480_v37, %s2560_s25  ;;  %1784 = vmatpush.msrb.mxu2 %v3185_v7 }
0x12f2   :  { %v1403_v0 = vpop.f32.mrf.mxu2 }
0x12f3   :  { %v1429_v33 = vadd.f32 %v1428_v2, %v1403_v0 }
0x12f5   :  { %v1431_v4 = vadd.f32 %v3037_v39, %v1429_v33 }
0x12f7   :  { %2481 = vtanh.f32 %v1431_v4  ;;  %v2312_v17 = vmul.f32 -1.442695, %v1431_v4 }
0x12f8   :  { %2483 = vpow2.f32 %v2316_v1 }
0x12fd   :  { %v2482_v35 = vpop.eup %2481 }
0x12fe   :  { %1454 = vrot.lane.b32.xlu1 %v2482_v35, %s2560_s25  ;;  %v2484_v5 = vpop.eup %2483 }
0x12ff   :  { %v1534_v10 = vadd.f32 1.0, %v2484_v5 }
0x1301   :  { %2485 = vrcp.f32 %v1534_v10  ;;  %v1546_v12 = vand.u32 2147483648, %v1534_v10  ;;  %vm1540_vm12 = vweird.f32 %v1534_v10  ;;  %v1544_v13 = vand.u32 2147483647, %v1534_v10 }
0x1302   :  { %2487 = vpow2.f32 %v2312_v17 }
0x1303   :  { %v1547_v39 = vor.u32 1.1754944e-38, %v1546_v12  ;;  %vm1545_vm14 = vcmp.eq.f32.partialorder %v1544_v13, 8.507059e+37 }
0x1307   :  { %v2486_v11 = vpop.eup %2485 }
0x1308   :  { %v1536_v32 = vmul.f32 %v2486_v11, %v1534_v10  ;;  %vm1541_vm11 = vweird.f32 %v2486_v11  ;;  %v2488_v18 = vpop.eup %2487 }
0x1309   :  { %vm1542_vm13 = vmor %vm1540_vm12, %vm1541_vm11  ;;  %v1435_v45 = vadd.f32 1.0, %v2488_v18 }
0x130a   :  { %v1537_v34 = vsub.f32 1.0, %v1536_v32 }
0x130b   :  { %2489 = vrcp.f32 %v1435_v45  ;;  %v1447_v24 = vand.u32 2147483648, %v1435_v45  ;;  %vm1441_vm2 = vweird.f32 %v1435_v45  ;;  %v1445_v25 = vand.u32 2147483647, %v1435_v45 }
0x130c   :  { %v1538_v36 = vmul.f32 %v2486_v11, %v1537_v34 }
0x130d   :  { %v1448_v27 = vor.u32 1.1754944e-38, %v1447_v24  ;;  %vm1446_vm4 = vcmp.eq.f32.partialorder %v1445_v25, 8.507059e+37 }
0x130e   :  { %v1539_v38 = vadd.f32 %v2486_v11, %v1538_v36 }
0x1310   :  { %v1543_v8 = vsel %vm1542_vm13, %v2486_v11, %v1539_v38 }
0x1311   :  { %v1548_v15 = vsel %vm1545_vm14, %v1547_v39, %v1543_v8  ;;  %v2490_v19 = vpop.eup %2489 }
0x1312   :  { %v1437_v20 = vmul.f32 %v2490_v19, %v1435_v45  ;;  %vm1442_vm15 = vweird.f32 %v2490_v19  ;;  %v1551_v43 = vmul.f32 %v1548_v15, %v3044_v41 }
0x1313   :  { %vm1443_vm3 = vmor %vm1441_vm2, %vm1442_vm15 }
0x1314   :  { %v1438_v21 = vsub.f32 1.0, %v1437_v20 }
0x1316   :  { %v1439_v22 = vmul.f32 %v2490_v19, %v1438_v21 }
0x1318   :  { %v1440_v23 = vadd.f32 %v2490_v19, %v1439_v22 }
0x131a   :  { %v1444_v26 = vsel %vm1443_vm3, %v2490_v19, %v1440_v23  ;;  %v22_v23 = vstv %s3356_s16  ;;  %s2563_s16 = smov 1  }
0x131b   :  { %v1449_v31 = vsel %vm1446_vm4, %v1448_v27, %v1444_v26  ;;  %23 = vst [vmem:[#allocation2] sm:$0x1] %v22_v23 }
0x131c   :  { %v1452_v49 = vmul.f32 %v1449_v31, %v3050_v30  ;;  %v3145_v30 = vld [vmem:[%s3352_s10 + $0x10] sm:$0xff] }
0x131d   :  { %1611 = vmatpush.msra.mxu3 %v3145_v30 }
0x131f   :  { %1612 = vmatpush.msra.mxu3 %v3151_v61 }
0x1321   :  { %1613 = vmatpush.msra.mxu3 %v3157_v62 }
0x1322   :  { %v1554_v14 = vpop.permute.xlu2 %1553  ;;  %v3234_v26 = vld [vmem:[#allocation2] ss:$0 sm:$0xff] }
0x1323   :  { %v1556_v16 = vmul.f32 %v1554_v14, %v1548_v15  ;;  %1806 = vmatpush.msrb.mxu3 %v3140_v58 }
0x1325   :  { %1558 = vrot.lane.b32.xlu2 %v1556_v16, %s2560_s25  ;;  %1807 = vmatpush.msrb.mxu3 %v3145_v30 }
0x1327   :  { %1808 = vmatpush.msrb.mxu3 %v3151_v61 }
0x1329   :  { %1809 = vmatpush.msrb.mxu3 %v3157_v62 }
0x1370   :  { %v1455_v28 = vpop.permute.xlu1 %1454 }
0x1371   :  { %v1457_v40 = vmul.f32 %v1455_v28, %v1449_v31 }
0x1373   :  { %1459 = vrot.lane.b32.xlu1 %v1457_v40, %s2560_s25 }
0x137f   :  { %v1559_v44 = vpop.permute.xlu2 %1558 }
0x1380   :  { %v3127_v46 = vadd.f32 %v1559_v44, %v1551_v43 }
0x1382   :  { %2491 = vtanh.f32 %v3127_v46 }
0x1388   :  { %v2492_v48 = vpop.eup %2491 }
0x1389   :  { %1564 = vrot.lane.b32.xlu1 %v2492_v48, %s2560_s25 }
0x13e5   :  { %v1460_v57 = vpop.permute.xlu1 %1459 }
0x13e6   :  { %v3132_v50 = vadd.f32 %v1460_v57, %v1452_v49 }
0x13e8   :  { %2493 = vtanh.f32 %v3132_v50 }
0x13ee   :  { %v2494_v59 = vpop.eup %2493 }
0x13ef   :  { %1465 = vrot.lane.b32.xlu0 %v2494_v59, %s2560_s25 }
0x13fb   :  { %v1565_v47 = vpop.permute.xlu1 %1564 }
0x13fc   :  { %v1567_v41 = vmul.f32 %v1565_v47, %v1548_v15  ;;  %v2357_v15 = vld [vmem:[%s3355_s15] ss:$0 sm:$0xff] }
0x13fe   :  { %1594 = vrot.lane.b32.xlu0 %v1567_v41, %s2561_s28 }
0x1461   :  { %v1466_v56 = vpop.permute.xlu0 %1465 }
0x1462   :  { %v1468_v9 = vmul.f32 %v1466_v56, %v1449_v31 }
0x1464   :  { %1569 = vrot.lane.b32.xlu2 %v1468_v9, %s2561_s28 }
0x1470   :  { %v1595_v37 = vpop.permute.xlu0 %1594 }
0x1471   :  { %2318 = vmatmul.msk.f32.vlgmr.msra.gmra.mxu3 %vm93_vm6, %v1595_v37  ;;  %2320 = vmatmul.msk.f32.vlgmr.msrb.gmra.mxu1 %vm93_vm6, %v1595_v37 }
0x1472   :  { %1991 = vmatpush.msra.mxu3 %v3140_v58  ;;  %2065 = vmatpush.msrb.mxu1 %v3057_v51  ;;  %v3212_v51 = vld [vmem:[%s3354_s12] ss:$0 sm:$0xff] }
0x1474   :  { %1992 = vmatpush.msra.mxu3 %v3145_v30  ;;  %2066 = vmatpush.msrb.mxu1 %v3062_v52 }
0x1476   :  { %1993 = vmatpush.msra.mxu3 %v3151_v61  ;;  %2067 = vmatpush.msrb.mxu1 %v3068_v29 }
0x1478   :  { %1994 = vmatpush.msra.mxu3 %v3157_v62  ;;  %2068 = vmatpush.msrb.mxu1 %v3081_v55 }
0x14be   :  { %v1570_v2 = vpop.permute.xlu2 %1569 }
0x14bf   :  { %2317 = vmatmul.msk.f32.vlgmr.msra.gmra.mxu2 %vm93_vm6, %v1570_v2 }
0x14c0   :  { %1966 = vmatpush.msra.mxu2 %v3167_v63 }
0x14c2   :  { %1967 = vmatpush.msra.mxu2 %v3172_v3 }
0x14c4   :  { %1968 = vmatpush.msra.mxu2 %v3179_v53 }
0x14c6   :  { %1969 = vmatpush.msra.mxu2 %v3185_v7 }
0x14ee   :  { %v1700_v44 = vpop.f32.mrf.mxu1 }
0x14f4   :  { %v1615_v52 = vpop.f32.mrf.mxu3 }
0x1542   :  { %v1590_v29 = vpop.f32.mrf.mxu2 }
0x1543   :  { %v1616_v0 = vadd.f32 %v1615_v52, %v1590_v29 }
0x1545   :  { %v1621_v55 = vadd.f32 %v3212_v51, %v1616_v0 }
0x1547   :  { %2495 = vtanh.f32 %v1621_v55  ;;  %v2319_v1 = vmul.f32 -1.442695, %v1621_v55 }
0x1549   :  { %2497 = vpow2.f32 %v2319_v1 }
0x154d   :  { %v2496_v33 = vpop.eup %2495 }
0x154e   :  { %1644 = vrot.lane.b32.xlu1 %v2496_v33, %s2560_s25 }
0x154f   :  { %v2498_v4 = vpop.eup %2497 }
0x1550   :  { %v1625_v35 = vadd.f32 1.0, %v2498_v4 }
0x1552   :  { %2499 = vrcp.f32 %v1625_v35  ;;  %v1637_v36 = vand.u32 2147483648, %v1625_v35  ;;  %vm1631_vm7 = vweird.f32 %v1625_v35  ;;  %v1635_v38 = vand.u32 2147483647, %v1625_v35 }
0x1554   :  { %v1638_v13 = vor.u32 1.1754944e-38, %v1637_v36  ;;  %vm1636_vm9 = vcmp.eq.f32.partialorder %v1635_v38, 8.507059e+37 }
0x1556   :  { %1661 = vrot.lane.b32.xlu1 %v2357_v15, %s2561_s28 }
0x1558   :  { %v2500_v5 = vpop.eup %2499 }
0x1559   :  { %v1627_v10 = vmul.f32 %v2500_v5, %v1625_v35  ;;  %vm1632_vm5 = vweird.f32 %v2500_v5 }
0x155a   :  { %vm1633_vm8 = vmor %vm1631_vm7, %vm1632_vm5 }
0x155b   :  { %v1628_v11 = vsub.f32 1.0, %v1627_v10 }
0x155d   :  { %v1629_v32 = vmul.f32 %v2500_v5, %v1628_v11 }
0x155f   :  { %v1630_v34 = vadd.f32 %v2500_v5, %v1629_v32 }
0x1561   :  { %v1634_v12 = vsel %vm1633_vm8, %v2500_v5, %v1630_v34 }
0x1562   :  { %v1639_v39 = vsel %vm1636_vm9, %v1638_v13, %v1634_v12 }
0x1563   :  { %v1642_v16 = vmul.f32 %v1639_v39, %v3132_v50 }
0x15c0   :  { %v1645_v8 = vpop.permute.xlu1 %1644 }
0x15c1   :  { %v1647_v14 = vmul.f32 %v1645_v8, %v1639_v39 }
0x15c3   :  { %1649 = vrot.lane.b32.xlu2 %v1647_v14, %s2560_s25 }
0x15c8   :  { %v3226_v20 = vpop.permute.xlu1 %1661 }
0x161d   :  { %v1650_v17 = vpop.permute.xlu2 %1649 }
0x161e   :  { %v3222_v18 = vadd.f32 %v1650_v17, %v1642_v16 }
0x1620   :  { %2501 = vtanh.f32 %v3222_v18 }
0x1626   :  { %v2502_v45 = vpop.eup %2501 }
0x1627   :  { %1655 = vrot.lane.b32.xlu0 %v2502_v45, %s2560_s25 }
0x1699   :  { %v1656_v19 = vpop.permute.xlu0 %1655 }
0x169a   :  { %v1658_v21 = vmul.f32 %v1656_v19, %v1639_v39 }
0x169c   :  { %v1664_v22 = vmul.f32 %v3226_v20, %v1658_v21 }
0x169e   :  { %1666 = vrot.lane.b32.xlu2 %v1664_v22, %s2561_s28 }
0x16f8   :  { %v1667_v24 = vpop.permute.xlu2 %1666 }
0x16f9   :  { %v1669_v25 = vsel %vm93_vm6, %v1667_v24, 0.0 }
0x16fa   :  { %1670 = vadd.xlane.f32.xlu0 %v1669_v25 }
0x176d   :  { %v1671_v27 = vpop.xlane.xlu0 %1670 }
0x176e   :  { %v3237_v28 = vadd.f32 %v3234_v26, %v1671_v27 }
0x1770   :  { %1678 = vperm.xlu1 %2349, %v3237_v28  }
0x17e2   :  { %v1679_v31 = vpop.permute.xlu1 %1678 }
0x17e3   :  { %v1681_v40 = vmul.f32 %v3095_v60, %v1679_v31 }
0x17e5   :  { %v1682_v43 = vadd.f32 %v3100_v54, %v1681_v40 }
0x17e7   :  { %2322 = vmatmul.msk.f32.vlgmr.msrb.gmra.mxu0 %vm117_vm1, %v1682_v43 }
0x17e8   :  { %2335 = vmatpush.msk.msrb.mxu0 %vm121_vm0, %v3073_v42 }
0x1864   :  { %v1723_v48 = vpop.f32.mrf.mxu0 }
0x1865   :  { %v1724_v49 = vadd.f32 %v1723_v48, %v1700_v44 }
0x1867   :  { %v1726_v57 = vadd.f32 %v3118_v6, %v1724_v49 }
0x1869   :  { %2503 = vtanh.f32 %v1726_v57  ;;  %v2323_v59 = vmul.f32 -1.442695, %v1726_v57 }
0x186b   :  { %2505 = vpow2.f32 %v2323_v59 }
0x186f   :  { %v2504_v50 = vpop.eup %2503 }
0x1870   :  { %1749 = vrot.lane.b32.xlu2 %v2504_v50, %s2560_s25 }
0x1871   :  { %v2506_v47 = vpop.eup %2505 }
0x1872   :  { %v1730_v41 = vadd.f32 1.0, %v2506_v47 }
0x1874   :  { %2507 = vrcp.f32 %v1730_v41  ;;  %v1742_v42 = vand.u32 2147483648, %v1730_v41  ;;  %vm1736_vm10 = vweird.f32 %v1730_v41  ;;  %v1740_v29 = vand.u32 2147483647, %v1730_v41 }
0x1876   :  { %v1743_v55 = vor.u32 1.1754944e-38, %v1742_v42  ;;  %vm1741_vm12 = vcmp.eq.f32.partialorder %v1740_v29, 8.507059e+37 }
0x187a   :  { %v2508_v56 = vpop.eup %2507 }
0x187b   :  { %v1732_v9 = vmul.f32 %v2508_v56, %v1730_v41  ;;  %vm1737_vm0 = vweird.f32 %v2508_v56 }
0x187c   :  { %vm1738_vm11 = vmor %vm1736_vm10, %vm1737_vm0 }
0x187d   :  { %v1733_v37 = vsub.f32 1.0, %v1732_v9 }
0x187f   :  { %v1734_v2 = vmul.f32 %v2508_v56, %v1733_v37 }
0x1881   :  { %v1735_v52 = vadd.f32 %v2508_v56, %v1734_v2 }
0x1883   :  { %v1739_v0 = vsel %vm1738_vm11, %v2508_v56, %v1735_v52 }
0x1884   :  { %v1744_v1 = vsel %vm1741_vm12, %v1743_v55, %v1739_v0 }
0x1885   :  { %v1747_v35 = vmul.f32 %v1744_v1, %v3127_v46 }
0x18ca   :  { %v1750_v33 = vpop.permute.xlu2 %1749 }
0x18cb   :  { %v1752_v4 = vmul.f32 %v1750_v33, %v1744_v1 }
0x18cd   :  { %1754 = vrot.lane.b32.xlu1 %v1752_v4, %s2560_s25 }
0x18d5   :  { %1765 = vrot.lane.b32.xlu1 %v1658_v21, %s2561_s28 }
0x193f   :  { %v1755_v5 = vpop.permute.xlu1 %1754 }
0x1940   :  { %v3250_v10 = vadd.f32 %v1755_v5, %v1747_v35 }
0x1942   :  { %2509 = vtanh.f32 %v3250_v10 }
0x1947   :  { %v1766_v11 = vpop.permute.xlu1 %1765 }
0x1948   :  { %v2510_v32 = vpop.eup %2509  ;;  %2324 = vmatmul.msk.f32.vlgmr.msrb.gmra.mxu2 %vm93_vm6, %v1766_v11 }
0x1949   :  { %1760 = vrot.lane.b32.xlu2 %v2510_v32, %s2560_s25  ;;  %2151 = vmatpush.msrb.mxu2 %v3167_v63 }
0x194b   :  { %2152 = vmatpush.msrb.mxu2 %v3172_v3 }
0x194d   :  { %2153 = vmatpush.msrb.mxu2 %v3179_v53 }
0x194f   :  { %2154 = vmatpush.msrb.mxu2 %v3185_v7 }
0x19a3   :  { %v1761_v46 = vpop.permute.xlu2 %1760 }
0x19a4   :  { %v1763_v34 = vmul.f32 %v1761_v46, %v1744_v1 }
0x19a6   :  { %1790 = vrot.lane.b32.xlu2 %v1763_v34, %s2561_s28 }
0x19cb   :  { %v1786_v63 = vpop.f32.mrf.mxu2 }
0x1a00   :  { %v1791_v36 = vpop.permute.xlu2 %1790 }
0x1a01   :  { %2325 = vmatmul.msk.f32.vlgmr.msrb.gmra.mxu3 %vm93_vm6, %v1791_v36  ;;  %2327 = vmatmul.msk.f32.vlgmr.msra.gmra.mxu1 %vm93_vm6, %v1791_v36 }
0x1a02   :  { %2176 = vmatpush.msrb.mxu3 %v3140_v58 }
0x1a04   :  { %2177 = vmatpush.msrb.mxu3 %v3145_v30 }
0x1a06   :  { %2178 = vmatpush.msrb.mxu3 %v3151_v61 }
0x1a08   :  { %2179 = vmatpush.msrb.mxu3 %v3157_v62 }
0x1a7e   :  { %v1885_v59 = vpop.f32.mrf.mxu1 }
0x1a84   :  { %v1811_v3 = vpop.f32.mrf.mxu3 }
0x1a85   :  { %v1812_v53 = vadd.f32 %v1811_v3, %v1786_v63 }
0x1a87   :  { %v1814_v7 = vadd.f32 %v3212_v51, %v1812_v53 }
0x1a89   :  { %2511 = vtanh.f32 %v1814_v7  ;;  %v2326_v12 = vmul.f32 -1.442695, %v1814_v7 }
0x1a8b   :  { %2513 = vpow2.f32 %v2326_v12 }
0x1a8f   :  { %v2512_v38 = vpop.eup %2511 }
0x1a90   :  { %1837 = vrot.lane.b32.xlu1 %v2512_v38, %s2560_s25 }
0x1a91   :  { %v2514_v13 = vpop.eup %2513 }
0x1a92   :  { %v1818_v8 = vadd.f32 1.0, %v2514_v13 }
0x1a94   :  { %2515 = vrcp.f32 %v1818_v8  ;;  %v1830_v62 = vand.u32 2147483648, %v1818_v8  ;;  %vm1824_vm14 = vweird.f32 %v1818_v8  ;;  %v1828_v15 = vand.u32 2147483647, %v1818_v8 }
0x1a96   :  { %v1831_v17 = vor.u32 1.1754944e-38, %v1830_v62  ;;  %vm1829_vm2 = vcmp.eq.f32.partialorder %v1828_v15, 8.507059e+37 }
0x1a9a   :  { %v2516_v58 = vpop.eup %2515 }
0x1a9b   :  { %v1820_v30 = vmul.f32 %v2516_v58, %v1818_v8  ;;  %vm1825_vm13 = vweird.f32 %v2516_v58 }
0x1a9c   :  { %vm1826_vm15 = vmor %vm1824_vm14, %vm1825_vm13 }
0x1a9d   :  { %v1821_v39 = vsub.f32 1.0, %v1820_v30 }
0x1a9f   :  { %v1822_v61 = vmul.f32 %v2516_v58, %v1821_v39 }
0x1aa1   :  { %v1823_v14 = vadd.f32 %v2516_v58, %v1822_v61 }
0x1aa3   :  { %v1827_v16 = vsel %vm1826_vm15, %v2516_v58, %v1823_v14 }
0x1aa4   :  { %v1832_v19 = vsel %vm1829_vm2, %v1831_v17, %v1827_v16 }
0x1aa5   :  { %v1835_v22 = vmul.f32 %v1832_v19, %v3222_v18 }
0x1b02   :  { %v1838_v45 = vpop.permute.xlu1 %1837 }
0x1b03   :  { %v1840_v21 = vmul.f32 %v1838_v45, %v1832_v19 }
0x1b05   :  { %1842 = vrot.lane.b32.xlu2 %v1840_v21, %s2560_s25 }
0x1b5f   :  { %v1843_v23 = vpop.permute.xlu2 %1842 }
0x1b60   :  { %v3270_v24 = vadd.f32 %v1843_v23, %v1835_v22 }
0x1b62   :  { %2517 = vtanh.f32 %v3270_v24 }
0x1b68   :  { %v2518_v25 = vpop.eup %2517 }
0x1b69   :  { %1848 = vrot.lane.b32.xlu1 %v2518_v25, %s2560_s25 }
0x1bdb   :  { %v1849_v27 = vpop.permute.xlu1 %1848 }
0x1bdc   :  { %v1851_v31 = vmul.f32 %v1849_v27, %v1832_v19 }
0x1bde   :  { %v1852_v40 = vmul.f32 %v1851_v31, %v3226_v20 }
0x1be0   :  { %1854 = vrot.lane.b32.xlu2 %v1852_v40, %s2561_s28 }
0x1c3a   :  { %v1855_v43 = vpop.permute.xlu2 %1854 }
0x1c3b   :  { %v1857_v44 = vsel %vm93_vm6, %v1855_v43, 0.0 }
0x1c3c   :  { %1858 = vadd.xlane.f32.xlu1 %v1857_v44 }
0x1caf   :  { %v1859_v48 = vpop.xlane.xlu1 %1858 }
0x1cb0   :  { %v3278_v18 = vadd.f32 %v3234_v26, %v1859_v48 }
0x1cb2   :  { %1863 = vperm.xlu2 %2350, %v3278_v18  }
0x1d0c   :  { %v1864_v49 = vpop.permute.xlu2 %1863 }
0x1d0d   :  { %v1866_v57 = vmul.f32 %v3095_v60, %v1864_v49 }
0x1d0f   :  { %v1867_v50 = vadd.f32 %v3100_v54, %v1866_v57 }
0x1d11   :  { %2329 = vmatmul.msk.f32.vlgmr.msra.gmra.mxu0 %vm117_vm1, %v1867_v50 }
0x1d8e   :  { %v1908_v47 = vpop.f32.mrf.mxu0 }
0x1d8f   :  { %v1909_v41 = vadd.f32 %v1908_v47, %v1885_v59 }
0x1d91   :  { %v1911_v56 = vadd.f32 %v3118_v6, %v1909_v41 }
0x1d93   :  { %2519 = vtanh.f32 %v1911_v56  ;;  %v2330_v37 = vmul.f32 -1.442695, %v1911_v56 }
0x1d95   :  { %2521 = vpow2.f32 %v2330_v37 }
0x1d99   :  { %v2520_v9 = vpop.eup %2519 }
0x1d9a   :  { %1934 = vrot.lane.b32.xlu0 %v2520_v9, %s2560_s25 }
0x1d9b   :  { %v2522_v2 = vpop.eup %2521 }
0x1d9c   :  { %v1915_v52 = vadd.f32 1.0, %v2522_v2 }
0x1d9e   :  { %2523 = vrcp.f32 %v1915_v52  ;;  %v1927_v1 = vand.u32 2147483648, %v1915_v52  ;;  %vm1921_vm4 = vweird.f32 %v1915_v52  ;;  %v1925_v4 = vand.u32 2147483647, %v1915_v52 }
0x1da0   :  { %v1928_v5 = vor.u32 1.1754944e-38, %v1927_v1  ;;  %vm1926_vm7 = vcmp.eq.f32.partialorder %v1925_v4, 8.507059e+37 }
0x1da2   :  { %1950 = vrot.lane.b32.xlu0 %v1851_v31, %s2561_s28 }
0x1da4   :  { %v2524_v42 = vpop.eup %2523 }
0x1da5   :  { %v1917_v29 = vmul.f32 %v2524_v42, %v1915_v52  ;;  %vm1922_vm3 = vweird.f32 %v2524_v42 }
0x1da6   :  { %vm1923_vm5 = vmor %vm1921_vm4, %vm1922_vm3 }
0x1da7   :  { %v1918_v0 = vsub.f32 1.0, %v1917_v29 }
0x1da9   :  { %v1919_v55 = vmul.f32 %v2524_v42, %v1918_v0 }
0x1dab   :  { %v1920_v33 = vadd.f32 %v2524_v42, %v1919_v55 }
0x1dad   :  { %v1924_v35 = vsel %vm1923_vm5, %v2524_v42, %v1920_v33  ;;  %vm2241_vm5 = vcmask 7168  }
0x1dae   :  { %v1929_v32 = vsel %vm1926_vm7, %v1928_v5, %v1924_v35  ;;  %vm2243_vm7 = vcmask 15360  }
0x1daf   :  { %v1932_v36 = vmul.f32 %v1929_v32, %v3250_v10 }
0x1e0c   :  { %v1935_v11 = vpop.permute.xlu0 %1934 }
0x1e0d   :  { %v1937_v46 = vmul.f32 %v1935_v11, %v1929_v32 }
0x1e0f   :  { %1939 = vrot.lane.b32.xlu2 %v1937_v46, %s2560_s25 }
0x1e14   :  { %v1951_v34 = vpop.permute.xlu0 %1950 }
0x1e15   :  { %2331 = vmatmul.msk.f32.vlgmr.msra.gmra.mxu2 %vm93_vm6, %v1951_v34 }
0x1e69   :  { %v1940_v63 = vpop.permute.xlu2 %1939 }
0x1e6a   :  { %v3290_v3 = vadd.f32 %v1940_v63, %v1932_v36 }
0x1e6c   :  { %2525 = vtanh.f32 %v3290_v3 }
0x1e72   :  { %v2526_v53 = vpop.eup %2525 }
0x1e73   :  { %1945 = vrot.lane.b32.xlu2 %v2526_v53, %s2560_s25 }
0x1e98   :  { %v1971_v13 = vpop.f32.mrf.mxu2 }
0x1ecd   :  { %v1946_v7 = vpop.permute.xlu2 %1945 }
0x1ece   :  { %v1948_v38 = vmul.f32 %v1946_v7, %v1929_v32 }
0x1ed0   :  { %1975 = vrot.lane.b32.xlu2 %v1948_v38, %s2561_s28 }
0x1f2a   :  { %v1976_v12 = vpop.permute.xlu2 %1975 }
0x1f2b   :  { %2332 = vmatmul.msk.f32.vlgmr.msra.gmra.mxu3 %vm93_vm6, %v1976_v12  ;;  %2334 = vmatmul.msk.f32.vlgmr.msrb.gmra.mxu1 %vm93_vm6, %v1976_v12 }
0x1fa8   :  { %v2070_v2 = vpop.f32.mrf.mxu1 }
0x1fae   :  { %v1996_v8 = vpop.f32.mrf.mxu3 }
0x1faf   :  { %v1997_v10 = vadd.f32 %v1996_v8, %v1971_v13 }
0x1fb1   :  { %v1999_v58 = vadd.f32 %v3212_v51, %v1997_v10 }
0x1fb3   :  { %2527 = vtanh.f32 %v1999_v58  ;;  %v2333_v39 = vmul.f32 -1.442695, %v1999_v58 }
0x1fb5   :  { %2529 = vpow2.f32 %v2333_v39 }
0x1fb9   :  { %v2528_v30 = vpop.eup %2527 }
0x1fba   :  { %2022 = vrot.lane.b32.xlu0 %v2528_v30, %s2560_s25 }
0x1fbb   :  { %v2530_v61 = vpop.eup %2529 }
0x1fbc   :  { %v2003_v14 = vadd.f32 1.0, %v2530_v61 }
0x1fbe   :  { %2531 = vrcp.f32 %v2003_v14  ;;  %v2015_v19 = vand.u32 2147483648, %v2003_v14  ;;  %vm2009_vm9 = vweird.f32 %v2003_v14  ;;  %v2013_v21 = vand.u32 2147483647, %v2003_v14 }
0x1fc0   :  { %v2016_v23 = vor.u32 1.1754944e-38, %v2015_v19  ;;  %vm2014_vm10 = vcmp.eq.f32.partialorder %v2013_v21, 8.507059e+37 }
0x1fc4   :  { %v2532_v62 = vpop.eup %2531 }
0x1fc5   :  { %v2005_v15 = vmul.f32 %v2532_v62, %v2003_v14  ;;  %vm2010_vm8 = vweird.f32 %v2532_v62 }
0x1fc6   :  { %vm2011_vm0 = vmor %vm2009_vm9, %vm2010_vm8  ;;  %vm2245_vm8 = vcmask 23552  }
0x1fc7   :  { %v2006_v16 = vsub.f32 1.0, %v2005_v15 }
0x1fc9   :  { %v2007_v17 = vmul.f32 %v2532_v62, %v2006_v16 }
0x1fcb   :  { %v2008_v45 = vadd.f32 %v2532_v62, %v2007_v17 }
0x1fcd   :  { %v2012_v22 = vsel %vm2011_vm0, %v2532_v62, %v2008_v45 }
0x1fce   :  { %v2017_v27 = vsel %vm2014_vm10, %v2016_v23, %v2012_v22 }
0x1fcf   :  { %v2020_v40 = vmul.f32 %v2017_v27, %v3270_v24 }
0x202c   :  { %v2023_v25 = vpop.permute.xlu0 %2022 }
0x202d   :  { %v2025_v31 = vmul.f32 %v2023_v25, %v2017_v27 }
0x202f   :  { %2027 = vrot.lane.b32.xlu2 %v2025_v31, %s2560_s25 }
0x2089   :  { %v2028_v43 = vpop.permute.xlu2 %2027 }
0x208a   :  { %v3301_v44 = vadd.f32 %v2028_v43, %v2020_v40 }
0x208c   :  { %2533 = vtanh.f32 %v3301_v44 }
0x2092   :  { %v2534_v48 = vpop.eup %2533 }
0x2093   :  { %2033 = vrot.lane.b32.xlu0 %v2534_v48, %s2560_s25 }
0x2105   :  { %v2034_v49 = vpop.permute.xlu0 %2033 }
0x2106   :  { %v2036_v57 = vmul.f32 %v2034_v49, %v2017_v27 }
0x2108   :  { %v2037_v50 = vmul.f32 %v2036_v57, %v3226_v20 }
0x210a   :  { %2039 = vrot.lane.b32.xlu2 %v2037_v50, %s2561_s28 }
0x2164   :  { %v2040_v59 = vpop.permute.xlu2 %2039 }
0x2165   :  { %v2042_v47 = vsel %vm93_vm6, %v2040_v59, 0.0 }
0x2166   :  { %2043 = vadd.xlane.f32.xlu1 %v2042_v47 }
0x21d9   :  { %v2044_v41 = vpop.xlane.xlu1 %2043 }
0x21da   :  { %v3309_v24 = vadd.f32 %v3234_v26, %v2044_v41 }
0x21dc   :  { %2048 = vperm.xlu0 %2348, %v3309_v24  }
0x224e   :  { %v2049_v56 = vpop.permute.xlu0 %2048 }
0x224f   :  { %v2051_v9 = vmul.f32 %v3095_v60, %v2049_v56 }
0x2251   :  { %v2052_v37 = vadd.f32 %v3100_v54, %v2051_v9 }
0x2253   :  { %2336 = vmatmul.msk.f32.vlgmr.msrb.gmra.mxu0 %vm117_vm1, %v2052_v37 }
0x22d0   :  { %v2093_v52 = vpop.f32.mrf.mxu0 }
0x22d1   :  { %v2094_v42 = vadd.f32 %v2093_v52, %v2070_v2 }
0x22d3   :  { %v2096_v29 = vadd.f32 %v3118_v6, %v2094_v42 }
0x22d5   :  { %2535 = vtanh.f32 %v2096_v29  ;;  %v2337_v55 = vmul.f32 -1.442695, %v2096_v29 }
0x22d7   :  { %2537 = vpow2.f32 %v2337_v55 }
0x22db   :  { %v2536_v0 = vpop.eup %2535 }
0x22dc   :  { %2119 = vrot.lane.b32.xlu2 %v2536_v0, %s2560_s25 }
0x22dd   :  { %v2538_v33 = vpop.eup %2537 }
0x22de   :  { %v2100_v1 = vadd.f32 1.0, %v2538_v33 }
0x22e0   :  { %2539 = vrcp.f32 %v2100_v1  ;;  %v2112_v11 = vand.u32 2147483648, %v2100_v1  ;;  %vm2106_vm12 = vweird.f32 %v2100_v1  ;;  %v2110_v6 = vand.u32 2147483647, %v2100_v1 }
0x22e2   :  { %v2113_v46 = vor.u32 1.1754944e-38, %v2112_v11  ;;  %vm2111_vm14 = vcmp.eq.f32.partialorder %v2110_v6, 8.507059e+37 }
0x22e4   :  { %2135 = vrot.lane.b32.xlu2 %v2036_v57, %s2561_s28 }
0x22e6   :  { %v2540_v60 = vpop.eup %2539 }
0x22e7   :  { %v2102_v54 = vmul.f32 %v2540_v60, %v2100_v1  ;;  %vm2107_vm11 = vweird.f32 %v2540_v60 }
0x22e8   :  { %vm2108_vm13 = vmor %vm2106_vm12, %vm2107_vm11 }
0x22e9   :  { %v2103_v4 = vsub.f32 1.0, %v2102_v54 }
0x22eb   :  { %v2104_v35 = vmul.f32 %v2540_v60, %v2103_v4 }
0x22ed   :  { %v2105_v5 = vadd.f32 %v2540_v60, %v2104_v35 }
0x22ef   :  { %v2109_v32 = vsel %vm2108_vm13, %v2540_v60, %v2105_v5 }
0x22f0   :  { %v2114_v36 = vsel %vm2111_vm14, %v2113_v46, %v2109_v32 }
0x22f1   :  { %v2117_v7 = vmul.f32 %v2114_v36, %v3290_v3 }
0x2336   :  { %v2120_v34 = vpop.permute.xlu2 %2119 }
0x2337   :  { %v2122_v63 = vmul.f32 %v2120_v34, %v2114_v36 }
0x2339   :  { %2124 = vrot.lane.b32.xlu1 %v2122_v63, %s2560_s25 }
0x233e   :  { %v2136_v53 = vpop.permute.xlu2 %2135 }
0x233f   :  { %2338 = vmatmul.msk.f32.vlgmr.msrb.gmra.mxu2 %vm93_vm6, %v2136_v53 }
0x23ab   :  { %v2125_v38 = vpop.permute.xlu1 %2124 }
0x23ac   :  { %v2127_v12 = vadd.f32 %v2125_v38, %v2117_v7 }
0x23ae   :  { %2541 = vtanh.f32 %v2127_v12 }
0x23b4   :  { %v2542_v13 = vpop.eup %2541 }
0x23b5   :  { %2130 = vrot.lane.b32.xlu0 %v2542_v13, %s2560_s25 }
0x23c2   :  { %v2156_v30 = vpop.f32.mrf.mxu2 }
0x2427   :  { %v2131_v8 = vpop.permute.xlu0 %2130 }
0x2428   :  { %v2133_v10 = vmul.f32 %v2131_v8, %v2114_v36 }
0x242a   :  { %2160 = vrot.lane.b32.xlu0 %v2133_v10, %s2561_s28 }
0x249c   :  { %v2161_v58 = vpop.permute.xlu0 %2160 }
0x249d   :  { %2339 = vmatmul.msk.f32.vlgmr.msrb.gmra.mxu3 %vm93_vm6, %v2161_v58 }
0x2520   :  { %v2181_v39 = vpop.f32.mrf.mxu3 }
0x2521   :  { %v2182_v61 = vadd.f32 %v2181_v39, %v2156_v30 }
0x2523   :  { %v2184_v14 = vadd.f32 %v3212_v51, %v2182_v61 }
0x2525   :  { %2543 = vtanh.f32 %v2184_v14  ;;  %v2340_v62 = vmul.f32 -1.442695, %v2184_v14 }
0x2527   :  { %2545 = vpow2.f32 %v2340_v62 }
0x252b   :  { %v2544_v3 = vpop.eup %2543 }
0x252c   :  { %2207 = vrot.lane.b32.xlu2 %v2544_v3, %s2560_s25 }
0x252d   :  { %v2546_v15 = vpop.eup %2545 }
0x252e   :  { %v2188_v16 = vadd.f32 1.0, %v2546_v15 }
0x2530   :  { %2547 = vrcp.f32 %v2188_v16  ;;  %v2200_v23 = vand.u32 2147483648, %v2188_v16  ;;  %vm2194_vm2 = vweird.f32 %v2188_v16  ;;  %v2198_v25 = vand.u32 2147483647, %v2188_v16 }
0x2532   :  { %v2201_v27 = vor.u32 1.1754944e-38, %v2200_v23  ;;  %vm2199_vm4 = vcmp.eq.f32.partialorder %v2198_v25, 8.507059e+37 }
0x2536   :  { %v2548_v17 = vpop.eup %2547 }
0x2537   :  { %v2190_v45 = vmul.f32 %v2548_v17, %v2188_v16  ;;  %vm2195_vm15 = vweird.f32 %v2548_v17 }
0x2538   :  { %vm2196_vm3 = vmor %vm2194_vm2, %vm2195_vm15 }
0x2539   :  { %v2191_v19 = vsub.f32 1.0, %v2190_v45 }
0x253b   :  { %v2192_v21 = vmul.f32 %v2548_v17, %v2191_v19 }
0x253d   :  { %v2193_v22 = vadd.f32 %v2548_v17, %v2192_v21 }
0x253f   :  { %v2197_v51 = vsel %vm2196_vm3, %v2548_v17, %v2193_v22 }
0x2540   :  { %v2202_v40 = vsel %vm2199_vm4, %v2201_v27, %v2197_v51 }
0x2541   :  { %v2205_v48 = vmul.f32 %v2202_v40, %v3301_v44 }
0x2586   :  { %v2208_v31 = vpop.permute.xlu2 %2207 }
0x2587   :  { %v2210_v43 = vmul.f32 %v2208_v31, %v2202_v40 }
0x2589   :  { %2212 = vrot.lane.b32.xlu0 %v2210_v43, %s2560_s25 }
0x25fb   :  { %v2213_v49 = vpop.permute.xlu0 %2212 }
0x25fc   :  { %v2215_v57 = vadd.f32 %v2213_v49, %v2205_v48 }
0x25fe   :  { %2549 = vtanh.f32 %v2215_v57 }
0x2604   :  { %v2550_v50 = vpop.eup %2549 }
0x2605   :  { %2218 = vrot.lane.b32.xlu2 %v2550_v50, %s2560_s25  ;;  %s2565_s25 = smov 3  }
0x260d   :  { %2231 = vrot.lane.b32.xlu2 %v3278_v18, %s2563_s16 }
0x265f   :  { %v2219_v59 = vpop.permute.xlu2 %2218 }
0x2660   :  { %v2221_v47 = vmul.f32 %v2219_v59, %v2202_v40 }
0x2662   :  { %v2222_v41 = vmul.f32 %v2221_v47, %v3226_v20 }
0x2664   :  { %2224 = vrot.lane.b32.xlu1 %v2222_v41, %s2561_s28 }
0x2667   :  { %v2232_v2 = vpop.permute.xlu2 %2231 }
0x2668   :  { %v2242_v20 = vsel %vm2241_vm5, %v3237_v28, %v2232_v2 }
0x266c   :  { %2234 = vrot.lane.b32.xlu1 %v3309_v24, %s2564_s8 }
0x26d6   :  { %v2225_v56 = vpop.permute.xlu1 %2224 }
0x26d7   :  { %v2227_v44 = vsel %vm93_vm6, %v2225_v56, 0.0 }
0x26d8   :  { %2228 = vadd.xlane.f32.xlu0 %v2227_v44 }
0x26de   :  { %v2235_v18 = vpop.permute.xlu1 %2234 }
0x26df   :  { %v2244_v52 = vsel %vm2243_vm7, %v2242_v20, %v2235_v18 }
0x274b   :  { %v2229_v9 = vpop.xlane.xlu0 %2228 }
0x274c   :  { %v2230_v37 = vadd.f32 %v3234_v26, %v2229_v9 }
0x274e   :  { %2238 = vrot.lane.b32.xlu2 %v2230_v37, %s2565_s25 }
0x27a8   :  { %v2239_v42 = vpop.permute.xlu2 %2238 }
0x27a9   :  { %v2246_v29 = vsel %vm2245_vm8, %v2244_v52, %v2239_v42 }
0x27aa   :  { %2247 = vst.msk [vmem:[%s3357_s17] sm:$0xff] %vm117_vm1, %v2246_v29 }

</bundles_post_ra>
